<compile_context>
chip_gen: v6e
topology: v6e:2x2x1
jax: 0.10.0
libtpu: 0.0.40
codegen_flags: <defaults>
</compile_context>

<pallas_src>
import functools
import math

import jax
import jax.numpy as jnp
from jax.experimental import pallas as pl
from jax.experimental.pallas import tpu as pltpu  # noqa: F401  (TPU backend)

# ----------------------------- configuration --------------------------------
PAD_TOKEN = 0.0

D_H = 32            # args['d_h']
NUM_HEAD = 2        # args['num_head']
NUM_LAYER = 2       # args['num_layer']
D_FF = 2048         # PyTorch nn.TransformerEncoderLayer default dim_feedforward
EMB_SIZE = 10       # discrete-feature embedding size (hard-coded in __init__)
U_EMB_SIZE = 10     # user-embedding input size (hard-coded in __init__)
LN_EPS = 1e-5
DEC_PAD = 128       # lane-dense decoder output width (sliced back to D_OUT)

FEATURE_LIST = [
    {'name': 'lat',  'type': 'continuous', 'idx': 0},
    {'name': 'lon',  'type': 'continuous', 'idx': 1},
    {'name': 'poi',  'type': 'discrete',   'idx': 2, 'class_num': 5},
    {'name': 'mode', 'type': 'discrete',   'idx': 3, 'class_num': 7},
]
CON_IDX = [f['idx'] for f in FEATURE_LIST if f['type'] == 'continuous']
DIS_FEATURES = [f for f in FEATURE_LIST if f['type'] == 'discrete']
D_C = len(CON_IDX)
D_OUT = D_C + sum(f['class_num'] for f in DIS_FEATURES)     # fused decoder width
D_IN = D_C + sum(f['class_num'] for f in DIS_FEATURES) + U_EMB_SIZE  # 24
POSITION2IDX = {'seq_pos': 0}

POS_MODE = 'use'                    # anything != 'no_use'
USER_MODE = 'before_transformer'


# ----------------------------- Pallas kernel ---------------------------------
def _layer_norm(x, gamma, beta):
    mu = jnp.mean(x, axis=-1, keepdims=True)
    var = jnp.mean((x - mu) ** 2, axis=-1, keepdims=True)
    return (x - mu) * jax.lax.rsqrt(var + LN_EPS) * gamma + beta


def _fused_forward_kernel(emb_ref, pos_ref, mask_ref,
                          w_emb_ref, wqkv_ref, wo_ref, w1_ref, w2_ref,
                          lvec_ref, dec_ref, out_ref, *, n_layer, n_head):
    """Whole VanillaTransformer forward for one (B, L) batch, fully in VMEM.

    Consolidated operands (10 inputs):
      emb_ref   (B*L, D_IN)                fused [con | oh0 | oh1 | user] input
      pos_ref   (B*L, d_h)                 pos encoding + summed embedding biases
      mask_ref  (B, 1, L)                  additive key-padding mask (0 / -1e9)
      w_emb_ref (D_IN, d_h)                fused [W_con; tab0; tab1; W_user]
      wqkv_ref  (n_layer*n_head*3, d_h+1, hd)  per-head [W; b] for Q, K, V
      wo_ref    (n_layer*n_head, hd, d_h)  per-head row-block of W_o
      w1_ref    (n_layer, d_h+1, d_ff)     [W1; b1]
      w2_ref    (n_layer, d_ff, d_h)       W2
      lvec_ref  (n_layer, 6, d_h)          rows: b_o, b2, g1, be1, g2, be2
      dec_ref   (d_h+1, DEC_PAD)           fused decoder [W; b], lane-padded
    """
    f32 = jnp.float32
    B = mask_ref.shape[0]
    L = mask_ref.shape[2]
    BL = B * L
    d_h = w_emb_ref.shape[1]
    hd = wqkv_ref.shape[2]
    scale = 1.0 / math.sqrt(hd)

    # ----- fused input embeddings: ONE (BL, D_IN) @ (D_IN, d_h) matmul -------
    h = jnp.dot(emb_ref[...], w_emb_ref[...],
                preferred_element_type=f32) + pos_ref[...]            # (BL, d_h)

    madd = mask_ref[...]                                              # (B, 1, L)

    # ----- transformer encoder (post-LN, ReLU FFN) ----------------------------
    for l in range(n_layer):
        lv = lvec_ref[l]                     # (6, d_h) per-layer vector table

        # Multi-head self-attention: batched over B via einsum; static
        # 2-iteration head loop over pre-split per-head weights.  No per-batch
        # unrolling, no lane-slicing of activations, no context concat.
        attn = None
        for hh in range(n_head):
            base = (l * n_head + hh) * 3
            wq = wqkv_ref[base + 0]          # (d_h+1, hd): [W_q; b_q]
            wk = wqkv_ref[base + 1]
            wv = wqkv_ref[base + 2]
            q = jnp.dot(h, wq[:d_h, :], preferred_element_type=f32) + wq[d_h:, :]
            k = jnp.dot(h, wk[:d_h, :], preferred_element_type=f32) + wk[d_h:, :]
            v = jnp.dot(h, wv[:d_h, :], preferred_element_type=f32) + wv[d_h:, :]
            q3 = q.reshape(B, L, hd)
            k3 = k.reshape(B, L, hd)
            v3 = v.reshape(B, L, hd)
            s = jnp.einsum('bqd,bkd->bqk', q3, k3,
                           preferred_element_type=f32) * scale + madd
            s = s - jnp.max(s, axis=-1, keepdims=True)
            p = jnp.exp(s)
            p = p / jnp.sum(p, axis=-1, keepdims=True)   # exact softmax denom
            ctx = jnp.einsum('bqk,bkd->bqd', p, v3,
                             preferred_element_type=f32)              # (B, L, hd)
            contrib = jnp.dot(ctx.reshape(BL, hd), wo_ref[l * n_head + hh],
                              preferred_element_type=f32)             # (BL, d_h)
            attn = contrib if attn is None else attn + contrib
        attn = attn + lv[0:1, :]                                      # + b_o

        x1 = _layer_norm(h + attn, lv[2:3, :], lv[3:4, :])            # g1, be1

        # FFN on the flattened (BL, d_h) token slab, all-f32 (v5e-friendly).
        w1b = w1_ref[l]                                               # (d_h+1, d_ff)
        ff = jnp.dot(x1, w1b[:d_h, :], preferred_element_type=f32) + w1b[d_h:, :]
        ff = jnp.maximum(ff, 0.0)
        ff = jnp.dot(ff, w2_ref[l], preferred_element_type=f32) + lv[1:2, :]
        h = _layer_norm(x1 + ff, lv[4:5, :], lv[5:6, :])              # g2, be2

    # ----- fused, lane-dense decoder heads ------------------------------------
    dec = dec_ref[...]                                                # (d_h+1, 128)
    out_ref[...] = jnp.dot(h, dec[:d_h, :],
                           preferred_element_type=f32) + dec[d_h:, :]


# ----------------------------- plain-JAX glue ---------------------------------
def positional_encode(pos_seq):
    """Non-learnable sinusoidal positional encoding.  pos_seq: (B, L) float."""
    B, L = pos_seq.shape
    inv_freq = 1.0 / (10000.0 ** (jnp.arange(0.0, D_H, 2.0) / D_H))   # (D_H/2,)
    sinusoid = pos_seq.reshape(-1)[:, None] * inv_freq[None, :]       # (B*L, D_H/2)
    pe = jnp.concatenate([jnp.sin(sinusoid), jnp.cos(sinusoid)], axis=-1)
    return pe.reshape(B, L, D_H)


def init_params(key):
    """Deterministic synthetic parameters (weights stored as (in, out))."""
    keys = iter(jax.random.split(key, 64))

    def w(shape, scale=0.1):
        return scale * jax.random.normal(next(keys), shape, dtype=jnp.float32)

    params = {
        'emb_con': {'w': w((D_C, D_H)), 'b': w((D_H,))},
        'emb_user': {'w': w((U_EMB_SIZE, D_H)), 'b': w((D_H,))},
        'emb_dis': [],
        'dec_con': {'w': w((D_H, D_C)), 'b': w((D_C,))},
        'dec_dis': [],
        'layers': [],
    }
    for f in DIS_FEATURES:
        params['emb_dis'].append({'table': w((f['class_num'], EMB_SIZE)),
                                  'w': w((EMB_SIZE, D_H)), 'b': w((D_H,))})
    for f in DIS_FEATURES:
        params['dec_dis'].append({'w': w((D_H, f['class_num'])),
                                  'b': w((f['class_num'],))})
    for _ in range(NUM_LAYER):
        params['layers'].append({
            'w_qkv': w((D_H, 3 * D_H)), 'b_qkv': w((3 * D_H,)),
            'w_o': w((D_H, D_H)), 'b_o': w((D_H,)),
            'w1': w((D_H, D_FF)), 'b1': w((D_FF,)),
            'w2': w((D_FF, D_H)), 'b2': w((D_H,)),
            'g1': jnp.ones((D_H,), jnp.float32),
            'be1': jnp.zeros((D_H,), jnp.float32),
            'g2': jnp.ones((D_H,), jnp.float32),
            'be2': jnp.zeros((D_H,), jnp.float32),
        })
    return params


def pack_params(params):
    """One-time, parameter-only repacking for the fused kernel (10 operands)."""
    assert len(DIS_FEATURES) == 2, "kernel packing assumes 2 discrete features"
    hd = D_H // NUM_HEAD
    layers = params['layers']

    # fused input-embedding weight: [W_con; table0@W0; table1@W1; W_user]
    tabs = [jnp.dot(ed['table'], ed['w']) for ed in params['emb_dis']]
    w_emb = jnp.concatenate([params['emb_con']['w']] + tabs +
                            [params['emb_user']['w']], axis=0)        # (D_IN, D_H)
    assert w_emb.shape == (D_IN, D_H)
    b_emb_base = (params['emb_con']['b'] +
                  sum(ed['b'] for ed in params['emb_dis'])).reshape(1, D_H)

    # per-head attention weights, bias packed as an extra row; W_o split by
    # per-head input rows so no head-concat is needed in-kernel.
    wqkv_rows, wo_rows = [], []
    for lp in layers:
        w_q, w_k, w_v = (lp['w_qkv'][:, i * D_H:(i + 1) * D_H] for i in range(3))
        b_q, b_k, b_v = (lp['b_qkv'][i * D_H:(i + 1) * D_H] for i in range(3))
        for hh in range(NUM_HEAD):
            s = hh * hd
            for w_m, b_m in ((w_q, b_q), (w_k, b_k), (w_v, b_v)):
                wqkv_rows.append(jnp.concatenate(
                    [w_m[:, s:s + hd], b_m[s:s + hd][None, :]], axis=0))  # (D_H+1, hd)
            wo_rows.append(lp['w_o'][s:s + hd, :])                        # (hd, D_H)

    # fused, lane-dense decoder: [W; b] padded to DEC_PAD columns
    dec_w = jnp.concatenate([params['dec_con']['w']] +
                            [d['w'] for d in params['dec_dis']], axis=1)  # (D_H, D_OUT)
    dec_b = jnp.concatenate([params['dec_con']['b']] +
                            [d['b'] for d in params['dec_dis']])          # (D_OUT,)
    dec_wb = jnp.zeros((D_H + 1, DEC_PAD), jnp.float32)
    dec_wb = dec_wb.at[:D_H, :D_OUT].set(dec_w).at[D_H, :D_OUT].set(dec_b)

    packed = {
        'w_emb': w_emb,
        'b_emb_base': b_emb_base,
        'w_user': params['emb_user']['w'],
        'b_user': params['emb_user']['b'].reshape(1, D_H),
        'wqkv_h': jnp.stack(wqkv_rows),      # (n_layer*n_head*3, D_H+1, hd)
        'wo_h': jnp.stack(wo_rows),          # (n_layer*n_head, hd, D_H)
        'w1b': jnp.stack([jnp.concatenate([lp['w1'], lp['b1'][None, :]], axis=0)
                          for lp in layers]),                # (n_layer, D_H+1, D_FF)
        'w2': jnp.stack([lp['w2'] for lp in layers]),        # (n_layer, D_FF, D_H)
        'lvec': jnp.stack([jnp.stack([lp['b_o'], lp['b2'], lp['g1'], lp['be1'],
                                      lp['g2'], lp['be2']]) for lp in layers]),
        'dec_wb': dec_wb,
    }
    return packed


@functools.partial(jax.jit, static_argnames=('pos_mode', 'user_mode'))
def vanilla_transformer_forward(packed, input_seq, position, u,
                                pos_mode=POS_MODE, user_mode=USER_MODE):
    """Reproduces VanillaTransformer.forward(..., return_raw=True) semantics."""
    input_x = input_seq[..., 0]                  # (B, L, F)
    token = input_seq[..., 1]                    # (B, L, F)
    B, L, _ = input_x.shape
    BL = B * L
    user_before = user_mode == 'before_transformer'
    user_after = user_mode == 'after_transformer'

    # fused embedding input: [con | onehot(dis0) | onehot(dis1) | user]
    con_x = input_x[:, :, jnp.array(CON_IDX)].reshape(BL, D_C).astype(jnp.float32)
    onehots = [jax.nn.one_hot(
        input_x[:, :, f['idx']].astype(jnp.int32).reshape(BL),
        f['class_num'], dtype=jnp.float32) for f in DIS_FEATURES]
    u_rep = jnp.broadcast_to(u.astype(jnp.float32)[:, None, :],
                             (B, L, U_EMB_SIZE)).reshape(BL, U_EMB_SIZE)
    u_cols = u_rep if user_before else jnp.zeros_like(u_rep)
    emb_in = jnp.concatenate([con_x] + onehots + [u_cols], axis=-1)   # (BL, D_IN)

    # positional encoding + summed embedding biases folded into one operand
    seq_pos = position[..., POSITION2IDX['seq_pos']].astype(jnp.float32)
    pos_e = positional_encode(seq_pos).reshape(BL, D_H)
    if pos_mode == 'no_use':
        pos_e = jnp.zeros_like(pos_e)
    b_emb = packed['b_emb_base'] + (packed['b_user'] if user_before else 0.0)
    pos_b = pos_e + b_emb

    # additive key-padding mask, shaped (B, 1, L) for the batched score add
    mask_add = jnp.where(token[..., 0] == PAD_TOKEN, -1e9, 0.0
                         ).astype(jnp.float32)[:, None, :]

    kernel = functools.partial(_fused_forward_kernel,
                               n_layer=NUM_LAYER, n_head=NUM_HEAD)

    # Single fused pallas_call, grid=(): every operand is a whole-array VMEM block.
    out = pl.pallas_call(
        kernel,
        out_shape=jax.ShapeDtypeStruct((BL, DEC_PAD), jnp.float32),
    )(emb_in, pos_b, mask_add,
      packed['w_emb'], packed['wqkv_h'], packed['wo_h'],
      packed['w1b'], packed['w2'], packed['lvec'], packed['dec_wb'])

    out = out[:, :D_OUT]
    if user_after:
        # Decoder heads are linear, so the post-encoder user add folds exactly
        # into a correction on the decoder output (computed outside the kernel).
        user_e = u_rep @ packed['w_user'] + packed['b_user']
        out = out + user_e @ packed['dec_wb'][:D_H, :D_OUT]

    out = out.reshape(B, L, D_OUT)
    pred_con = out[..., :D_C]
    pred_dis = []
    off = D_C
    for f in DIS_FEATURES:
        pred_dis.append(out[..., off:off + f['class_num']])
        off += f['class_num']
    # TODO(synk): return_raw=False argmax/cat path not exercised here.
    return pred_con, pred_dis


# ----------------------------------- main -------------------------------------
if __name__ == "__main__":
    B, L, F_TOT = 2, 8, len(FEATURE_LIST)

    key = jax.random.PRNGKey(0)
    kp, kc, kd0, kd1, ku = jax.random.split(key, 5)
    params = init_params(kp)
    packed = pack_params(params)          # one-time parameter repacking

    # build input_seq (B, L, F, 2): channel 0 = feature value, channel 1 = token
    con_vals = jax.random.normal(kc, (B, L, D_C), dtype=jnp.float32)
    dis0 = jax.random.randint(kd0, (B, L), 0, DIS_FEATURES[0]['class_num']
                              ).astype(jnp.float32)
    dis1 = jax.random.randint(kd1, (B, L), 0, DIS_FEATURES[1]['class_num']
                              ).astype(jnp.float32)
    input_x = jnp.concatenate(
        [con_vals, dis0[..., None], dis1[..., None]], axis=-1)       # (B, L, 4)
    token = jnp.ones((B, L, F_TOT), dtype=jnp.float32)
    token = token.at[1, L - 2:, :].set(PAD_TOKEN)   # pad last 2 steps of row 1
    input_seq = jnp.stack([input_x, token], axis=-1)                 # (B, L, 4, 2)

    position = jnp.broadcast_to(
        jnp.arange(L, dtype=jnp.float32)[None, :, None], (B, L, 1))  # seq_pos
    u = jax.random.normal(ku, (B, U_EMB_SIZE), dtype=jnp.float32)

    pred_con, pred_dis = vanilla_transformer_forward(
        packed, input_seq, position, u, pos_mode=POS_MODE, user_mode=USER_MODE)
    jax.block_until_ready(pred_con)
    for p in pred_dis:
        jax.block_until_ready(p)

    assert pred_con.shape == (B, L, D_C)
    assert pred_dis[0].shape == (B, L, DIS_FEATURES[0]['class_num'])
    assert pred_dis[1].shape == (B, L, DIS_FEATURES[1]['class_num'])
    assert all(bool(jnp.isfinite(x).all()) for x in [pred_con] + pred_dis)
    print("KERNEL_OK")
</pallas_src>

<mosaic_0001>
module attributes {stable_mosaic.version = 11 : i64} {
  func.func @_fused_forward_kernel(%arg0: memref<16x24xf32, #tpu.memory_space<vmem>>, %arg1: memref<16x32xf32, #tpu.memory_space<vmem>>, %arg2: memref<2x1x8xf32, #tpu.memory_space<vmem>>, %arg3: memref<24x32xf32, #tpu.memory_space<vmem>>, %arg4: memref<12x33x16xf32, #tpu.memory_space<vmem>>, %arg5: memref<4x16x32xf32, #tpu.memory_space<vmem>>, %arg6: memref<2x33x2048xf32, #tpu.memory_space<vmem>>, %arg7: memref<2x2048x32xf32, #tpu.memory_space<vmem>>, %arg8: memref<2x6x32xf32, #tpu.memory_space<vmem>>, %arg9: memref<33x128xf32, #tpu.memory_space<vmem>>, %arg10: memref<16x128xf32, #tpu.memory_space<vmem>>) attributes {dimension_semantics = [], scalar_prefetch = 0 : i64, scratch_operands = 0 : i64, tpu.core_type = #tpu.core_type<tc>} {
    %c0 = arith.constant 0 : index
    %c0_0 = arith.constant 0 : index
    %0 = vector.load %arg0[%c0, %c0_0] : memref<16x24xf32, #tpu.memory_space<vmem>>, vector<16x24xf32>
    %c0_1 = arith.constant 0 : index
    %c0_2 = arith.constant 0 : index
    %1 = vector.load %arg3[%c0_1, %c0_2] : memref<24x32xf32, #tpu.memory_space<vmem>>, vector<24x32xf32>
    %cst = arith.constant dense<0.000000e+00> : vector<16x32xf32>
    %2 = tpu.matmul %0, %1, %cst {dimension_numbers = #tpu.dot_dimension_numbers<[1], [0], [0], [1], [0, 0, 1, 1], [], []>} : vector<16x24xf32>, vector<24x32xf32>, vector<16x32xf32> -> vector<16x32xf32>
    %c0_3 = arith.constant 0 : index
    %c0_4 = arith.constant 0 : index
    %3 = vector.load %arg1[%c0_3, %c0_4] : memref<16x32xf32, #tpu.memory_space<vmem>>, vector<16x32xf32>
    %4 = arith.addf %2, %3 : vector<16x32xf32>
    %c0_5 = arith.constant 0 : index
    %c0_6 = arith.constant 0 : index
    %c0_7 = arith.constant 0 : index
    %5 = vector.load %arg2[%c0_5, %c0_6, %c0_7] : memref<2x1x8xf32, #tpu.memory_space<vmem>>, vector<2x1x8xf32>
    %c0_8 = arith.constant 0 : index
    %c0_9 = arith.constant 0 : index
    %c0_10 = arith.constant 0 : index
    %6 = vector.load %arg8[%c0_8, %c0_9, %c0_10] : memref<2x6x32xf32, #tpu.memory_space<vmem>>, vector<1x6x32xf32>
    %7 = vector.shape_cast %6 : vector<1x6x32xf32> to vector<6x32xf32>
    %c0_11 = arith.constant 0 : index
    %c0_12 = arith.constant 0 : index
    %c0_13 = arith.constant 0 : index
    %8 = vector.load %arg4[%c0_11, %c0_12, %c0_13] : memref<12x33x16xf32, #tpu.memory_space<vmem>>, vector<1x33x16xf32>
    %9 = vector.shape_cast %8 : vector<1x33x16xf32> to vector<33x16xf32>
    %c1 = arith.constant 1 : index
    %c0_14 = arith.constant 0 : index
    %c0_15 = arith.constant 0 : index
    %10 = vector.load %arg4[%c1, %c0_14, %c0_15] : memref<12x33x16xf32, #tpu.memory_space<vmem>>, vector<1x33x16xf32>
    %11 = vector.shape_cast %10 : vector<1x33x16xf32> to vector<33x16xf32>
    %c2 = arith.constant 2 : index
    %c0_16 = arith.constant 0 : index
    %c0_17 = arith.constant 0 : index
    %12 = vector.load %arg4[%c2, %c0_16, %c0_17] : memref<12x33x16xf32, #tpu.memory_space<vmem>>, vector<1x33x16xf32>
    %13 = vector.shape_cast %12 : vector<1x33x16xf32> to vector<33x16xf32>
    %14 = vector.extract_strided_slice %9 {offsets = [0, 0], sizes = [32, 16], strides = [1, 1]} : vector<33x16xf32> to vector<32x16xf32>
    %cst_18 = arith.constant dense<0.000000e+00> : vector<16x16xf32>
    %15 = tpu.matmul %4, %14, %cst_18 {dimension_numbers = #tpu.dot_dimension_numbers<[1], [0], [0], [1], [0, 0, 1, 1], [], []>} : vector<16x32xf32>, vector<32x16xf32>, vector<16x16xf32> -> vector<16x16xf32>
    %16 = vector.extract_strided_slice %9 {offsets = [32, 0], sizes = [1, 16], strides = [1, 1]} : vector<33x16xf32> to vector<1x16xf32>
    %17 = vector.broadcast %16 : vector<1x16xf32> to vector<16x16xf32>
    %18 = arith.addf %15, %17 : vector<16x16xf32>
    %19 = vector.extract_strided_slice %11 {offsets = [0, 0], sizes = [32, 16], strides = [1, 1]} : vector<33x16xf32> to vector<32x16xf32>
    %cst_19 = arith.constant dense<0.000000e+00> : vector<16x16xf32>
    %20 = tpu.matmul %4, %19, %cst_19 {dimension_numbers = #tpu.dot_dimension_numbers<[1], [0], [0], [1], [0, 0, 1, 1], [], []>} : vector<16x32xf32>, vector<32x16xf32>, vector<16x16xf32> -> vector<16x16xf32>
    %21 = vector.extract_strided_slice %11 {offsets = [32, 0], sizes = [1, 16], strides = [1, 1]} : vector<33x16xf32> to vector<1x16xf32>
    %22 = vector.broadcast %21 : vector<1x16xf32> to vector<16x16xf32>
    %23 = arith.addf %20, %22 : vector<16x16xf32>
    %24 = vector.extract_strided_slice %13 {offsets = [0, 0], sizes = [32, 16], strides = [1, 1]} : vector<33x16xf32> to vector<32x16xf32>
    %cst_20 = arith.constant dense<0.000000e+00> : vector<16x16xf32>
    %25 = tpu.matmul %4, %24, %cst_20 {dimension_numbers = #tpu.dot_dimension_numbers<[1], [0], [0], [1], [0, 0, 1, 1], [], []>} : vector<16x32xf32>, vector<32x16xf32>, vector<16x16xf32> -> vector<16x16xf32>
    %26 = vector.extract_strided_slice %13 {offsets = [32, 0], sizes = [1, 16], strides = [1, 1]} : vector<33x16xf32> to vector<1x16xf32>
    %27 = vector.broadcast %26 : vector<1x16xf32> to vector<16x16xf32>
    %28 = arith.addf %25, %27 : vector<16x16xf32>
    %29 = vector.shape_cast %18 : vector<16x16xf32> to vector<2x8x16xf32>
    %30 = vector.shape_cast %23 : vector<16x16xf32> to vector<2x8x16xf32>
    %31 = vector.shape_cast %28 : vector<16x16xf32> to vector<2x8x16xf32>
    "tpu.trace_start"() <{level = 10 : i32, message = "bqd,bkd->bqk"}> : () -> ()
    %cst_21 = arith.constant dense<0.000000e+00> : vector<2x8x8xf32>
    %32 = tpu.matmul %29, %30, %cst_21 {dimension_numbers = #tpu.dot_dimension_numbers<[2], [2], [1], [1], [0, 0, 0, 1, 1, 1], [0], [0]>} : vector<2x8x16xf32>, vector<2x8x16xf32>, vector<2x8x8xf32> -> vector<2x8x8xf32>
    "tpu.trace_stop"() : () -> ()
    %cst_22 = arith.constant 2.500000e-01 : f32
    %33 = vector.broadcast %cst_22 : f32 to vector<2x8x8xf32>
    %34 = arith.mulf %32, %33 : vector<2x8x8xf32>
    %35 = vector.broadcast %5 : vector<2x1x8xf32> to vector<2x8x8xf32>
    %36 = arith.addf %34, %35 : vector<2x8x8xf32>
    %cst_23 = arith.constant dense<0xFF800000> : vector<2x8xf32>
    %37 = vector.multi_reduction <maximumf>, %36, %cst_23 [2] : vector<2x8x8xf32> to vector<2x8xf32>
    %38 = vector.shape_cast %37 : vector<2x8xf32> to vector<2x8x1xf32>
    %39 = vector.broadcast %38 : vector<2x8x1xf32> to vector<2x8x8xf32>
    %40 = arith.subf %36, %39 : vector<2x8x8xf32>
    %41 = math.exp %40 : vector<2x8x8xf32>
    %cst_24 = arith.constant dense<0.000000e+00> : vector<2x8xf32>
    %42 = vector.multi_reduction <add>, %41, %cst_24 [2] : vector<2x8x8xf32> to vector<2x8xf32>
    %43 = vector.shape_cast %42 : vector<2x8xf32> to vector<2x8x1xf32>
    %44 = vector.broadcast %43 : vector<2x8x1xf32> to vector<2x8x8xf32>
    %45 = arith.divf %41, %44 : vector<2x8x8xf32>
    "tpu.trace_start"() <{level = 10 : i32, message = "bqk,bkd->bqd"}> : () -> ()
    %cst_25 = arith.constant dense<0.000000e+00> : vector<2x8x16xf32>
    %46 = tpu.matmul %45, %31, %cst_25 {dimension_numbers = #tpu.dot_dimension_numbers<[2], [1], [1], [2], [0, 0, 0, 1, 1, 2], [0], [0]>} : vector<2x8x8xf32>, vector<2x8x16xf32>, vector<2x8x16xf32> -> vector<2x8x16xf32>
    "tpu.trace_stop"() : () -> ()
    %47 = vector.shape_cast %46 : vector<2x8x16xf32> to vector<16x16xf32>
    %c0_26 = arith.constant 0 : index
    %c0_27 = arith.constant 0 : index
    %c0_28 = arith.constant 0 : index
    %48 = vector.load %arg5[%c0_26, %c0_27, %c0_28] : memref<4x16x32xf32, #tpu.memory_space<vmem>>, vector<1x16x32xf32>
    %49 = vector.shape_cast %48 : vector<1x16x32xf32> to vector<16x32xf32>
    %cst_29 = arith.constant dense<0.000000e+00> : vector<16x32xf32>
    %50 = tpu.matmul %47, %49, %cst_29 {dimension_numbers = #tpu.dot_dimension_numbers<[1], [0], [0], [1], [0, 0, 1, 1], [], []>} : vector<16x16xf32>, vector<16x32xf32>, vector<16x32xf32> -> vector<16x32xf32>
    %c3 = arith.constant 3 : index
    %c0_30 = arith.constant 0 : index
    %c0_31 = arith.constant 0 : index
    %51 = vector.load %arg4[%c3, %c0_30, %c0_31] : memref<12x33x16xf32, #tpu.memory_space<vmem>>, vector<1x33x16xf32>
    %52 = vector.shape_cast %51 : vector<1x33x16xf32> to vector<33x16xf32>
    %c4 = arith.constant 4 : index
    %c0_32 = arith.constant 0 : index
    %c0_33 = arith.constant 0 : index
    %53 = vector.load %arg4[%c4, %c0_32, %c0_33] : memref<12x33x16xf32, #tpu.memory_space<vmem>>, vector<1x33x16xf32>
    %54 = vector.shape_cast %53 : vector<1x33x16xf32> to vector<33x16xf32>
    %c5 = arith.constant 5 : index
    %c0_34 = arith.constant 0 : index
    %c0_35 = arith.constant 0 : index
    %55 = vector.load %arg4[%c5, %c0_34, %c0_35] : memref<12x33x16xf32, #tpu.memory_space<vmem>>, vector<1x33x16xf32>
    %56 = vector.shape_cast %55 : vector<1x33x16xf32> to vector<33x16xf32>
    %57 = vector.extract_strided_slice %52 {offsets = [0, 0], sizes = [32, 16], strides = [1, 1]} : vector<33x16xf32> to vector<32x16xf32>
    %cst_36 = arith.constant dense<0.000000e+00> : vector<16x16xf32>
    %58 = tpu.matmul %4, %57, %cst_36 {dimension_numbers = #tpu.dot_dimension_numbers<[1], [0], [0], [1], [0, 0, 1, 1], [], []>} : vector<16x32xf32>, vector<32x16xf32>, vector<16x16xf32> -> vector<16x16xf32>
    %59 = vector.extract_strided_slice %52 {offsets = [32, 0], sizes = [1, 16], strides = [1, 1]} : vector<33x16xf32> to vector<1x16xf32>
    %60 = vector.broadcast %59 : vector<1x16xf32> to vector<16x16xf32>
    %61 = arith.addf %58, %60 : vector<16x16xf32>
    %62 = vector.extract_strided_slice %54 {offsets = [0, 0], sizes = [32, 16], strides = [1, 1]} : vector<33x16xf32> to vector<32x16xf32>
    %cst_37 = arith.constant dense<0.000000e+00> : vector<16x16xf32>
    %63 = tpu.matmul %4, %62, %cst_37 {dimension_numbers = #tpu.dot_dimension_numbers<[1], [0], [0], [1], [0, 0, 1, 1], [], []>} : vector<16x32xf32>, vector<32x16xf32>, vector<16x16xf32> -> vector<16x16xf32>
    %64 = vector.extract_strided_slice %54 {offsets = [32, 0], sizes = [1, 16], strides = [1, 1]} : vector<33x16xf32> to vector<1x16xf32>
    %65 = vector.broadcast %64 : vector<1x16xf32> to vector<16x16xf32>
    %66 = arith.addf %63, %65 : vector<16x16xf32>
    %67 = vector.extract_strided_slice %56 {offsets = [0, 0], sizes = [32, 16], strides = [1, 1]} : vector<33x16xf32> to vector<32x16xf32>
    %cst_38 = arith.constant dense<0.000000e+00> : vector<16x16xf32>
    %68 = tpu.matmul %4, %67, %cst_38 {dimension_numbers = #tpu.dot_dimension_numbers<[1], [0], [0], [1], [0, 0, 1, 1], [], []>} : vector<16x32xf32>, vector<32x16xf32>, vector<16x16xf32> -> vector<16x16xf32>
    %69 = vector.extract_strided_slice %56 {offsets = [32, 0], sizes = [1, 16], strides = [1, 1]} : vector<33x16xf32> to vector<1x16xf32>
    %70 = vector.broadcast %69 : vector<1x16xf32> to vector<16x16xf32>
    %71 = arith.addf %68, %70 : vector<16x16xf32>
    %72 = vector.shape_cast %61 : vector<16x16xf32> to vector<2x8x16xf32>
    %73 = vector.shape_cast %66 : vector<16x16xf32> to vector<2x8x16xf32>
    %74 = vector.shape_cast %71 : vector<16x16xf32> to vector<2x8x16xf32>
    "tpu.trace_start"() <{level = 10 : i32, message = "bqd,bkd->bqk"}> : () -> ()
    %cst_39 = arith.constant dense<0.000000e+00> : vector<2x8x8xf32>
    %75 = tpu.matmul %72, %73, %cst_39 {dimension_numbers = #tpu.dot_dimension_numbers<[2], [2], [1], [1], [0, 0, 0, 1, 1, 1], [0], [0]>} : vector<2x8x16xf32>, vector<2x8x16xf32>, vector<2x8x8xf32> -> vector<2x8x8xf32>
    "tpu.trace_stop"() : () -> ()
    %cst_40 = arith.constant 2.500000e-01 : f32
    %76 = vector.broadcast %cst_40 : f32 to vector<2x8x8xf32>
    %77 = arith.mulf %75, %76 : vector<2x8x8xf32>
    %78 = vector.broadcast %5 : vector<2x1x8xf32> to vector<2x8x8xf32>
    %79 = arith.addf %77, %78 : vector<2x8x8xf32>
    %cst_41 = arith.constant dense<0xFF800000> : vector<2x8xf32>
    %80 = vector.multi_reduction <maximumf>, %79, %cst_41 [2] : vector<2x8x8xf32> to vector<2x8xf32>
    %81 = vector.shape_cast %80 : vector<2x8xf32> to vector<2x8x1xf32>
    %82 = vector.broadcast %81 : vector<2x8x1xf32> to vector<2x8x8xf32>
    %83 = arith.subf %79, %82 : vector<2x8x8xf32>
    %84 = math.exp %83 : vector<2x8x8xf32>
    %cst_42 = arith.constant dense<0.000000e+00> : vector<2x8xf32>
    %85 = vector.multi_reduction <add>, %84, %cst_42 [2] : vector<2x8x8xf32> to vector<2x8xf32>
    %86 = vector.shape_cast %85 : vector<2x8xf32> to vector<2x8x1xf32>
    %87 = vector.broadcast %86 : vector<2x8x1xf32> to vector<2x8x8xf32>
    %88 = arith.divf %84, %87 : vector<2x8x8xf32>
    "tpu.trace_start"() <{level = 10 : i32, message = "bqk,bkd->bqd"}> : () -> ()
    %cst_43 = arith.constant dense<0.000000e+00> : vector<2x8x16xf32>
    %89 = tpu.matmul %88, %74, %cst_43 {dimension_numbers = #tpu.dot_dimension_numbers<[2], [1], [1], [2], [0, 0, 0, 1, 1, 2], [0], [0]>} : vector<2x8x8xf32>, vector<2x8x16xf32>, vector<2x8x16xf32> -> vector<2x8x16xf32>
    "tpu.trace_stop"() : () -> ()
    %90 = vector.shape_cast %89 : vector<2x8x16xf32> to vector<16x16xf32>
    %c1_44 = arith.constant 1 : index
    %c0_45 = arith.constant 0 : index
    %c0_46 = arith.constant 0 : index
    %91 = vector.load %arg5[%c1_44, %c0_45, %c0_46] : memref<4x16x32xf32, #tpu.memory_space<vmem>>, vector<1x16x32xf32>
    %92 = vector.shape_cast %91 : vector<1x16x32xf32> to vector<16x32xf32>
    %cst_47 = arith.constant dense<0.000000e+00> : vector<16x32xf32>
    %93 = tpu.matmul %90, %92, %cst_47 {dimension_numbers = #tpu.dot_dimension_numbers<[1], [0], [0], [1], [0, 0, 1, 1], [], []>} : vector<16x16xf32>, vector<16x32xf32>, vector<16x32xf32> -> vector<16x32xf32>
    %94 = arith.addf %50, %93 : vector<16x32xf32>
    %95 = vector.extract_strided_slice %7 {offsets = [0, 0], sizes = [1, 32], strides = [1, 1]} : vector<6x32xf32> to vector<1x32xf32>
    %96 = vector.broadcast %95 : vector<1x32xf32> to vector<16x32xf32>
    %97 = arith.addf %94, %96 : vector<16x32xf32>
    %98 = arith.addf %4, %97 : vector<16x32xf32>
    %99 = vector.extract_strided_slice %7 {offsets = [2, 0], sizes = [1, 32], strides = [1, 1]} : vector<6x32xf32> to vector<1x32xf32>
    %100 = vector.extract_strided_slice %7 {offsets = [3, 0], sizes = [1, 32], strides = [1, 1]} : vector<6x32xf32> to vector<1x32xf32>
    %cst_48 = arith.constant dense<0.000000e+00> : vector<16xf32>
    %101 = vector.multi_reduction <add>, %98, %cst_48 [1] : vector<16x32xf32> to vector<16xf32>
    %102 = vector.shape_cast %101 : vector<16xf32> to vector<16x1xf32>
    %cst_49 = arith.constant 3.200000e+01 : f32
    %103 = vector.broadcast %cst_49 : f32 to vector<16x1xf32>
    %104 = arith.divf %102, %103 : vector<16x1xf32>
    %105 = vector.broadcast %104 : vector<16x1xf32> to vector<16x32xf32>
    %106 = arith.subf %98, %105 : vector<16x32xf32>
    %107 = arith.mulf %106, %106 : vector<16x32xf32>
    %cst_50 = arith.constant dense<0.000000e+00> : vector<16xf32>
    %108 = vector.multi_reduction <add>, %107, %cst_50 [1] : vector<16x32xf32> to vector<16xf32>
    %109 = vector.shape_cast %108 : vector<16xf32> to vector<16x1xf32>
    %cst_51 = arith.constant 3.200000e+01 : f32
    %110 = vector.broadcast %cst_51 : f32 to vector<16x1xf32>
    %111 = arith.divf %109, %110 : vector<16x1xf32>
    %112 = vector.broadcast %104 : vector<16x1xf32> to vector<16x32xf32>
    %113 = arith.subf %98, %112 : vector<16x32xf32>
    %cst_52 = arith.constant 9.99999974E-6 : f32
    %114 = vector.broadcast %cst_52 : f32 to vector<16x1xf32>
    %115 = arith.addf %111, %114 : vector<16x1xf32>
    %116 = math.rsqrt %115 : vector<16x1xf32>
    %117 = vector.broadcast %116 : vector<16x1xf32> to vector<16x32xf32>
    %118 = arith.mulf %113, %117 : vector<16x32xf32>
    %119 = vector.broadcast %99 : vector<1x32xf32> to vector<16x32xf32>
    %120 = arith.mulf %118, %119 : vector<16x32xf32>
    %121 = vector.broadcast %100 : vector<1x32xf32> to vector<16x32xf32>
    %122 = arith.addf %120, %121 : vector<16x32xf32>
    %c0_53 = arith.constant 0 : index
    %c0_54 = arith.constant 0 : index
    %c0_55 = arith.constant 0 : index
    %123 = vector.load %arg6[%c0_53, %c0_54, %c0_55] : memref<2x33x2048xf32, #tpu.memory_space<vmem>>, vector<1x33x2048xf32>
    %124 = vector.shape_cast %123 : vector<1x33x2048xf32> to vector<33x2048xf32>
    %125 = vector.extract_strided_slice %124 {offsets = [0, 0], sizes = [32, 2048], strides = [1, 1]} : vector<33x2048xf32> to vector<32x2048xf32>
    %cst_56 = arith.constant dense<0.000000e+00> : vector<16x2048xf32>
    %126 = tpu.matmul %122, %125, %cst_56 {dimension_numbers = #tpu.dot_dimension_numbers<[1], [0], [0], [1], [0, 0, 1, 1], [], []>} : vector<16x32xf32>, vector<32x2048xf32>, vector<16x2048xf32> -> vector<16x2048xf32>
    %127 = vector.extract_strided_slice %124 {offsets = [32, 0], sizes = [1, 2048], strides = [1, 1]} : vector<33x2048xf32> to vector<1x2048xf32>
    %128 = vector.broadcast %127 : vector<1x2048xf32> to vector<16x2048xf32>
    %129 = arith.addf %126, %128 : vector<16x2048xf32>
    %cst_57 = arith.constant 0.000000e+00 : f32
    %130 = vector.broadcast %cst_57 : f32 to vector<16x2048xf32>
    %131 = arith.maximumf %129, %130 : vector<16x2048xf32>
    %c0_58 = arith.constant 0 : index
    %c0_59 = arith.constant 0 : index
    %c0_60 = arith.constant 0 : index
    %132 = vector.load %arg7[%c0_58, %c0_59, %c0_60] : memref<2x2048x32xf32, #tpu.memory_space<vmem>>, vector<1x2048x32xf32>
    %133 = vector.shape_cast %132 : vector<1x2048x32xf32> to vector<2048x32xf32>
    %cst_61 = arith.constant dense<0.000000e+00> : vector<16x32xf32>
    %134 = tpu.matmul %131, %133, %cst_61 {dimension_numbers = #tpu.dot_dimension_numbers<[1], [0], [0], [1], [0, 0, 1, 1], [], []>} : vector<16x2048xf32>, vector<2048x32xf32>, vector<16x32xf32> -> vector<16x32xf32>
    %135 = vector.extract_strided_slice %7 {offsets = [1, 0], sizes = [1, 32], strides = [1, 1]} : vector<6x32xf32> to vector<1x32xf32>
    %136 = vector.broadcast %135 : vector<1x32xf32> to vector<16x32xf32>
    %137 = arith.addf %134, %136 : vector<16x32xf32>
    %138 = arith.addf %122, %137 : vector<16x32xf32>
    %139 = vector.extract_strided_slice %7 {offsets = [4, 0], sizes = [1, 32], strides = [1, 1]} : vector<6x32xf32> to vector<1x32xf32>
    %140 = vector.extract_strided_slice %7 {offsets = [5, 0], sizes = [1, 32], strides = [1, 1]} : vector<6x32xf32> to vector<1x32xf32>
    %cst_62 = arith.constant dense<0.000000e+00> : vector<16xf32>
    %141 = vector.multi_reduction <add>, %138, %cst_62 [1] : vector<16x32xf32> to vector<16xf32>
    %142 = vector.shape_cast %141 : vector<16xf32> to vector<16x1xf32>
    %cst_63 = arith.constant 3.200000e+01 : f32
    %143 = vector.broadcast %cst_63 : f32 to vector<16x1xf32>
    %144 = arith.divf %142, %143 : vector<16x1xf32>
    %145 = vector.broadcast %144 : vector<16x1xf32> to vector<16x32xf32>
    %146 = arith.subf %138, %145 : vector<16x32xf32>
    %147 = arith.mulf %146, %146 : vector<16x32xf32>
    %cst_64 = arith.constant dense<0.000000e+00> : vector<16xf32>
    %148 = vector.multi_reduction <add>, %147, %cst_64 [1] : vector<16x32xf32> to vector<16xf32>
    %149 = vector.shape_cast %148 : vector<16xf32> to vector<16x1xf32>
    %cst_65 = arith.constant 3.200000e+01 : f32
    %150 = vector.broadcast %cst_65 : f32 to vector<16x1xf32>
    %151 = arith.divf %149, %150 : vector<16x1xf32>
    %152 = vector.broadcast %144 : vector<16x1xf32> to vector<16x32xf32>
    %153 = arith.subf %138, %152 : vector<16x32xf32>
    %cst_66 = arith.constant 9.99999974E-6 : f32
    %154 = vector.broadcast %cst_66 : f32 to vector<16x1xf32>
    %155 = arith.addf %151, %154 : vector<16x1xf32>
    %156 = math.rsqrt %155 : vector<16x1xf32>
    %157 = vector.broadcast %156 : vector<16x1xf32> to vector<16x32xf32>
    %158 = arith.mulf %153, %157 : vector<16x32xf32>
    %159 = vector.broadcast %139 : vector<1x32xf32> to vector<16x32xf32>
    %160 = arith.mulf %158, %159 : vector<16x32xf32>
    %161 = vector.broadcast %140 : vector<1x32xf32> to vector<16x32xf32>
    %162 = arith.addf %160, %161 : vector<16x32xf32>
    %c1_67 = arith.constant 1 : index
    %c0_68 = arith.constant 0 : index
    %c0_69 = arith.constant 0 : index
    %163 = vector.load %arg8[%c1_67, %c0_68, %c0_69] : memref<2x6x32xf32, #tpu.memory_space<vmem>>, vector<1x6x32xf32>
    %164 = vector.shape_cast %163 : vector<1x6x32xf32> to vector<6x32xf32>
    %c6 = arith.constant 6 : index
    %c0_70 = arith.constant 0 : index
    %c0_71 = arith.constant 0 : index
    %165 = vector.load %arg4[%c6, %c0_70, %c0_71] : memref<12x33x16xf32, #tpu.memory_space<vmem>>, vector<1x33x16xf32>
    %166 = vector.shape_cast %165 : vector<1x33x16xf32> to vector<33x16xf32>
    %c7 = arith.constant 7 : index
    %c0_72 = arith.constant 0 : index
    %c0_73 = arith.constant 0 : index
    %167 = vector.load %arg4[%c7, %c0_72, %c0_73] : memref<12x33x16xf32, #tpu.memory_space<vmem>>, vector<1x33x16xf32>
    %168 = vector.shape_cast %167 : vector<1x33x16xf32> to vector<33x16xf32>
    %c8 = arith.constant 8 : index
    %c0_74 = arith.constant 0 : index
    %c0_75 = arith.constant 0 : index
    %169 = vector.load %arg4[%c8, %c0_74, %c0_75] : memref<12x33x16xf32, #tpu.memory_space<vmem>>, vector<1x33x16xf32>
    %170 = vector.shape_cast %169 : vector<1x33x16xf32> to vector<33x16xf32>
    %171 = vector.extract_strided_slice %166 {offsets = [0, 0], sizes = [32, 16], strides = [1, 1]} : vector<33x16xf32> to vector<32x16xf32>
    %cst_76 = arith.constant dense<0.000000e+00> : vector<16x16xf32>
    %172 = tpu.matmul %162, %171, %cst_76 {dimension_numbers = #tpu.dot_dimension_numbers<[1], [0], [0], [1], [0, 0, 1, 1], [], []>} : vector<16x32xf32>, vector<32x16xf32>, vector<16x16xf32> -> vector<16x16xf32>
    %173 = vector.extract_strided_slice %166 {offsets = [32, 0], sizes = [1, 16], strides = [1, 1]} : vector<33x16xf32> to vector<1x16xf32>
    %174 = vector.broadcast %173 : vector<1x16xf32> to vector<16x16xf32>
    %175 = arith.addf %172, %174 : vector<16x16xf32>
    %176 = vector.extract_strided_slice %168 {offsets = [0, 0], sizes = [32, 16], strides = [1, 1]} : vector<33x16xf32> to vector<32x16xf32>
    %cst_77 = arith.constant dense<0.000000e+00> : vector<16x16xf32>
    %177 = tpu.matmul %162, %176, %cst_77 {dimension_numbers = #tpu.dot_dimension_numbers<[1], [0], [0], [1], [0, 0, 1, 1], [], []>} : vector<16x32xf32>, vector<32x16xf32>, vector<16x16xf32> -> vector<16x16xf32>
    %178 = vector.extract_strided_slice %168 {offsets = [32, 0], sizes = [1, 16], strides = [1, 1]} : vector<33x16xf32> to vector<1x16xf32>
    %179 = vector.broadcast %178 : vector<1x16xf32> to vector<16x16xf32>
    %180 = arith.addf %177, %179 : vector<16x16xf32>
    %181 = vector.extract_strided_slice %170 {offsets = [0, 0], sizes = [32, 16], strides = [1, 1]} : vector<33x16xf32> to vector<32x16xf32>
    %cst_78 = arith.constant dense<0.000000e+00> : vector<16x16xf32>
    %182 = tpu.matmul %162, %181, %cst_78 {dimension_numbers = #tpu.dot_dimension_numbers<[1], [0], [0], [1], [0, 0, 1, 1], [], []>} : vector<16x32xf32>, vector<32x16xf32>, vector<16x16xf32> -> vector<16x16xf32>
    %183 = vector.extract_strided_slice %170 {offsets = [32, 0], sizes = [1, 16], strides = [1, 1]} : vector<33x16xf32> to vector<1x16xf32>
    %184 = vector.broadcast %183 : vector<1x16xf32> to vector<16x16xf32>
    %185 = arith.addf %182, %184 : vector<16x16xf32>
    %186 = vector.shape_cast %175 : vector<16x16xf32> to vector<2x8x16xf32>
    %187 = vector.shape_cast %180 : vector<16x16xf32> to vector<2x8x16xf32>
    %188 = vector.shape_cast %185 : vector<16x16xf32> to vector<2x8x16xf32>
    "tpu.trace_start"() <{level = 10 : i32, message = "bqd,bkd->bqk"}> : () -> ()
    %cst_79 = arith.constant dense<0.000000e+00> : vector<2x8x8xf32>
    %189 = tpu.matmul %186, %187, %cst_79 {dimension_numbers = #tpu.dot_dimension_numbers<[2], [2], [1], [1], [0, 0, 0, 1, 1, 1], [0], [0]>} : vector<2x8x16xf32>, vector<2x8x16xf32>, vector<2x8x8xf32> -> vector<2x8x8xf32>
    "tpu.trace_stop"() : () -> ()
    %cst_80 = arith.constant 2.500000e-01 : f32
    %190 = vector.broadcast %cst_80 : f32 to vector<2x8x8xf32>
    %191 = arith.mulf %189, %190 : vector<2x8x8xf32>
    %192 = vector.broadcast %5 : vector<2x1x8xf32> to vector<2x8x8xf32>
    %193 = arith.addf %191, %192 : vector<2x8x8xf32>
    %cst_81 = arith.constant dense<0xFF800000> : vector<2x8xf32>
    %194 = vector.multi_reduction <maximumf>, %193, %cst_81 [2] : vector<2x8x8xf32> to vector<2x8xf32>
    %195 = vector.shape_cast %194 : vector<2x8xf32> to vector<2x8x1xf32>
    %196 = vector.broadcast %195 : vector<2x8x1xf32> to vector<2x8x8xf32>
    %197 = arith.subf %193, %196 : vector<2x8x8xf32>
    %198 = math.exp %197 : vector<2x8x8xf32>
    %cst_82 = arith.constant dense<0.000000e+00> : vector<2x8xf32>
    %199 = vector.multi_reduction <add>, %198, %cst_82 [2] : vector<2x8x8xf32> to vector<2x8xf32>
    %200 = vector.shape_cast %199 : vector<2x8xf32> to vector<2x8x1xf32>
    %201 = vector.broadcast %200 : vector<2x8x1xf32> to vector<2x8x8xf32>
    %202 = arith.divf %198, %201 : vector<2x8x8xf32>
    "tpu.trace_start"() <{level = 10 : i32, message = "bqk,bkd->bqd"}> : () -> ()
    %cst_83 = arith.constant dense<0.000000e+00> : vector<2x8x16xf32>
    %203 = tpu.matmul %202, %188, %cst_83 {dimension_numbers = #tpu.dot_dimension_numbers<[2], [1], [1], [2], [0, 0, 0, 1, 1, 2], [0], [0]>} : vector<2x8x8xf32>, vector<2x8x16xf32>, vector<2x8x16xf32> -> vector<2x8x16xf32>
    "tpu.trace_stop"() : () -> ()
    %204 = vector.shape_cast %203 : vector<2x8x16xf32> to vector<16x16xf32>
    %c2_84 = arith.constant 2 : index
    %c0_85 = arith.constant 0 : index
    %c0_86 = arith.constant 0 : index
    %205 = vector.load %arg5[%c2_84, %c0_85, %c0_86] : memref<4x16x32xf32, #tpu.memory_space<vmem>>, vector<1x16x32xf32>
    %206 = vector.shape_cast %205 : vector<1x16x32xf32> to vector<16x32xf32>
    %cst_87 = arith.constant dense<0.000000e+00> : vector<16x32xf32>
    %207 = tpu.matmul %204, %206, %cst_87 {dimension_numbers = #tpu.dot_dimension_numbers<[1], [0], [0], [1], [0, 0, 1, 1], [], []>} : vector<16x16xf32>, vector<16x32xf32>, vector<16x32xf32> -> vector<16x32xf32>
    %c9 = arith.constant 9 : index
    %c0_88 = arith.constant 0 : index
    %c0_89 = arith.constant 0 : index
    %208 = vector.load %arg4[%c9, %c0_88, %c0_89] : memref<12x33x16xf32, #tpu.memory_space<vmem>>, vector<1x33x16xf32>
    %209 = vector.shape_cast %208 : vector<1x33x16xf32> to vector<33x16xf32>
    %c10 = arith.constant 10 : index
    %c0_90 = arith.constant 0 : index
    %c0_91 = arith.constant 0 : index
    %210 = vector.load %arg4[%c10, %c0_90, %c0_91] : memref<12x33x16xf32, #tpu.memory_space<vmem>>, vector<1x33x16xf32>
    %211 = vector.shape_cast %210 : vector<1x33x16xf32> to vector<33x16xf32>
    %c11 = arith.constant 11 : index
    %c0_92 = arith.constant 0 : index
    %c0_93 = arith.constant 0 : index
    %212 = vector.load %arg4[%c11, %c0_92, %c0_93] : memref<12x33x16xf32, #tpu.memory_space<vmem>>, vector<1x33x16xf32>
    %213 = vector.shape_cast %212 : vector<1x33x16xf32> to vector<33x16xf32>
    %214 = vector.extract_strided_slice %209 {offsets = [0, 0], sizes = [32, 16], strides = [1, 1]} : vector<33x16xf32> to vector<32x16xf32>
    %cst_94 = arith.constant dense<0.000000e+00> : vector<16x16xf32>
    %215 = tpu.matmul %162, %214, %cst_94 {dimension_numbers = #tpu.dot_dimension_numbers<[1], [0], [0], [1], [0, 0, 1, 1], [], []>} : vector<16x32xf32>, vector<32x16xf32>, vector<16x16xf32> -> vector<16x16xf32>
    %216 = vector.extract_strided_slice %209 {offsets = [32, 0], sizes = [1, 16], strides = [1, 1]} : vector<33x16xf32> to vector<1x16xf32>
    %217 = vector.broadcast %216 : vector<1x16xf32> to vector<16x16xf32>
    %218 = arith.addf %215, %217 : vector<16x16xf32>
    %219 = vector.extract_strided_slice %211 {offsets = [0, 0], sizes = [32, 16], strides = [1, 1]} : vector<33x16xf32> to vector<32x16xf32>
    %cst_95 = arith.constant dense<0.000000e+00> : vector<16x16xf32>
    %220 = tpu.matmul %162, %219, %cst_95 {dimension_numbers = #tpu.dot_dimension_numbers<[1], [0], [0], [1], [0, 0, 1, 1], [], []>} : vector<16x32xf32>, vector<32x16xf32>, vector<16x16xf32> -> vector<16x16xf32>
    %221 = vector.extract_strided_slice %211 {offsets = [32, 0], sizes = [1, 16], strides = [1, 1]} : vector<33x16xf32> to vector<1x16xf32>
    %222 = vector.broadcast %221 : vector<1x16xf32> to vector<16x16xf32>
    %223 = arith.addf %220, %222 : vector<16x16xf32>
    %224 = vector.extract_strided_slice %213 {offsets = [0, 0], sizes = [32, 16], strides = [1, 1]} : vector<33x16xf32> to vector<32x16xf32>
    %cst_96 = arith.constant dense<0.000000e+00> : vector<16x16xf32>
    %225 = tpu.matmul %162, %224, %cst_96 {dimension_numbers = #tpu.dot_dimension_numbers<[1], [0], [0], [1], [0, 0, 1, 1], [], []>} : vector<16x32xf32>, vector<32x16xf32>, vector<16x16xf32> -> vector<16x16xf32>
    %226 = vector.extract_strided_slice %213 {offsets = [32, 0], sizes = [1, 16], strides = [1, 1]} : vector<33x16xf32> to vector<1x16xf32>
    %227 = vector.broadcast %226 : vector<1x16xf32> to vector<16x16xf32>
    %228 = arith.addf %225, %227 : vector<16x16xf32>
    %229 = vector.shape_cast %218 : vector<16x16xf32> to vector<2x8x16xf32>
    %230 = vector.shape_cast %223 : vector<16x16xf32> to vector<2x8x16xf32>
    %231 = vector.shape_cast %228 : vector<16x16xf32> to vector<2x8x16xf32>
    "tpu.trace_start"() <{level = 10 : i32, message = "bqd,bkd->bqk"}> : () -> ()
    %cst_97 = arith.constant dense<0.000000e+00> : vector<2x8x8xf32>
    %232 = tpu.matmul %229, %230, %cst_97 {dimension_numbers = #tpu.dot_dimension_numbers<[2], [2], [1], [1], [0, 0, 0, 1, 1, 1], [0], [0]>} : vector<2x8x16xf32>, vector<2x8x16xf32>, vector<2x8x8xf32> -> vector<2x8x8xf32>
    "tpu.trace_stop"() : () -> ()
    %cst_98 = arith.constant 2.500000e-01 : f32
    %233 = vector.broadcast %cst_98 : f32 to vector<2x8x8xf32>
    %234 = arith.mulf %232, %233 : vector<2x8x8xf32>
    %235 = vector.broadcast %5 : vector<2x1x8xf32> to vector<2x8x8xf32>
    %236 = arith.addf %234, %235 : vector<2x8x8xf32>
    %cst_99 = arith.constant dense<0xFF800000> : vector<2x8xf32>
    %237 = vector.multi_reduction <maximumf>, %236, %cst_99 [2] : vector<2x8x8xf32> to vector<2x8xf32>
    %238 = vector.shape_cast %237 : vector<2x8xf32> to vector<2x8x1xf32>
    %239 = vector.broadcast %238 : vector<2x8x1xf32> to vector<2x8x8xf32>
    %240 = arith.subf %236, %239 : vector<2x8x8xf32>
    %241 = math.exp %240 : vector<2x8x8xf32>
    %cst_100 = arith.constant dense<0.000000e+00> : vector<2x8xf32>
    %242 = vector.multi_reduction <add>, %241, %cst_100 [2] : vector<2x8x8xf32> to vector<2x8xf32>
    %243 = vector.shape_cast %242 : vector<2x8xf32> to vector<2x8x1xf32>
    %244 = vector.broadcast %243 : vector<2x8x1xf32> to vector<2x8x8xf32>
    %245 = arith.divf %241, %244 : vector<2x8x8xf32>
    "tpu.trace_start"() <{level = 10 : i32, message = "bqk,bkd->bqd"}> : () -> ()
    %cst_101 = arith.constant dense<0.000000e+00> : vector<2x8x16xf32>
    %246 = tpu.matmul %245, %231, %cst_101 {dimension_numbers = #tpu.dot_dimension_numbers<[2], [1], [1], [2], [0, 0, 0, 1, 1, 2], [0], [0]>} : vector<2x8x8xf32>, vector<2x8x16xf32>, vector<2x8x16xf32> -> vector<2x8x16xf32>
    "tpu.trace_stop"() : () -> ()
    %247 = vector.shape_cast %246 : vector<2x8x16xf32> to vector<16x16xf32>
    %c3_102 = arith.constant 3 : index
    %c0_103 = arith.constant 0 : index
    %c0_104 = arith.constant 0 : index
    %248 = vector.load %arg5[%c3_102, %c0_103, %c0_104] : memref<4x16x32xf32, #tpu.memory_space<vmem>>, vector<1x16x32xf32>
    %249 = vector.shape_cast %248 : vector<1x16x32xf32> to vector<16x32xf32>
    %cst_105 = arith.constant dense<0.000000e+00> : vector<16x32xf32>
    %250 = tpu.matmul %247, %249, %cst_105 {dimension_numbers = #tpu.dot_dimension_numbers<[1], [0], [0], [1], [0, 0, 1, 1], [], []>} : vector<16x16xf32>, vector<16x32xf32>, vector<16x32xf32> -> vector<16x32xf32>
    %251 = arith.addf %207, %250 : vector<16x32xf32>
    %252 = vector.extract_strided_slice %164 {offsets = [0, 0], sizes = [1, 32], strides = [1, 1]} : vector<6x32xf32> to vector<1x32xf32>
    %253 = vector.broadcast %252 : vector<1x32xf32> to vector<16x32xf32>
    %254 = arith.addf %251, %253 : vector<16x32xf32>
    %255 = arith.addf %162, %254 : vector<16x32xf32>
    %256 = vector.extract_strided_slice %164 {offsets = [2, 0], sizes = [1, 32], strides = [1, 1]} : vector<6x32xf32> to vector<1x32xf32>
    %257 = vector.extract_strided_slice %164 {offsets = [3, 0], sizes = [1, 32], strides = [1, 1]} : vector<6x32xf32> to vector<1x32xf32>
    %cst_106 = arith.constant dense<0.000000e+00> : vector<16xf32>
    %258 = vector.multi_reduction <add>, %255, %cst_106 [1] : vector<16x32xf32> to vector<16xf32>
    %259 = vector.shape_cast %258 : vector<16xf32> to vector<16x1xf32>
    %cst_107 = arith.constant 3.200000e+01 : f32
    %260 = vector.broadcast %cst_107 : f32 to vector<16x1xf32>
    %261 = arith.divf %259, %260 : vector<16x1xf32>
    %262 = vector.broadcast %261 : vector<16x1xf32> to vector<16x32xf32>
    %263 = arith.subf %255, %262 : vector<16x32xf32>
    %264 = arith.mulf %263, %263 : vector<16x32xf32>
    %cst_108 = arith.constant dense<0.000000e+00> : vector<16xf32>
    %265 = vector.multi_reduction <add>, %264, %cst_108 [1] : vector<16x32xf32> to vector<16xf32>
    %266 = vector.shape_cast %265 : vector<16xf32> to vector<16x1xf32>
    %cst_109 = arith.constant 3.200000e+01 : f32
    %267 = vector.broadcast %cst_109 : f32 to vector<16x1xf32>
    %268 = arith.divf %266, %267 : vector<16x1xf32>
    %269 = vector.broadcast %261 : vector<16x1xf32> to vector<16x32xf32>
    %270 = arith.subf %255, %269 : vector<16x32xf32>
    %cst_110 = arith.constant 9.99999974E-6 : f32
    %271 = vector.broadcast %cst_110 : f32 to vector<16x1xf32>
    %272 = arith.addf %268, %271 : vector<16x1xf32>
    %273 = math.rsqrt %272 : vector<16x1xf32>
    %274 = vector.broadcast %273 : vector<16x1xf32> to vector<16x32xf32>
    %275 = arith.mulf %270, %274 : vector<16x32xf32>
    %276 = vector.broadcast %256 : vector<1x32xf32> to vector<16x32xf32>
    %277 = arith.mulf %275, %276 : vector<16x32xf32>
    %278 = vector.broadcast %257 : vector<1x32xf32> to vector<16x32xf32>
    %279 = arith.addf %277, %278 : vector<16x32xf32>
    %c1_111 = arith.constant 1 : index
    %c0_112 = arith.constant 0 : index
    %c0_113 = arith.constant 0 : index
    %280 = vector.load %arg6[%c1_111, %c0_112, %c0_113] : memref<2x33x2048xf32, #tpu.memory_space<vmem>>, vector<1x33x2048xf32>
    %281 = vector.shape_cast %280 : vector<1x33x2048xf32> to vector<33x2048xf32>
    %282 = vector.extract_strided_slice %281 {offsets = [0, 0], sizes = [32, 2048], strides = [1, 1]} : vector<33x2048xf32> to vector<32x2048xf32>
    %cst_114 = arith.constant dense<0.000000e+00> : vector<16x2048xf32>
    %283 = tpu.matmul %279, %282, %cst_114 {dimension_numbers = #tpu.dot_dimension_numbers<[1], [0], [0], [1], [0, 0, 1, 1], [], []>} : vector<16x32xf32>, vector<32x2048xf32>, vector<16x2048xf32> -> vector<16x2048xf32>
    %284 = vector.extract_strided_slice %281 {offsets = [32, 0], sizes = [1, 2048], strides = [1, 1]} : vector<33x2048xf32> to vector<1x2048xf32>
    %285 = vector.broadcast %284 : vector<1x2048xf32> to vector<16x2048xf32>
    %286 = arith.addf %283, %285 : vector<16x2048xf32>
    %cst_115 = arith.constant 0.000000e+00 : f32
    %287 = vector.broadcast %cst_115 : f32 to vector<16x2048xf32>
    %288 = arith.maximumf %286, %287 : vector<16x2048xf32>
    %c1_116 = arith.constant 1 : index
    %c0_117 = arith.constant 0 : index
    %c0_118 = arith.constant 0 : index
    %289 = vector.load %arg7[%c1_116, %c0_117, %c0_118] : memref<2x2048x32xf32, #tpu.memory_space<vmem>>, vector<1x2048x32xf32>
    %290 = vector.shape_cast %289 : vector<1x2048x32xf32> to vector<2048x32xf32>
    %cst_119 = arith.constant dense<0.000000e+00> : vector<16x32xf32>
    %291 = tpu.matmul %288, %290, %cst_119 {dimension_numbers = #tpu.dot_dimension_numbers<[1], [0], [0], [1], [0, 0, 1, 1], [], []>} : vector<16x2048xf32>, vector<2048x32xf32>, vector<16x32xf32> -> vector<16x32xf32>
    %292 = vector.extract_strided_slice %164 {offsets = [1, 0], sizes = [1, 32], strides = [1, 1]} : vector<6x32xf32> to vector<1x32xf32>
    %293 = vector.broadcast %292 : vector<1x32xf32> to vector<16x32xf32>
    %294 = arith.addf %291, %293 : vector<16x32xf32>
    %295 = arith.addf %279, %294 : vector<16x32xf32>
    %296 = vector.extract_strided_slice %164 {offsets = [4, 0], sizes = [1, 32], strides = [1, 1]} : vector<6x32xf32> to vector<1x32xf32>
    %297 = vector.extract_strided_slice %164 {offsets = [5, 0], sizes = [1, 32], strides = [1, 1]} : vector<6x32xf32> to vector<1x32xf32>
    %cst_120 = arith.constant dense<0.000000e+00> : vector<16xf32>
    %298 = vector.multi_reduction <add>, %295, %cst_120 [1] : vector<16x32xf32> to vector<16xf32>
    %299 = vector.shape_cast %298 : vector<16xf32> to vector<16x1xf32>
    %cst_121 = arith.constant 3.200000e+01 : f32
    %300 = vector.broadcast %cst_121 : f32 to vector<16x1xf32>
    %301 = arith.divf %299, %300 : vector<16x1xf32>
    %302 = vector.broadcast %301 : vector<16x1xf32> to vector<16x32xf32>
    %303 = arith.subf %295, %302 : vector<16x32xf32>
    %304 = arith.mulf %303, %303 : vector<16x32xf32>
    %cst_122 = arith.constant dense<0.000000e+00> : vector<16xf32>
    %305 = vector.multi_reduction <add>, %304, %cst_122 [1] : vector<16x32xf32> to vector<16xf32>
    %306 = vector.shape_cast %305 : vector<16xf32> to vector<16x1xf32>
    %cst_123 = arith.constant 3.200000e+01 : f32
    %307 = vector.broadcast %cst_123 : f32 to vector<16x1xf32>
    %308 = arith.divf %306, %307 : vector<16x1xf32>
    %309 = vector.broadcast %301 : vector<16x1xf32> to vector<16x32xf32>
    %310 = arith.subf %295, %309 : vector<16x32xf32>
    %cst_124 = arith.constant 9.99999974E-6 : f32
    %311 = vector.broadcast %cst_124 : f32 to vector<16x1xf32>
    %312 = arith.addf %308, %311 : vector<16x1xf32>
    %313 = math.rsqrt %312 : vector<16x1xf32>
    %314 = vector.broadcast %313 : vector<16x1xf32> to vector<16x32xf32>
    %315 = arith.mulf %310, %314 : vector<16x32xf32>
    %316 = vector.broadcast %296 : vector<1x32xf32> to vector<16x32xf32>
    %317 = arith.mulf %315, %316 : vector<16x32xf32>
    %318 = vector.broadcast %297 : vector<1x32xf32> to vector<16x32xf32>
    %319 = arith.addf %317, %318 : vector<16x32xf32>
    %c0_125 = arith.constant 0 : index
    %c0_126 = arith.constant 0 : index
    %320 = vector.load %arg9[%c0_125, %c0_126] : memref<33x128xf32, #tpu.memory_space<vmem>>, vector<33x128xf32>
    %321 = vector.extract_strided_slice %320 {offsets = [0, 0], sizes = [32, 128], strides = [1, 1]} : vector<33x128xf32> to vector<32x128xf32>
    %cst_127 = arith.constant dense<0.000000e+00> : vector<16x128xf32>
    %322 = tpu.matmul %319, %321, %cst_127 {dimension_numbers = #tpu.dot_dimension_numbers<[1], [0], [0], [1], [0, 0, 1, 1], [], []>} : vector<16x32xf32>, vector<32x128xf32>, vector<16x128xf32> -> vector<16x128xf32>
    %323 = vector.extract_strided_slice %320 {offsets = [32, 0], sizes = [1, 128], strides = [1, 1]} : vector<33x128xf32> to vector<1x128xf32>
    %324 = vector.broadcast %323 : vector<1x128xf32> to vector<16x128xf32>
    %325 = arith.addf %322, %324 : vector<16x128xf32>
    %c0_128 = arith.constant 0 : index
    %c0_129 = arith.constant 0 : index
    %326 = vector.load %arg10[%c0_128, %c0_129] : memref<16x128xf32, #tpu.memory_space<vmem>>, vector<16x128xf32>
    tpu.vector_store %arg10[%c0_128, %c0_129], %325 {strides = array<i32>} : memref<16x128xf32, #tpu.memory_space<vmem>>, vector<16x128xf32>,
    return
  }
}

</mosaic_0001>

<bundles_post_ra>
// kernel: mul.10
= control target key start
LH: loop header
LB: loop body
LE: loop exit
PB: predicated region body
PF: predicated region fallthrough
CT: control target
= control target key end

     0   :  { %vm8_vm0 = vcmask 64512   ;;  %vm14_vm1 = vcmask 130112   ;;  %s42_s0 = inlined_call_operand.vmem [shape: f32[2,8], index: 0, kind: input, shape index: {}]   ;;  %s43_s1 = inlined_call_operand.vmem [shape: f32[16], index: 1, kind: output, shape index: {}]  }
   0x1   :  { %v5_v0 = vld [vmem:[%s42_s0] sm:$0x3]  ;;  %s25_s0 = smov 8  }
   0x2   :  { %6 = vst [vmem:[#allocation1] sm:$0x3] %v5_v0 }
   0x9   :  { %v11_v1 = vld [vmem:[#allocation1 + $0x1] sm:$0x1]   ;;  %v7_v2 = vld [vmem:[#allocation1] sm:$0x1]  }
   0xa   :  { %12 = vrot.lane.b32.xlu0 %v11_v1, %s25_s0  ;;  %9 = vst.msk [vmem:[#allocation0] sm:$0x1] %vm8_vm0, %v7_v2  }
  0x7c   :  { %v13_v3 = vpop.permute.xlu0 %12  }
  0x7d   :  { %15 = vst.msk [vmem:[#allocation0] sm:$0x1] %vm14_vm1, %v13_v3  }
  0x84   :  { %v20_v4 = vld [vmem:[#allocation0] sm:$0x1] }
  0x85   :  { %23 = vst [vmem:[%s43_s1] sm:$0x1] %v20_v4 }

// kernel: vanilla_transformer_forward.1
= control target key start
LH: loop header
LB: loop body
LE: loop exit
PB: predicated region body
PF: predicated region fallthrough
CT: control target
= control target key end

     0   :  { %vm42_vm0 = vcmask 195584   ;;  %vm148_vm1 = vcmask 261120   ;;  %v7983_v23 = vmov 0.0   ;;  %vm7984_vm2 = vmmov 0   ;;  %s10786_s3 = inlined_call_operand.vmem [shape: f32[24,32], index: 3, kind: input, shape index: {}]   ;;  %s10787_s0 = inlined_call_operand.vmem [shape: f32[16,24], index: 0, kind: input, shape index: {}]   ;;  %s10788_s4 = inlined_call_operand.vmem [shape: f32[12,33,16], index: 4, kind: input, shape index: {}]   ;;  %s10789_s1 = inlined_call_operand.vmem [shape: f32[16,32], index: 1, kind: input, shape index: {}]   ;;  %s10790_s2 = inlined_call_operand.vmem [shape: f32[2,1,8], index: 2, kind: input, shape index: {}]   ;;  %s10791_s5 = inlined_call_operand.vmem [shape: f32[4,16,32], index: 5, kind: input, shape index: {}]   ;;  %s10792_s8 = inlined_call_operand.vmem [shape: f32[2,6,32], index: 8, kind: input, shape index: {}]   ;;  %s10793_s6 = inlined_call_operand.vmem [shape: f32[2,33,2048], index: 6, kind: input, shape index: {}]   ;;  %s10794_s7 = inlined_call_operand.vmem [shape: f32[2,2048,32], index: 7, kind: input, shape index: {}]   ;;  %s10795_s9 = inlined_call_operand.vmem [shape: f32[33,128], index: 9, kind: input, shape index: {}]   ;;  %s10796_s10 = inlined_call_operand.vmem [shape: f32[16,128], index: 10, kind: output, shape index: {}]  }
   0x1   :  { %v39_v0 = vld [vmem:[%s10786_s3 + $0x10] sm:$0xff]  ;;  %v38_v1 = vld [vmem:[%s10786_s3 + $0x8] sm:$0xff]  ;;  %v35_v2 = vld [vmem:[%s10787_s0] sm:$0xff]  ;;  %vm388_vm3 = vcmask 130048   ;;  %vm557_vm4 = vcmask 64512  }
   0x2   :  { %7669 = vmatprep.subr.mxu0 %v39_v0  ;;  %v130_v3 = vld [vmem:[%s10788_s4 + $0x18] sm:$0xff]  ;;  %v37_v4 = vld [vmem:[%s10786_s3] sm:$0xff]  ;;  %7675 = vmatprep.mubr.msk.f32.mxu0 %vm42_vm0, %v35_v2  ;;  %v129_v5 = vld [vmem:[%s10788_s4 + $0x10] sm:$0xff] }
   0x3   :  { %7670 = vmatpush3.msra.mxu0 %v39_v0  ;;  %7678 = vmatprep.subr.mxu1 %v130_v3  ;;  %v36_v6 = vld [vmem:[%s10787_s0 + $0x8] sm:$0xff]  ;;  %v6398_v7 = vld [vmem:[%s10788_s4 + $0x40] sm:$0xff]  ;;  %v6397_v8 = vld [vmem:[%s10788_s4 + $0x38] sm:$0xff] }
   0x4   :  { %7671 = vmatprep.subr.mxu0 %v38_v1  ;;  %7679 = vmatpush3.msra.mxu1 %v130_v3  ;;  %v128_v9 = vld [vmem:[%s10788_s4 + $0x8] sm:$0xff]  ;;  %v6396_v10 = vld [vmem:[%s10788_s4 + $0x30] sm:$0xff]  ;;  %v127_v11 = vld [vmem:[%s10788_s4] sm:$0xff] }
   0x5   :  { %7672 = vmatpush3.msra.mxu0 %v38_v1  ;;  %7680 = vmatprep.subr.mxu1 %v129_v5  ;;  %v6395_v12 = vld [vmem:[%s10788_s4 + $0x28] sm:$0xff]  ;;  %v40_v15 = vld [vmem:[%s10789_s1] sm:$0xff]  ;;  %v6401_v21 = vld [vmem:[%s10788_s4 + $0x58] sm:$0xff] }
   0x6   :  { %7673 = vmatprep.subr.mxu0 %v37_v4  ;;  %7681 = vmatpush3.msra.mxu1 %v129_v5  ;;  %v6403_v13 = vld [vmem:[%s10788_s4 + $0x68] sm:$0xff]  ;;  %v6402_v20 = vld [vmem:[%s10788_s4 + $0x60] sm:$0xff]  ;;  %v6400_v22 = vld [vmem:[%s10788_s4 + $0x50] sm:$0xff] }
   0x7   :  { %7674 = vmatpush3.msra.mxu0 %v37_v4  ;;  %7682 = vmatprep.subr.mxu1 %v128_v9  ;;  %v41_v16 = vld [vmem:[%s10789_s1 + $0x8] sm:$0xff]  ;;  %v6405_v27 = vld [vmem:[%s10788_s4 + $0x20] ss:$0 sm:$0xff]  ;;  %v6411_v34 = vld [vmem:[%s10788_s4 + $0x70] ss:$0 sm:$0xff] }
   0x8   :  { %7676 = vmatmul.mubr.msk.f32.vlgmr.msra.gmra.mxu0 %vm42_vm0, %v36_v6  ;;  %7689 = vmatprep.subr.mxu0 %v6398_v7  ;;  %v6408_v24 = vld [vmem:[%s10788_s4 + $0x48] ss:$0 sm:$0xff]  ;;  %v8143_v40 = vld [vmem:[%s10790_s2 + $0x1] ss:$0 sm:$0xff]  ;;  %v8148_v44 = vld [vmem:[%s10790_s2] ss:$0 sm:$0xff] }
   0x9   :  { %7690 = vmatpush3.msra.mxu0 %v6398_v7  ;;  %7683 = vmatpush3.msra.mxu1 %v128_v9  ;;  %v6430_v61 = vld [vmem:[%s10788_s4 + $0xb8] sm:$0xff]  ;;  %v6425_v62 = vld [vmem:[%s10788_s4 + $0x90] sm:$0xff]  ;;  %v6428_v5 = vld [vmem:[%s10788_s4 + $0xa8] sm:$0xff] }
   0xa   :  { %7691 = vmatprep.subr.mxu0 %v6397_v8  ;;  %7684 = vmatprep.subr.mxu1 %v127_v11  ;;  %v6429_v3 = vld [vmem:[%s10788_s4 + $0xb0] sm:$0xff]  ;;  %v6424_v7 = vld [vmem:[%s10788_s4 + $0x88] sm:$0xff]  ;;  %v6423_v9 = vld [vmem:[%s10788_s4 + $0x80] sm:$0xff] }
   0xb   :  { %7692 = vmatpush3.msra.mxu0 %v6397_v8  ;;  %7685 = vmatpush3.msra.mxu1 %v127_v11  ;;  %v6427_v8 = vld [vmem:[%s10788_s4 + $0xa0] sm:$0xff] }
   0xc   :  { %7693 = vmatprep.subr.mxu0 %v6396_v10  ;;  %7700 = vmatprep.subr.mxu1 %v6403_v13  ;;  %v6435_v11 = vld [vmem:[%s10788_s4 + $0xe0] sm:$0xff] }
   0xd   :  { %7694 = vmatpush3.msra.mxu0 %v6396_v10  ;;  %v6422_v10 = vld [vmem:[%s10788_s4 + $0x78] sm:$0xff] }
   0xe   :  { %7695 = vmatprep.subr.mxu0 %v6395_v12 }
   0xf   :  { %7696 = vmatpush3.msra.mxu0 %v6395_v12  ;;  %v6434_v12 = vld [vmem:[%s10788_s4 + $0xd8] sm:$0xff] }
  0x10   :  { %7711 = vmatprep.subr.mxu0 %v7983_v23 }
  0xc8   :  { %v7677_v14 = vpop.f32.mrf.mxu0 }
  0xc9   :  { %v8092_v19 = vadd.f32 %v7677_v14, %v41_v16  ;;  %v6432_v14 = vld [vmem:[%s10788_s4 + $0xc8] sm:$0xff] }
  0xca   :  { %v115_v17 = vpop.f32.mrf.mxu0 }
  0xcb   :  { %v8090_v18 = vadd.f32 %v115_v17, %v40_v15 }
  0xcd   :  { %7686 = vmatprep.mubr.msk.f32.mxu1 %vm148_vm1, %v8090_v18  ;;  %7697 = vmatprep.mubr.msk.f32.mxu0 %vm148_vm1, %v8090_v18 }
  0xce   :  { %7687 = vmatmul.mubr.msk.f32.vlgmr.msra.gmra.mxu1 %vm148_vm1, %v8092_v19  ;;  %7698 = vmatmul.mubr.msk.f32.vlgmr.msra.gmra.mxu0 %vm148_vm1, %v8092_v19 }
  0xcf   :  { %7701 = vmatpush3.msra.mxu1 %v6403_v13  ;;  %7708 = vmatprep.mubr.msk.f32.mxu1 %vm148_vm1, %v8090_v18  ;;  %v6433_v13 = vld [vmem:[%s10788_s4 + $0xd0] sm:$0xff] }
  0xd0   :  { %7702 = vmatprep.subr.mxu1 %v6402_v20  ;;  %7713 = vmatprep.mubr.msk.f32.mxu0 %vm7984_vm2, %v7983_v23 }
  0xd1   :  { %7703 = vmatpush3.msra.mxu1 %v6402_v20 }
  0xd2   :  { %7704 = vmatprep.subr.mxu1 %v6401_v21 }
  0xd3   :  { %7705 = vmatpush3.msra.mxu1 %v6401_v21 }
  0xd4   :  { %7706 = vmatprep.subr.mxu1 %v6400_v22 }
  0xd5   :  { %7707 = vmatpush3.msra.mxu1 %v6400_v22  ;;  %v6440_v22 = vld [vmem:[%s10788_s4 + $0xc0] ss:$0 sm:$0xff] }
  0xd6   :  { %7709 = vmatmul.mubr.msk.f32.vlgmr.msra.gmra.mxu1 %vm148_vm1, %v8092_v19  ;;  %7716 = vmatprep.subr.mxu1 %v7983_v23 }
  0xd7   :  { %7718 = vmatprep.mubr.msk.f32.mxu1 %vm7984_vm2, %v7983_v23 }
 0x18e   :  { %v7688_v25 = vpop.f32.mrf.mxu1  ;;  %v7699_v26 = vpop.f32.mrf.mxu0 }
 0x18f   :  { %v306_v28 = vadd.f32 %v7699_v26, %v6408_v24  ;;  %v227_v32 = vadd.f32 %v7688_v25, %v6405_v27 }
 0x190   :  { %v300_v29 = vpop.f32.mrf.mxu0  ;;  %v221_v30 = vpop.f32.mrf.mxu1 }
 0x191   :  { %v301_v31 = vadd.f32 %v6408_v24, %v300_v29  ;;  %7717 = vmatpush3.xpose.msk.msra.mxu1 %vm388_vm3, %v306_v28  ;;  %v222_v33 = vadd.f32 %v6405_v27, %v221_v30  ;;  %v6437_v27 = vld [vmem:[%s10788_s4 + $0x98] ss:$0 sm:$0xff] }
 0x192   :  { %7726 = vmatprep.subr.mxu1 %v7983_v23 }
 0x193   :  { %7712 = vmatpush3.xpose.msk.msra.mxu0 %vm388_vm3, %v301_v31  ;;  %v6443_v31 = vld [vmem:[%s10788_s4 + $0xe8] ss:$0 sm:$0xff] }
 0x194   :  { %7719 = vmatmul.mubr.msk.f32.vlgmr.msra.gmra.mxu1 %vm388_vm3, %v227_v32  ;;  %7721 = vmatprep.subr.mxu0 %v7983_v23 }
 0x195   :  { %7728 = vmatprep.mubr.msk.f32.mxu1 %vm7984_vm2, %v7983_v23 }
 0x196   :  { %v7710_v35 = vpop.f32.mrf.mxu1  ;;  %7714 = vmatmul.mubr.msk.f32.vlgmr.msra.gmra.mxu0 %vm388_vm3, %v222_v33 }
 0x197   :  { %v385_v36 = vadd.f32 %v7710_v35, %v6411_v34  ;;  %7723 = vmatprep.mubr.msk.f32.mxu0 %vm7984_vm2, %v7983_v23 }
 0x198   :  { %v379_v37 = vpop.f32.mrf.mxu1 }
 0x199   :  { %v380_v38 = vadd.f32 %v6411_v34, %v379_v37  ;;  %7727 = vmatpush3.msra.mxu1 %v385_v36 }
 0x19a   :  { %7742 = vmatprep.subr.mxu1 %v6430_v61 }
 0x19b   :  { %7722 = vmatpush3.msra.mxu0 %v380_v38 }
 0x19c   :  { %7731 = vmatprep.subr.mxu0 %v6425_v62 }
 0x254   :  { %v537_v39 = vpop.f32.mrf.mxu1 }
 0x255   :  { %v542_v41 = vmul.f32 0.25, %v537_v39 }
 0x256   :  { %v461_v42 = vpop.f32.mrf.mxu0  ;;  %v7720_v43 = vpop.f32.mrf.mxu1 }
 0x257   :  { %v541_v45 = vmul.f32 0.25, %v461_v42  ;;  %v556_v46 = vadd.f32 %v8143_v40, %v542_v41 }
 0x258   :  { %v7715_v47 = vpop.f32.mrf.mxu0 }
 0x259   :  { %v561_v48 = vsel %vm557_vm4, %v556_v46, -inf  ;;  %v555_v49 = vadd.f32 %v8148_v44, %v541_v45 }
 0x25a   :  { %562 = vmax.xlane.f32.xlu0 %v561_v48 }
 0x25b   :  { %v558_v50 = vsel %vm557_vm4, %v555_v49, -inf }
 0x25e   :  { %559 = vmax.xlane.f32.xlu0 %v558_v50 }
 0x2e3   :  { %v563_v51 = vpop.xlane.xlu0 %562 }
 0x2e4   :  { %v565_v52 = vsub.f32 %v556_v46, %v563_v51 }
 0x2e6   :  { %v568_v53 = vmul.f32 1.442695, %v565_v52 }
 0x2e7   :  { %v560_v54 = vpop.xlane.xlu0 %559 }
 0x2e8   :  { %7931 = vpow2.f32 %v568_v53  ;;  %v564_v55 = vsub.f32 %v555_v49, %v560_v54 }
 0x2ea   :  { %v566_v56 = vmul.f32 1.442695, %v564_v55 }
 0x2ec   :  { %7933 = vpow2.f32 %v566_v56 }
 0x2f5   :  { %v7932_v57 = vpop.eup %7931 }
 0x2f6   :  { %v573_v58 = vsel %vm557_vm4, %v7932_v57, 0.0 }
 0x2f7   :  { %574 = vadd.xlane.f32.xlu1 %v573_v58 }
 0x2f9   :  { %v7934_v59 = vpop.eup %7933 }
 0x2fa   :  { %v570_v60 = vsel %vm557_vm4, %v7934_v59, 0.0 }
 0x2fb   :  { %571 = vadd.xlane.f32.xlu1 %v570_v60 }
 0x380   :  { %v575_v63 = vpop.xlane.xlu1 %574 }
 0x381   :  { %7935 = vrcp.f32 %v575_v63 }
 0x384   :  { %v572_v0 = vpop.xlane.xlu1 %571 }
 0x385   :  { %7937 = vrcp.f32 %v572_v0  ;;  %v726_v0 = vld [vmem:[%s10791_s5] sm:$0xff] }
 0x38e   :  { %v7936_v1 = vpop.eup %7935 }
 0x38f   :  { %v579_v2 = vmul.f32 %v7936_v1, %v7932_v57  ;;  %v6453_v1 = vld [vmem:[%s10791_s5 + $0x18] sm:$0xff] }
 0x391   :  { %7729 = vmatmul.mubr.msk.f32.vlgmr.msra.gmra.mxu1 %vm557_vm4, %v579_v2  ;;  %v6452_v2 = vld [vmem:[%s10791_s5 + $0x10] sm:$0xff] }
 0x392   :  { %v7938_v4 = vpop.eup %7937  ;;  %7743 = vmatpush3.msra.mxu1 %v6430_v61  ;;  %7750 = vmatprep.mubr.msk.f32.mxu1 %vm148_vm1, %v8090_v18 }
 0x393   :  { %7744 = vmatprep.subr.mxu1 %v6429_v3  ;;  %v577_v6 = vmul.f32 %v7938_v4, %v7934_v59 }
 0x394   :  { %7745 = vmatpush3.msra.mxu1 %v6429_v3 }
 0x395   :  { %7746 = vmatprep.subr.mxu1 %v6428_v5  ;;  %7724 = vmatmul.mubr.msk.f32.vlgmr.msra.gmra.mxu0 %vm557_vm4, %v577_v6 }
 0x396   :  { %7732 = vmatpush3.msra.mxu0 %v6425_v62  ;;  %7747 = vmatpush3.msra.mxu1 %v6428_v5 }
 0x397   :  { %7733 = vmatprep.subr.mxu0 %v6424_v7  ;;  %7739 = vmatprep.mubr.msk.f32.mxu0 %vm148_vm1, %v8090_v18 }
 0x398   :  { %7748 = vmatprep.subr.mxu1 %v6427_v8  ;;  %7734 = vmatpush3.msra.mxu0 %v6424_v7  ;;  %v1472_v7 = vlaneseq }
 0x399   :  { %7749 = vmatpush3.msra.mxu1 %v6427_v8  ;;  %7735 = vmatprep.subr.mxu0 %v6423_v9 }
 0x39a   :  { %7751 = vmatmul.mubr.msk.f32.vlgmr.msra.gmra.mxu1 %vm148_vm1, %v8092_v19  ;;  %7736 = vmatpush3.msra.mxu0 %v6423_v9  ;;  %v8263_v8 = vshrl.u32 %v1472_v7, 7 }
 0x39b   :  { %7737 = vmatprep.subr.mxu0 %v6422_v10  ;;  %7764 = vmatprep.subr.mxu1 %v7983_v23 }
 0x39c   :  { %7738 = vmatpush3.msra.mxu0 %v6422_v10  ;;  %7766 = vmatprep.mubr.msk.f32.mxu1 %vm7984_vm2, %v7983_v23  ;;  %v1474_v9 = vsub.s32 0, %v8263_v8  ;;  %v8269_v10 = vld [vmem:[%s10792_s8] sm:$0x3f] }
 0x39d   :  { %7740 = vmatmul.mubr.msk.f32.vlgmr.msra.gmra.mxu0 %vm148_vm1, %v8092_v19  ;;  %7753 = vmatprep.subr.mxu0 %v6435_v11 }
 0x39e   :  { %7754 = vmatpush3.msra.mxu0 %v6435_v11  ;;  %7761 = vmatprep.mubr.msk.f32.mxu0 %vm148_vm1, %v8090_v18 }
 0x39f   :  { %7755 = vmatprep.subr.mxu0 %v6434_v12 }
 0x3a0   :  { %7756 = vmatpush3.msra.mxu0 %v6434_v12  ;;  %v1475_v12 = vrot.slane %v8269_v10, %v1474_v9 }
 0x3a1   :  { %7757 = vmatprep.subr.mxu0 %v6433_v13 }
 0x3a2   :  { %7758 = vmatpush3.msra.mxu0 %v6433_v13 }
 0x3a3   :  { %7759 = vmatprep.subr.mxu0 %v6432_v14 }
 0x3a4   :  { %7760 = vmatpush3.msra.mxu0 %v6432_v14 }
 0x3a5   :  { %7762 = vmatmul.mubr.msk.f32.vlgmr.msra.gmra.mxu0 %vm148_vm1, %v8092_v19  ;;  %7774 = vmatprep.subr.mxu0 %v7983_v23 }
 0x3a6   :  { %7776 = vmatprep.mubr.msk.f32.mxu0 %vm7984_vm2, %v7983_v23 }
 0x451   :  { %v8212_v15 = vpop.f32.mrf.mxu1 }
 0x453   :  { %v7730_v16 = vpop.f32.mrf.mxu1 }
 0x455   :  { %v8214_v17 = vpop.f32.mrf.mxu0 }
 0x457   :  { %v7725_v20 = vpop.f32.mrf.mxu0 }
 0x45a   :  { %v7752_v21 = vpop.f32.mrf.mxu1 }
 0x45b   :  { %v901_v30 = vadd.f32 %v7752_v21, %v6440_v22 }
 0x45c   :  { %v895_v24 = vpop.f32.mrf.mxu1 }
 0x45d   :  { %v896_v25 = vadd.f32 %v6440_v22, %v895_v24  ;;  %v7741_v26 = vpop.f32.mrf.mxu0 }
 0x45e   :  { %v822_v32 = vadd.f32 %v7741_v26, %v6437_v27 }
 0x45f   :  { %7765 = vmatpush3.xpose.msk.msra.mxu1 %vm388_vm3, %v896_v25  ;;  %v816_v28 = vpop.f32.mrf.mxu0 }
 0x460   :  { %v817_v29 = vadd.f32 %v6437_v27, %v816_v28  ;;  %7769 = vmatprep.subr.mxu1 %v7983_v23 }
 0x462   :  { %7767 = vmatmul.mubr.msk.f32.vlgmr.msra.gmra.mxu1 %vm388_vm3, %v817_v29 }
 0x463   :  { %7770 = vmatpush3.xpose.msk.msra.mxu1 %vm388_vm3, %v901_v30  ;;  %7771 = vmatprep.mubr.msk.f32.mxu1 %vm7984_vm2, %v7983_v23 }
 0x464   :  { %7779 = vmatprep.subr.mxu1 %v7983_v23 }
 0x465   :  { %v7763_v33 = vpop.f32.mrf.mxu0 }
 0x466   :  { %v980_v34 = vadd.f32 %v7763_v33, %v6443_v31  ;;  %7772 = vmatmul.mubr.msk.f32.vlgmr.msra.gmra.mxu1 %vm388_vm3, %v822_v32 }
 0x467   :  { %v974_v35 = vpop.f32.mrf.mxu0  ;;  %7781 = vmatprep.mubr.msk.f32.mxu1 %vm7984_vm2, %v7983_v23 }
 0x468   :  { %v975_v36 = vadd.f32 %v6443_v31, %v974_v35  ;;  %7780 = vmatpush3.msra.mxu1 %v980_v34 }
 0x46a   :  { %7775 = vmatpush3.msra.mxu0 %v975_v36  ;;  %v1570_v36 = vld [vmem:[%s10793_s6 + $0x198] sm:$0xff] }
 0x46b   :  { %7784 = vmatprep.subr.mxu0 %v6453_v1 }
 0x522   :  { %v1055_v37 = vpop.f32.mrf.mxu1 }
 0x523   :  { %v1135_v38 = vmul.f32 0.25, %v1055_v37  ;;  %v1567_v37 = vld [vmem:[%s10793_s6 + $0x180] sm:$0xff] }
 0x524   :  { %v7768_v39 = vpop.f32.mrf.mxu1 }
 0x525   :  { %v1137_v41 = vadd.f32 %v8148_v44, %v1135_v38  ;;  %v1569_v38 = vld [vmem:[%s10793_s6 + $0x190] sm:$0xff]  ;;  %v1552_v39 = vld [vmem:[%s10793_s6 + $0x108] sm:$0xff] }
 0x526   :  { %v1131_v42 = vpop.f32.mrf.mxu1 }
 0x527   :  { %v1136_v43 = vmul.f32 0.25, %v1131_v42  ;;  %v1139_v45 = vsel %vm557_vm4, %v1137_v41, -inf  ;;  %v1551_v42 = vld [vmem:[%s10793_s6 + $0x100] sm:$0xff] }
 0x528   :  { %1140 = vmax.xlane.f32.xlu0 %v1139_v45  ;;  %v7773_v46 = vpop.f32.mrf.mxu1  ;;  %v1536_v45 = vld [vmem:[%s10793_s6 + $0x88] sm:$0xff] }
 0x529   :  { %v1138_v47 = vadd.f32 %v8143_v40, %v1136_v43  ;;  %v727_v40 = vld [vmem:[%s10791_s5 + $0x8] sm:$0xff]  ;;  %v1553_v43 = vld [vmem:[%s10793_s6 + $0x110] sm:$0xff]  ;;  %v1538_v46 = vld [vmem:[%s10793_s6 + $0x98] sm:$0xff] }
 0x52a   :  { %7791 = vmatprep.subr.mxu1 %v727_v40 }
 0x52b   :  { %v1142_v48 = vsel %vm557_vm4, %v1138_v47, -inf }
 0x52c   :  { %1143 = vmax.xlane.f32.xlu1 %v1142_v48  ;;  %v1537_v48 = vld [vmem:[%s10793_s6 + $0x90] sm:$0xff] }
 0x5b1   :  { %v1141_v49 = vpop.xlane.xlu0 %1140 }
 0x5b2   :  { %v1145_v50 = vsub.f32 %v1137_v41, %v1141_v49  ;;  %v1554_v41 = vld [vmem:[%s10793_s6 + $0x118] sm:$0xff]  ;;  %v1520_v49 = vld [vmem:[%s10793_s6 + $0x8] sm:$0xff] }
 0x5b4   :  { %v1147_v51 = vmul.f32 1.442695, %v1145_v50  ;;  %v1522_v50 = vld [vmem:[%s10793_s6 + $0x18] sm:$0xff] }
 0x5b5   :  { %v1144_v52 = vpop.xlane.xlu1 %1143 }
 0x5b6   :  { %7939 = vpow2.f32 %v1147_v51  ;;  %v1146_v53 = vsub.f32 %v1138_v47, %v1144_v52  ;;  %v1535_v47 = vld [vmem:[%s10793_s6 + $0x80] sm:$0xff]  ;;  %v1521_v52 = vld [vmem:[%s10793_s6 + $0x10] sm:$0xff] }
 0x5b7   :  { %v1519_v51 = vld [vmem:[%s10793_s6] sm:$0xff] }
 0x5b8   :  { %v1149_v54 = vmul.f32 1.442695, %v1146_v53  ;;  %v1572_v53 = vld [vmem:[%s10793_s6 + $0x1a8] sm:$0xff] }
 0x5ba   :  { %7941 = vpow2.f32 %v1149_v54  ;;  %v1574_v54 = vld [vmem:[%s10793_s6 + $0x1b8] sm:$0xff] }
 0x5c3   :  { %v7940_v44 = vpop.eup %7939 }
 0x5c4   :  { %v1151_v55 = vsel %vm557_vm4, %v7940_v44, 0.0 }
 0x5c5   :  { %1152 = vadd.xlane.f32.xlu0 %v1151_v55 }
 0x5c7   :  { %v7942_v56 = vpop.eup %7941 }
 0x5c8   :  { %v1154_v57 = vsel %vm557_vm4, %v7942_v56, 0.0 }
 0x5c9   :  { %1155 = vadd.xlane.f32.xlu1 %v1154_v57 }
 0x64e   :  { %v1153_v58 = vpop.xlane.xlu0 %1152 }
 0x64f   :  { %7943 = vrcp.f32 %v1153_v58 }
 0x652   :  { %v1156_v59 = vpop.xlane.xlu1 %1155 }
 0x653   :  { %7945 = vrcp.f32 %v1156_v59  ;;  %v1509_v59 = vsub.s32 2, %v8263_v8 }
 0x65c   :  { %v7944_v60 = vpop.eup %7943 }
 0x65d   :  { %v1158_v61 = vmul.f32 %v7944_v60, %v7940_v44 }
 0x65f   :  { %7777 = vmatmul.mubr.msk.f32.vlgmr.msra.gmra.mxu0 %vm557_vm4, %v1158_v61  ;;  %v1515_v61 = vsub.s32 3, %v8263_v8 }
 0x660   :  { %v7946_v62 = vpop.eup %7945  ;;  %7785 = vmatpush3.msra.mxu0 %v6453_v1 }
 0x661   :  { %v1160_v63 = vmul.f32 %v7946_v62, %v7942_v56  ;;  %7786 = vmatprep.subr.mxu0 %v6452_v2 }
 0x662   :  { %7787 = vmatpush3.msra.mxu0 %v6452_v2  ;;  %v1516_v2 = vrot.slane %v8269_v10, %v1515_v61 }
 0x663   :  { %7782 = vmatmul.mubr.msk.f32.vlgmr.msra.gmra.mxu1 %vm557_vm4, %v1160_v63  ;;  %v1510_v63 = vrot.slane %v8269_v10, %v1509_v59  ;;  %v1558_v10 = vld [vmem:[%s10793_s6 + $0x138] sm:$0xff] }
 0x664   :  { %7792 = vmatpush3.msra.mxu1 %v727_v40  ;;  %7795 = vmatprep.mubr.msk.f32.mxu1 %vm388_vm3, %v8214_v17 }
 0x665   :  { %7793 = vmatprep.subr.mxu1 %v726_v0 }
 0x666   :  { %7794 = vmatpush3.msra.mxu1 %v726_v0 }
 0x667   :  { %7796 = vmatmul.mubr.msk.f32.vlgmr.msra.gmra.mxu1 %vm388_vm3, %v8212_v15  ;;  %1770 = vmatprep.subr.mxu1 %v1570_v36  ;;  %v1528_v36 = vld [vmem:[%s10793_s6 + $0x48] sm:$0xff] }
 0x668   :  { %1810 = vmatprep.mubr.f32.mxu1 %v7983_v23  ;;  %1771 = vmatpush1.msra.mxu1 %v1569_v38  ;;  %v1527_v38 = vld [vmem:[%s10793_s6 + $0x40] sm:$0xff] }
 0x669   :  { %1772 = vmatprep.subr.mxu1 %v1554_v41  ;;  %v1580_v41 = vld [vmem:[%s10793_s6 + $0x1e8] sm:$0xff] }
 0x66a   :  { %1773 = vmatpush1.msra.mxu1 %v1553_v43  ;;  %v1579_v43 = vld [vmem:[%s10793_s6 + $0x1e0] sm:$0xff] }
 0x66b   :  { %1774 = vmatprep.subr.mxu1 %v1538_v46  ;;  %v1564_v46 = vld [vmem:[%s10793_s6 + $0x168] sm:$0xff] }
 0x66c   :  { %1775 = vmatpush1.msra.mxu1 %v1537_v48  ;;  %v1563_v48 = vld [vmem:[%s10793_s6 + $0x160] sm:$0xff] }
 0x66d   :  { %1776 = vmatprep.subr.mxu1 %v1522_v50  ;;  %v1548_v50 = vld [vmem:[%s10793_s6 + $0xe8] sm:$0xff] }
 0x66e   :  { %1777 = vmatpush1.msra.mxu1 %v1521_v52  ;;  %v1547_v52 = vld [vmem:[%s10793_s6 + $0xe0] sm:$0xff] }
 0x66f   :  { %1924 = vmatprep.subr.mxu1 %v1574_v54  ;;  %v1532_v54 = vld [vmem:[%s10793_s6 + $0x68] sm:$0xff] }
 0x71f   :  { %v1230_v3 = vpop.f32.mrf.mxu0 }
 0x720   :  { %7788 = vmatprep.mubr.msk.f32.mxu0 %vm388_vm3, %v1230_v3 }
 0x721   :  { %v7778_v4 = vpop.f32.mrf.mxu0 }
 0x723   :  { %v1303_v5 = vpop.f32.mrf.mxu1 }
 0x724   :  { %7789 = vmatmul.mubr.msk.f32.vlgmr.msra.gmra.mxu0 %vm388_vm3, %v1303_v5  ;;  %v1571_v5 = vld [vmem:[%s10793_s6 + $0x1a0] sm:$0xff] }
 0x725   :  { %v7783_v6 = vpop.f32.mrf.mxu1  ;;  %1733 = vmatprep.mubr.f32.mxu0 %v7983_v23 }
 0x726   :  { %v1573_v6 = vld [vmem:[%s10793_s6 + $0x1b0] sm:$0xff] }
 0x727   :  { %v7797_v11 = vpop.f32.mrf.mxu1 }
 0x729   :  { %v1463_v15 = vpop.f32.mrf.mxu1 }
 0x7e4   :  { %v7790_v13 = vpop.f32.mrf.mxu0 }
 0x7e5   :  { %v1469_v14 = vadd.f32 %v7797_v11, %v7790_v13  ;;  %v1556_v11 = vld [vmem:[%s10793_s6 + $0x128] sm:$0xff]  ;;  %v1557_v13 = vld [vmem:[%s10793_s6 + $0x130] sm:$0xff] }
 0x7e6   :  { %v1382_v16 = vpop.f32.mrf.mxu0 }
 0x7e7   :  { %v1477_v17 = vadd.f32 %v1475_v12, %v1469_v14  ;;  %v1464_v20 = vadd.f32 %v1463_v15, %v1382_v16  ;;  %v1540_v15 = vld [vmem:[%s10793_s6 + $0xa8] sm:$0xff]  ;;  %v1542_v16 = vld [vmem:[%s10793_s6 + $0xb8] sm:$0xff] }
 0x7e9   :  { %v1476_v21 = vadd.f32 %v1475_v12, %v1464_v20  ;;  %v1479_v22 = vadd.f32 %v1477_v17, %v8092_v19  ;;  %v1555_v12 = vld [vmem:[%s10793_s6 + $0x120] sm:$0xff]  ;;  %v1541_v20 = vld [vmem:[%s10793_s6 + $0xb0] sm:$0xff] }
 0x7ea   :  { %v1539_v17 = vld [vmem:[%s10793_s6 + $0xa0] sm:$0xff] }
 0x7eb   :  { %v1483_v24 = vsel %vm148_vm1, %v1479_v22, 0.0  ;;  %v1478_v25 = vadd.f32 %v1476_v21, %v8090_v18  ;;  %v1568_v18 = vld [vmem:[%s10793_s6 + $0x188] sm:$0xff] }
 0x7ec   :  { %1484 = vadd.xlane.f32.xlu1 %v1483_v24  ;;  %1693 = vmatprep.subr.mxu0 %v1568_v18  ;;  %v1524_v21 = vld [vmem:[%s10793_s6 + $0x28] sm:$0xff]  ;;  %v1523_v24 = vld [vmem:[%s10793_s6 + $0x20] sm:$0xff]  ;;  %v1545_v18 = vld [vmem:[%s10793_s6 + $0xd0] sm:$0xff] }
 0x7ed   :  { %v1480_v26 = vsel %vm148_vm1, %v1478_v25, 0.0  ;;  %1694 = vmatpush1.msra.mxu0 %v1567_v37  ;;  %v1530_v37 = vld [vmem:[%s10793_s6 + $0x58] sm:$0xff] }
 0x7ee   :  { %1481 = vadd.xlane.f32.xlu0 %v1480_v26  ;;  %1695 = vmatprep.subr.mxu0 %v1552_v39  ;;  %v1576_v26 = vld [vmem:[%s10793_s6 + $0x1c8] sm:$0xff]  ;;  %v1529_v39 = vld [vmem:[%s10793_s6 + $0x50] sm:$0xff] }
 0x7ef   :  { %1696 = vmatpush1.msra.mxu0 %v1551_v42  ;;  %v1582_v42 = vld [vmem:[%s10793_s6 + $0x1f8] sm:$0xff] }
 0x7f0   :  { %1697 = vmatprep.subr.mxu0 %v1536_v45  ;;  %v1581_v45 = vld [vmem:[%s10793_s6 + $0x1f0] sm:$0xff] }
 0x7f1   :  { %1698 = vmatpush1.msra.mxu0 %v1535_v47  ;;  %v1566_v47 = vld [vmem:[%s10793_s6 + $0x178] sm:$0xff] }
 0x7f2   :  { %1699 = vmatprep.subr.mxu0 %v1520_v49  ;;  %v1565_v49 = vld [vmem:[%s10793_s6 + $0x170] sm:$0xff] }
 0x7f3   :  { %1700 = vmatpush1.msra.mxu0 %v1519_v51  ;;  %v1550_v51 = vld [vmem:[%s10793_s6 + $0xf8] sm:$0xff] }
 0x7f4   :  { %1847 = vmatprep.subr.mxu0 %v1572_v53  ;;  %v1549_v53 = vld [vmem:[%s10793_s6 + $0xf0] sm:$0xff] }
 0x875   :  { %v1485_v27 = vpop.xlane.xlu1 %1484 }
 0x876   :  { %v1488_v28 = vmul.f32 0.03125, %v1485_v27  ;;  %v1578_v27 = vld [vmem:[%s10793_s6 + $0x1d8] sm:$0xff] }
 0x877   :  { %v1482_v29 = vpop.xlane.xlu0 %1481 }
 0x878   :  { %v1490_v30 = vsub.f32 %v1479_v22, %v1488_v28  ;;  %v1487_v31 = vmul.f32 0.03125, %v1482_v29  ;;  %v1526_v22 = vld [vmem:[%s10793_s6 + $0x38] sm:$0xff]  ;;  %v1575_v28 = vld [vmem:[%s10793_s6 + $0x1c0] sm:$0xff]  ;;  %v1577_v29 = vld [vmem:[%s10793_s6 + $0x1d0] sm:$0xff] }
 0x87a   :  { %v1489_v32 = vsub.f32 %v1478_v25, %v1487_v31  ;;  %v1492_v33 = vmul.f32 %v1490_v30, %v1490_v30  ;;  %v1525_v25 = vld [vmem:[%s10793_s6 + $0x30] sm:$0xff]  ;;  %v1562_v31 = vld [vmem:[%s10793_s6 + $0x158] sm:$0xff] }
 0x87c   :  { %v1496_v34 = vsel %vm148_vm1, %v1492_v33, 0.0  ;;  %v1491_v35 = vmul.f32 %v1489_v32, %v1489_v32  ;;  %v1561_v33 = vld [vmem:[%s10793_s6 + $0x150] sm:$0xff] }
 0x87d   :  { %1497 = vadd.xlane.f32.xlu1 %v1496_v34  ;;  %v1544_v34 = vld [vmem:[%s10793_s6 + $0xc8] sm:$0xff] }
 0x87e   :  { %v1493_v19 = vsel %vm148_vm1, %v1491_v35, 0.0  ;;  %v1546_v35 = vld [vmem:[%s10793_s6 + $0xd8] sm:$0xff] }
 0x87f   :  { %1494 = vadd.xlane.f32.xlu0 %v1493_v19  ;;  %v1543_v19 = vld [vmem:[%s10793_s6 + $0xc0] sm:$0xff] }
 0x906   :  { %v1498_v44 = vpop.xlane.xlu1 %1497 }
 0x907   :  { %v1500_v55 = vmul.f32 0.03125, %v1498_v44  ;;  %v1534_v44 = vld [vmem:[%s10793_s6 + $0x78] sm:$0xff] }
 0x908   :  { %v1495_v56 = vpop.xlane.xlu0 %1494 }
 0x909   :  { %v1502_v57 = vadd.f32 1e-05, %v1500_v55  ;;  %v1499_v40 = vmul.f32 0.03125, %v1495_v56  ;;  %v1531_v55 = vld [vmem:[%s10793_s6 + $0x60] sm:$0xff]  ;;  %v1533_v56 = vld [vmem:[%s10793_s6 + $0x70] sm:$0xff] }
 0x90b   :  { %v1501_v58 = vadd.f32 1e-05, %v1499_v40  ;;  %7947 = vrsqrt.f32 %v1502_v57  ;;  %v2348_v57 = vld [vmem:[%s10794_s7 + $0xf8] sm:$0xff] }
 0x90c   :  { %v2380_v40 = vld [vmem:[%s10794_s7 + $0x1f8] sm:$0xff] }
 0x90d   :  { %7949 = vrsqrt.f32 %v1501_v58  ;;  %v2332_v58 = vld [vmem:[%s10794_s7 + $0x78] sm:$0xff] }
 0x918   :  { %v7948_v60 = vpop.eup %7947 }
 0x919   :  { %v1506_v1 = vmul.f32 %v7948_v60, %v1490_v30  ;;  %v1560_v30 = vld [vmem:[%s10793_s6 + $0x148] sm:$0xff]  ;;  %v2364_v60 = vld [vmem:[%s10794_s7 + $0x178] sm:$0xff] }
 0x91a   :  { %v7950_v62 = vpop.eup %7949 }
 0x91b   :  { %v1505_v0 = vmul.f32 %v7950_v62, %v1489_v32  ;;  %v1512_v7 = vmul.f32 %v1510_v63, %v1506_v1  ;;  %v1559_v32 = vld [vmem:[%s10793_s6 + $0x140] sm:$0xff]  ;;  %v2347_v62 = vld [vmem:[%s10794_s7 + $0xf0] sm:$0xff] }
 0x91c   :  { %v2363_v1 = vld [vmem:[%s10794_s7 + $0x170] sm:$0xff] }
 0x91d   :  { %v1511_v3 = vmul.f32 %v1510_v63, %v1505_v0  ;;  %v8366_v14 = vadd.f32 %v1516_v2, %v1512_v7  ;;  %v2379_v63 = vld [vmem:[%s10794_s7 + $0x1f0] sm:$0xff]  ;;  %v2345_v7 = vld [vmem:[%s10794_s7 + $0xe0] sm:$0xff] }
 0x91e   :  { %v2331_v0 = vld [vmem:[%s10794_s7 + $0x70] sm:$0xff] }
 0x91f   :  { %v8342_v4 = vadd.f32 %v1516_v2, %v1511_v3  ;;  %v2346_v2 = vld [vmem:[%s10794_s7 + $0xe8] sm:$0xff] }
 0x920   :  { %v2378_v3 = vld [vmem:[%s10794_s7 + $0x1e8] sm:$0xff] }
 0x921   :  { %6474 = vmatmul.mubr.msk.f32.vlgmr.msra.gmra.mxu0 %vm148_vm1, %v8342_v4  ;;  %6476 = vmatmul.mubr.msk.f32.vlgmr.msra.gmra.mxu1 %vm148_vm1, %v8342_v4 }
 0x922   :  { %1848 = vmatpush1.msra.mxu0 %v1571_v5  ;;  %1925 = vmatpush1.msra.mxu1 %v1573_v6  ;;  %v2330_v5 = vld [vmem:[%s10794_s7 + $0x68] sm:$0xff] }
 0x923   :  { %1849 = vmatprep.subr.mxu0 %v1556_v11  ;;  %1926 = vmatprep.subr.mxu1 %v1558_v10  ;;  %v2362_v6 = vld [vmem:[%s10794_s7 + $0x168] sm:$0xff]  ;;  %v2377_v11 = vld [vmem:[%s10794_s7 + $0x1e0] sm:$0xff] }
 0x924   :  { %1739 = vmatprep.mubr.f32.mxu0 %v7983_v23  ;;  %1816 = vmatprep.mubr.f32.mxu1 %v7983_v23  ;;  %v2329_v10 = vld [vmem:[%s10794_s7 + $0x60] sm:$0xff] }
 0x925   :  { %1850 = vmatpush1.msra.mxu0 %v1555_v12  ;;  %1927 = vmatpush1.msra.mxu1 %v1557_v13  ;;  %v2361_v12 = vld [vmem:[%s10794_s7 + $0x160] sm:$0xff]  ;;  %v2344_v13 = vld [vmem:[%s10794_s7 + $0xd8] sm:$0xff] }
 0x926   :  { %6475 = vmatmul.mubr.msk.f32.gmra.mxu0 %vm148_vm1, %v8366_v14  ;;  %6477 = vmatmul.mubr.msk.f32.gmra.mxu1 %vm148_vm1, %v8366_v14 }
 0x927   :  { %1851 = vmatprep.subr.mxu0 %v1540_v15  ;;  %1928 = vmatprep.subr.mxu1 %v1542_v16  ;;  %v2376_v15 = vld [vmem:[%s10794_s7 + $0x1d8] sm:$0xff] }
 0x928   :  { %1852 = vmatpush1.msra.mxu0 %v1539_v17  ;;  %1929 = vmatpush1.msra.mxu1 %v1541_v20  ;;  %v2328_v16 = vld [vmem:[%s10794_s7 + $0x58] sm:$0xff]  ;;  %v2343_v20 = vld [vmem:[%s10794_s7 + $0xd0] sm:$0xff] }
 0x929   :  { %1853 = vmatprep.subr.mxu0 %v1524_v21  ;;  %1930 = vmatprep.subr.mxu1 %v1526_v22  ;;  %v2360_v17 = vld [vmem:[%s10794_s7 + $0x158] sm:$0xff]  ;;  %v2375_v21 = vld [vmem:[%s10794_s7 + $0x1d0] sm:$0xff] }
 0x92a   :  { %1854 = vmatpush1.msra.mxu0 %v1523_v24  ;;  %1887 = vmatprep.mubr.f32.mxu0 %v7983_v23  ;;  %v2327_v22 = vld [vmem:[%s10794_s7 + $0x50] sm:$0xff] }
 0x92b   :  { %1931 = vmatpush1.msra.mxu1 %v1525_v25  ;;  %1964 = vmatprep.mubr.f32.mxu1 %v7983_v23  ;;  %v2359_v24 = vld [vmem:[%s10794_s7 + $0x150] sm:$0xff]  ;;  %v2342_v25 = vld [vmem:[%s10794_s7 + $0xc8] sm:$0xff] }
 0x92c   :  { %6478 = vmatmul.mubr.msk.f32.vlgmr.msra.gmra.mxu0 %vm148_vm1, %v8342_v4  ;;  %6480 = vmatmul.mubr.msk.f32.vlgmr.msra.gmra.mxu1 %vm148_vm1, %v8342_v4 }
 0x92d   :  { %2001 = vmatprep.subr.mxu0 %v1576_v26  ;;  %2078 = vmatprep.subr.mxu1 %v1578_v27  ;;  %v2374_v26 = vld [vmem:[%s10794_s7 + $0x1c8] sm:$0xff] }
 0x92e   :  { %2002 = vmatpush1.msra.mxu0 %v1575_v28  ;;  %2079 = vmatpush1.msra.mxu1 %v1577_v29  ;;  %v2326_v27 = vld [vmem:[%s10794_s7 + $0x48] sm:$0xff]  ;;  %v2341_v29 = vld [vmem:[%s10794_s7 + $0xc0] sm:$0xff] }
 0x92f   :  { %2003 = vmatprep.subr.mxu0 %v1560_v30  ;;  %2080 = vmatprep.subr.mxu1 %v1562_v31  ;;  %v2358_v28 = vld [vmem:[%s10794_s7 + $0x148] sm:$0xff]  ;;  %v2373_v30 = vld [vmem:[%s10794_s7 + $0x1c0] sm:$0xff] }
 0x930   :  { %1893 = vmatprep.mubr.f32.mxu0 %v7983_v23  ;;  %1970 = vmatprep.mubr.f32.mxu1 %v7983_v23  ;;  %v2325_v31 = vld [vmem:[%s10794_s7 + $0x40] sm:$0xff] }
 0x931   :  { %2004 = vmatpush1.msra.mxu0 %v1559_v32  ;;  %2081 = vmatpush1.msra.mxu1 %v1561_v33  ;;  %v2357_v32 = vld [vmem:[%s10794_s7 + $0x140] sm:$0xff]  ;;  %v2340_v33 = vld [vmem:[%s10794_s7 + $0xb8] sm:$0xff] }
 0x932   :  { %6479 = vmatmul.mubr.msk.f32.gmra.mxu0 %vm148_vm1, %v8366_v14  ;;  %6481 = vmatmul.mubr.msk.f32.gmra.mxu1 %vm148_vm1, %v8366_v14 }
 0x933   :  { %2005 = vmatprep.subr.mxu0 %v1544_v34  ;;  %2082 = vmatprep.subr.mxu1 %v1546_v35  ;;  %v2372_v34 = vld [vmem:[%s10794_s7 + $0x1b8] sm:$0xff] }
 0x934   :  { %2006 = vmatpush1.msra.mxu0 %v1543_v19  ;;  %2083 = vmatpush1.msra.mxu1 %v1545_v18  ;;  %v2324_v35 = vld [vmem:[%s10794_s7 + $0x38] sm:$0xff]  ;;  %v2339_v18 = vld [vmem:[%s10794_s7 + $0xb0] sm:$0xff] }
 0x935   :  { %2007 = vmatprep.subr.mxu0 %v1528_v36  ;;  %2084 = vmatprep.subr.mxu1 %v1530_v37  ;;  %v2356_v19 = vld [vmem:[%s10794_s7 + $0x138] sm:$0xff]  ;;  %v2371_v36 = vld [vmem:[%s10794_s7 + $0x1b0] sm:$0xff] }
 0x936   :  { %2008 = vmatpush1.msra.mxu0 %v1527_v38  ;;  %2041 = vmatprep.mubr.f32.mxu0 %v7983_v23  ;;  %v2323_v37 = vld [vmem:[%s10794_s7 + $0x30] sm:$0xff] }
 0x937   :  { %2085 = vmatpush1.msra.mxu1 %v1529_v39  ;;  %2118 = vmatprep.mubr.f32.mxu1 %v7983_v23  ;;  %v2355_v38 = vld [vmem:[%s10794_s7 + $0x130] sm:$0xff]  ;;  %v2338_v39 = vld [vmem:[%s10794_s7 + $0xa8] sm:$0xff] }
 0x938   :  { %6482 = vmatmul.mubr.msk.f32.vlgmr.msra.gmra.mxu0 %vm148_vm1, %v8342_v4  ;;  %6484 = vmatmul.mubr.msk.f32.vlgmr.msra.gmra.mxu1 %vm148_vm1, %v8342_v4 }
 0x939   :  { %2155 = vmatprep.subr.mxu0 %v1580_v41  ;;  %2232 = vmatprep.subr.mxu1 %v1582_v42  ;;  %v2370_v41 = vld [vmem:[%s10794_s7 + $0x1a8] sm:$0xff] }
 0x93a   :  { %2156 = vmatpush1.msra.mxu0 %v1579_v43  ;;  %2233 = vmatpush1.msra.mxu1 %v1581_v45  ;;  %v2322_v42 = vld [vmem:[%s10794_s7 + $0x28] sm:$0xff]  ;;  %v2337_v45 = vld [vmem:[%s10794_s7 + $0xa0] sm:$0xff] }
 0x93b   :  { %2157 = vmatprep.subr.mxu0 %v1564_v46  ;;  %2234 = vmatprep.subr.mxu1 %v1566_v47  ;;  %v2354_v43 = vld [vmem:[%s10794_s7 + $0x128] sm:$0xff]  ;;  %v2369_v46 = vld [vmem:[%s10794_s7 + $0x1a0] sm:$0xff] }
 0x93c   :  { %2047 = vmatprep.mubr.f32.mxu0 %v7983_v23  ;;  %2124 = vmatprep.mubr.f32.mxu1 %v7983_v23  ;;  %v2321_v47 = vld [vmem:[%s10794_s7 + $0x20] sm:$0xff] }
 0x93d   :  { %2158 = vmatpush1.msra.mxu0 %v1563_v48  ;;  %2235 = vmatpush1.msra.mxu1 %v1565_v49  ;;  %v2353_v48 = vld [vmem:[%s10794_s7 + $0x120] sm:$0xff]  ;;  %v2336_v49 = vld [vmem:[%s10794_s7 + $0x98] sm:$0xff] }
 0x93e   :  { %6483 = vmatmul.mubr.msk.f32.gmra.mxu0 %vm148_vm1, %v8366_v14  ;;  %6485 = vmatmul.mubr.msk.f32.gmra.mxu1 %vm148_vm1, %v8366_v14 }
 0x93f   :  { %2159 = vmatprep.subr.mxu0 %v1548_v50  ;;  %2236 = vmatprep.subr.mxu1 %v1550_v51  ;;  %v2368_v50 = vld [vmem:[%s10794_s7 + $0x198] sm:$0xff] }
 0x940   :  { %2160 = vmatpush1.msra.mxu0 %v1547_v52  ;;  %2237 = vmatpush1.msra.mxu1 %v1549_v53  ;;  %v2320_v51 = vld [vmem:[%s10794_s7 + $0x18] sm:$0xff]  ;;  %v2335_v53 = vld [vmem:[%s10794_s7 + $0x90] sm:$0xff] }
 0x941   :  { %2161 = vmatprep.subr.mxu0 %v1532_v54  ;;  %2238 = vmatprep.subr.mxu1 %v1534_v44  ;;  %v2352_v52 = vld [vmem:[%s10794_s7 + $0x118] sm:$0xff]  ;;  %v2367_v54 = vld [vmem:[%s10794_s7 + $0x190] sm:$0xff] }
 0x942   :  { %2162 = vmatpush1.msra.mxu0 %v1531_v55  ;;  %2195 = vmatprep.mubr.f32.mxu0 %v7983_v23  ;;  %v2319_v44 = vld [vmem:[%s10794_s7 + $0x10] sm:$0xff] }
 0x943   :  { %2239 = vmatpush1.msra.mxu1 %v1533_v56  ;;  %2272 = vmatprep.mubr.f32.mxu1 %v7983_v23  ;;  %v2351_v55 = vld [vmem:[%s10794_s7 + $0x110] sm:$0xff]  ;;  %v2334_v56 = vld [vmem:[%s10794_s7 + $0x88] sm:$0xff] }
 0x944   :  { %6486 = vmatmul.mubr.msk.f32.vlgmr.msra.gmra.mxu0 %vm148_vm1, %v8342_v4  ;;  %6488 = vmatmul.mubr.msk.f32.vlgmr.msra.gmra.mxu1 %vm148_vm1, %v8342_v4 }
 0x945   :  { %2201 = vmatprep.mubr.f32.mxu0 %v7983_v23  ;;  %2278 = vmatprep.mubr.f32.mxu1 %v7983_v23 }
 0x946   :  { %6995 = vmatprep.subr.mxu0 %v2348_v57  ;;  %7033 = vmatprep.subr.mxu1 %v2380_v40  ;;  %v2366_v57 = vld [vmem:[%s10794_s7 + $0x188] sm:$0xff] }
 0x947   :  { %6996 = vmatpush3.msra.mxu0 %v2332_v58  ;;  %7034 = vmatpush3.msra.mxu1 %v2364_v60  ;;  %v2318_v40 = vld [vmem:[%s10794_s7 + $0x8] sm:$0xff]  ;;  %v2333_v60 = vld [vmem:[%s10794_s7 + $0x80] sm:$0xff] }
 0x948   :  { %6487 = vmatmul.mubr.msk.f32.gmra.mxu0 %vm148_vm1, %v8366_v14  ;;  %6489 = vmatmul.mubr.msk.f32.gmra.mxu1 %vm148_vm1, %v8366_v14  ;;  %v2350_v58 = vld [vmem:[%s10794_s7 + $0x108] sm:$0xff] }
 0x949   :  { %6997 = vmatprep.subr.mxu0 %v2347_v62  ;;  %7035 = vmatprep.subr.mxu1 %v2379_v63  ;;  %v2365_v62 = vld [vmem:[%s10794_s7 + $0x180] sm:$0xff] }
 0x94a   :  { %6998 = vmatpush3.msra.mxu0 %v2331_v0  ;;  %7036 = vmatpush3.msra.mxu1 %v2363_v1  ;;  %v2317_v63 = vld [vmem:[%s10794_s7] sm:$0xff]  ;;  %v2412_v1 = vld [vmem:[%s10794_s7 + $0x2f8] sm:$0xff] }
 0x94b   :  { %6999 = vmatprep.subr.mxu0 %v2346_v2  ;;  %7037 = vmatprep.subr.mxu1 %v2378_v3  ;;  %v2349_v0 = vld [vmem:[%s10794_s7 + $0x100] sm:$0xff]  ;;  %v2444_v2 = vld [vmem:[%s10794_s7 + $0x3f8] sm:$0xff] }
 0x94c   :  { %7000 = vmatpush3.msra.mxu0 %v2330_v5  ;;  %7038 = vmatpush3.msra.mxu1 %v2362_v6  ;;  %v6458_v3 = vld [vmem:[%s10793_s6 + $0x200] ss:$0 sm:$0xff]  ;;  %v6460_v5 = vld [vmem:[%s10793_s6 + $0x210] ss:$0 sm:$0xff] }
 0x94d   :  { %7001 = vmatprep.subr.mxu0 %v2345_v7  ;;  %7039 = vmatprep.subr.mxu1 %v2377_v11  ;;  %v6459_v11 = vld [vmem:[%s10793_s6 + $0x208] ss:$0 sm:$0xff] }
 0x94e   :  { %7002 = vmatpush3.msra.mxu0 %v2329_v10  ;;  %7040 = vmatpush3.msra.mxu1 %v2361_v12  ;;  %v6461_v10 = vld [vmem:[%s10793_s6 + $0x218] ss:$0 sm:$0xff] }
 0x94f   :  { %7003 = vmatprep.subr.mxu0 %v2344_v13  ;;  %7041 = vmatprep.subr.mxu1 %v2376_v15 }
 0x950   :  { %7004 = vmatpush3.msra.mxu0 %v2328_v16  ;;  %7042 = vmatpush3.msra.mxu1 %v2360_v17 }
 0x951   :  { %7005 = vmatprep.subr.mxu0 %v2343_v20  ;;  %7043 = vmatprep.subr.mxu1 %v2375_v21 }
 0x952   :  { %7006 = vmatpush3.msra.mxu0 %v2327_v22  ;;  %7044 = vmatpush3.msra.mxu1 %v2359_v24 }
 0x953   :  { %7007 = vmatprep.subr.mxu0 %v2342_v25  ;;  %7045 = vmatprep.subr.mxu1 %v2374_v26 }
 0x954   :  { %7008 = vmatpush3.msra.mxu0 %v2326_v27  ;;  %7046 = vmatpush3.msra.mxu1 %v2358_v28  ;;  %v2396_v28 = vld [vmem:[%s10794_s7 + $0x278] sm:$0xff] }
 0x955   :  { %7009 = vmatprep.subr.mxu0 %v2341_v29  ;;  %7047 = vmatprep.subr.mxu1 %v2373_v30  ;;  %v2428_v29 = vld [vmem:[%s10794_s7 + $0x378] sm:$0xff] }
 0x956   :  { %7010 = vmatpush3.msra.mxu0 %v2325_v31  ;;  %7048 = vmatpush3.msra.mxu1 %v2357_v32 }
 0x957   :  { %7011 = vmatprep.subr.mxu0 %v2340_v33  ;;  %7049 = vmatprep.subr.mxu1 %v2372_v34  ;;  %v2411_v33 = vld [vmem:[%s10794_s7 + $0x2f0] sm:$0xff] }
 0x958   :  { %7012 = vmatpush3.msra.mxu0 %v2324_v35  ;;  %7050 = vmatpush3.msra.mxu1 %v2356_v19  ;;  %v2443_v34 = vld [vmem:[%s10794_s7 + $0x3f0] sm:$0xff] }
 0x959   :  { %7013 = vmatprep.subr.mxu0 %v2339_v18  ;;  %7051 = vmatprep.subr.mxu1 %v2371_v36  ;;  %v2395_v36 = vld [vmem:[%s10794_s7 + $0x270] sm:$0xff] }
 0x95a   :  { %7014 = vmatpush3.msra.mxu0 %v2323_v37  ;;  %7052 = vmatpush3.msra.mxu1 %v2355_v38  ;;  %v2427_v37 = vld [vmem:[%s10794_s7 + $0x370] sm:$0xff] }
 0x95b   :  { %7015 = vmatprep.subr.mxu0 %v2338_v39  ;;  %7053 = vmatprep.subr.mxu1 %v2370_v41  ;;  %v2410_v41 = vld [vmem:[%s10794_s7 + $0x2e8] sm:$0xff] }
 0x95c   :  { %7016 = vmatpush3.msra.mxu0 %v2322_v42  ;;  %7054 = vmatpush3.msra.mxu1 %v2354_v43  ;;  %v2442_v42 = vld [vmem:[%s10794_s7 + $0x3e8] sm:$0xff] }
 0x95d   :  { %7017 = vmatprep.subr.mxu0 %v2337_v45  ;;  %7055 = vmatprep.subr.mxu1 %v2369_v46  ;;  %v8771_v46 = vld [vmem:[%s10793_s6 + $0x228] ss:$0 sm:$0xff] }
 0x95e   :  { %7018 = vmatpush3.msra.mxu0 %v2321_v47  ;;  %7056 = vmatpush3.msra.mxu1 %v2353_v48  ;;  %v8776_v47 = vld [vmem:[%s10793_s6 + $0x238] ss:$0 sm:$0xff] }
 0x95f   :  { %7019 = vmatprep.subr.mxu0 %v2336_v49  ;;  %7057 = vmatprep.subr.mxu1 %v2368_v50  ;;  %v2394_v50 = vld [vmem:[%s10794_s7 + $0x268] sm:$0xff] }
 0x960   :  { %7020 = vmatpush3.msra.mxu0 %v2320_v51  ;;  %7058 = vmatpush3.msra.mxu1 %v2352_v52  ;;  %v2426_v51 = vld [vmem:[%s10794_s7 + $0x368] sm:$0xff] }
 0x961   :  { %7021 = vmatprep.subr.mxu0 %v2335_v53  ;;  %7059 = vmatprep.subr.mxu1 %v2367_v54  ;;  %v2409_v54 = vld [vmem:[%s10794_s7 + $0x2e0] sm:$0xff] }
 0x962   :  { %7022 = vmatpush3.msra.mxu0 %v2319_v44  ;;  %7060 = vmatpush3.msra.mxu1 %v2351_v55  ;;  %v2441_v44 = vld [vmem:[%s10794_s7 + $0x3e0] sm:$0xff] }
 0x963   :  { %7023 = vmatprep.subr.mxu0 %v2334_v56  ;;  %7061 = vmatprep.subr.mxu1 %v2366_v57  ;;  %v2393_v57 = vld [vmem:[%s10794_s7 + $0x260] sm:$0xff] }
 0x964   :  { %7024 = vmatpush3.msra.mxu0 %v2318_v40  ;;  %7062 = vmatpush3.msra.mxu1 %v2350_v58  ;;  %v2425_v40 = vld [vmem:[%s10794_s7 + $0x360] sm:$0xff]  ;;  %v2408_v58 = vld [vmem:[%s10794_s7 + $0x2d8] sm:$0xff] }
 0x965   :  { %7025 = vmatprep.subr.mxu0 %v2333_v60  ;;  %7063 = vmatprep.subr.mxu1 %v2365_v62 }
 0x966   :  { %7026 = vmatpush3.msra.mxu0 %v2317_v63  ;;  %7064 = vmatpush3.msra.mxu1 %v2349_v0  ;;  %v2440_v63 = vld [vmem:[%s10794_s7 + $0x3d8] sm:$0xff] }
 0x967   :  { %7071 = vmatprep.subr.mxu0 %v2412_v1  ;;  %7109 = vmatprep.subr.mxu1 %v2444_v2  ;;  %v2392_v0 = vld [vmem:[%s10794_s7 + $0x258] sm:$0xff]  ;;  %v2407_v2 = vld [vmem:[%s10794_s7 + $0x2d0] sm:$0xff] }
 0x968   :  { %v2424_v1 = vld [vmem:[%s10794_s7 + $0x358] sm:$0xff] }
 0x9e1   :  { %v1735_v6 = vpop.f32.mrf.mxu0  ;;  %v1812_v7 = vpop.f32.mrf.mxu1 }
 0x9e2   :  { %v1736_v12 = vadd.f32 %v6458_v3, %v1735_v6  ;;  %v1813_v13 = vadd.f32 %v6460_v5, %v1812_v7  ;;  %v2423_v6 = vld [vmem:[%s10794_s7 + $0x350] sm:$0xff]  ;;  %v2406_v7 = vld [vmem:[%s10794_s7 + $0x2c8] sm:$0xff] }
 0x9e3   :  { %v1737_v15 = vpop.f32.mrf.mxu0  ;;  %v1814_v16 = vpop.f32.mrf.mxu1 }
 0x9e4   :  { %v1738_v17 = vadd.f32 %v6459_v11, %v1737_v15  ;;  %v1815_v20 = vadd.f32 %v6461_v10, %v1814_v16  ;;  %v2285_v26 = vmax.f32 %v1736_v12, 0.0  ;;  %v2287_v27 = vmax.f32 %v1813_v13, 0.0  ;;  %v2422_v12 = vld [vmem:[%s10794_s7 + $0x348] sm:$0xff]  ;;  %v2405_v13 = vld [vmem:[%s10794_s7 + $0x2c0] sm:$0xff] }
 0x9e5   :  { %v2437_v15 = vld [vmem:[%s10794_s7 + $0x3c0] sm:$0xff] }
 0x9e6   :  { %v2286_v21 = vmax.f32 %v1738_v17, 0.0  ;;  %v2288_v22 = vmax.f32 %v1815_v20, 0.0  ;;  %v1741_v24 = vpop.f32.mrf.mxu0  ;;  %v1818_v25 = vpop.f32.mrf.mxu1  ;;  %v2389_v16 = vld [vmem:[%s10794_s7 + $0x240] sm:$0xff]  ;;  %v2404_v20 = vld [vmem:[%s10794_s7 + $0x2b8] sm:$0xff] }
 0x9e7   :  { %v1742_v30 = vadd.f32 %v6458_v3, %v1741_v24  ;;  %v1819_v35 = vadd.f32 %v6460_v5, %v1818_v25  ;;  %v2439_v3 = vld [vmem:[%s10794_s7 + $0x3d0] sm:$0xff]  ;;  %v2421_v17 = vld [vmem:[%s10794_s7 + $0x340] sm:$0xff]  ;;  %v2420_v24 = vld [vmem:[%s10794_s7 + $0x338] sm:$0xff] }
 0x9e8   :  { %v1743_v31 = vpop.f32.mrf.mxu0  ;;  %v1820_v32 = vpop.f32.mrf.mxu1  ;;  %2641 = vmatprep.mubr.f32.mxu0 %v2286_v21  ;;  %2716 = vmatprep.mubr.f32.mxu1 %v2288_v22  ;;  %v2391_v5 = vld [vmem:[%s10794_s7 + $0x250] sm:$0xff]  ;;  %v2436_v21 = vld [vmem:[%s10794_s7 + $0x3b8] sm:$0xff] }
 0x9e9   :  { %v1744_v19 = vadd.f32 %v6459_v11, %v1743_v31  ;;  %v1821_v18 = vadd.f32 %v6461_v10, %v1820_v32  ;;  %2642 = vmatmul.mubr.f32.vlgmr.msra.gmra.mxu0 %v2285_v26  ;;  %2717 = vmatmul.mubr.f32.vlgmr.msra.gmra.mxu1 %v2287_v27  ;;  %v2301_v48 = vmax.f32 %v1742_v30, 0.0  ;;  %v2303_v49 = vmax.f32 %v1819_v35, 0.0  ;;  %v2438_v11 = vld [vmem:[%s10794_s7 + $0x3c8] sm:$0xff]  ;;  %v2388_v22 = vld [vmem:[%s10794_s7 + $0x238] sm:$0xff]  ;;  %v2403_v25 = vld [vmem:[%s10794_s7 + $0x2b0] sm:$0xff] }
 0x9ea   :  { %7072 = vmatpush3.msra.mxu0 %v2396_v28  ;;  %7110 = vmatpush3.msra.mxu1 %v2428_v29  ;;  %v2390_v10 = vld [vmem:[%s10794_s7 + $0x248] sm:$0xff]  ;;  %v2435_v26 = vld [vmem:[%s10794_s7 + $0x3b0] sm:$0xff]  ;;  %v2433_v35 = vld [vmem:[%s10794_s7 + $0x3a0] sm:$0xff] }
 0x9eb   :  { %v2302_v38 = vmax.f32 %v1744_v19, 0.0  ;;  %v2304_v39 = vmax.f32 %v1821_v18, 0.0  ;;  %7073 = vmatprep.subr.mxu0 %v2411_v33  ;;  %7111 = vmatprep.subr.mxu1 %v2443_v34  ;;  %v2387_v27 = vld [vmem:[%s10794_s7 + $0x230] sm:$0xff]  ;;  %v2402_v29 = vld [vmem:[%s10794_s7 + $0x2a8] sm:$0xff]  ;;  %v2401_v34 = vld [vmem:[%s10794_s7 + $0x2a0] sm:$0xff] }
 0x9ec   :  { %v8764_v43 = vpop.f32.mrf.mxu0  ;;  %v8766_v45 = vpop.f32.mrf.mxu1  ;;  %7074 = vmatpush3.msra.mxu0 %v2395_v36  ;;  %7112 = vmatpush3.msra.mxu1 %v2427_v37  ;;  %v2419_v28 = vld [vmem:[%s10794_s7 + $0x330] sm:$0xff]  ;;  %v2434_v30 = vld [vmem:[%s10794_s7 + $0x3a8] sm:$0xff]  ;;  %v2385_v18 = vld [vmem:[%s10794_s7 + $0x220] sm:$0xff] }
 0x9ed   :  { %2646 = vmatprep.mubr.f32.mxu0 %v2302_v38  ;;  %2721 = vmatprep.mubr.f32.mxu1 %v2304_v39  ;;  %v2386_v31 = vld [vmem:[%s10794_s7 + $0x228] sm:$0xff]  ;;  %v2417_v36 = vld [vmem:[%s10794_s7 + $0x320] sm:$0xff]  ;;  %v2400_v37 = vld [vmem:[%s10794_s7 + $0x298] sm:$0xff] }
 0x9ee   :  { %v1891_v52 = vpop.f32.mrf.mxu0  ;;  %v1968_v53 = vpop.f32.mrf.mxu1  ;;  %7075 = vmatprep.subr.mxu0 %v2410_v41  ;;  %7113 = vmatprep.subr.mxu1 %v2442_v42  ;;  %v2418_v32 = vld [vmem:[%s10794_s7 + $0x328] sm:$0xff]  ;;  %v2432_v38 = vld [vmem:[%s10794_s7 + $0x398] sm:$0xff]  ;;  %v6462_v39 = vld [vmem:[%s10793_s6 + $0x220] ss:$0 sm:$0xff] }
 0x9ef   :  { %v1892_v55 = vadd.f32 %v8771_v46, %v1891_v52  ;;  %v1969_v56 = vadd.f32 %v8776_v47, %v1968_v53  ;;  %2647 = vmatmul.mubr.f32.gmra.mxu0 %v2301_v48  ;;  %2722 = vmatmul.mubr.f32.gmra.mxu1 %v2303_v49  ;;  %v2384_v41 = vld [vmem:[%s10794_s7 + $0x218] sm:$0xff]  ;;  %v6464_v48 = vld [vmem:[%s10793_s6 + $0x230] ss:$0 sm:$0xff] }
 0x9f0   :  { %7076 = vmatpush3.msra.mxu0 %v2394_v50  ;;  %7114 = vmatpush3.msra.mxu1 %v2426_v51  ;;  %v2416_v42 = vld [vmem:[%s10794_s7 + $0x318] sm:$0xff]  ;;  %v2399_v50 = vld [vmem:[%s10794_s7 + $0x290] sm:$0xff] }
 0x9f1   :  { %v2290_v60 = vmax.f32 %v1892_v55, 0.0  ;;  %v2292_v62 = vmax.f32 %v1969_v56, 0.0  ;;  %7077 = vmatprep.subr.mxu0 %v2409_v54  ;;  %7115 = vmatprep.subr.mxu1 %v2441_v44  ;;  %v2431_v51 = vld [vmem:[%s10794_s7 + $0x390] sm:$0xff]  ;;  %v2398_v44 = vld [vmem:[%s10794_s7 + $0x288] sm:$0xff]  ;;  %v1890_v56 = vadd.f32 %v6462_v39, %v8764_v43  ;;  %v2397_v43 = vld [vmem:[%s10794_s7 + $0x280] sm:$0xff] }
 0x9f2   :  { %7078 = vmatpush3.msra.mxu0 %v2393_v57  ;;  %7116 = vmatpush3.msra.mxu1 %v2425_v40  ;;  %v8882_v33 = vpop.f32.mrf.mxu0  ;;  %v1972_v19 = vpop.f32.mrf.mxu1  ;;  %v2383_v53 = vld [vmem:[%s10794_s7 + $0x210] sm:$0xff]  ;;  %v2430_v55 = vld [vmem:[%s10794_s7 + $0x388] sm:$0xff]  ;;  %v1967_v57 = vadd.f32 %v6464_v48, %v8766_v45  ;;  %v2429_v45 = vld [vmem:[%s10794_s7 + $0x380] sm:$0xff] }
 0x9f3   :  { %7079 = vmatprep.subr.mxu0 %v2408_v58  ;;  %2791 = vmatprep.mubr.f32.mxu0 %v2290_v60  ;;  %v2415_v54 = vld [vmem:[%s10794_s7 + $0x310] sm:$0xff]  ;;  %v2382_v40 = vld [vmem:[%s10794_s7 + $0x208] sm:$0xff] }
 0x9f4   :  { %7117 = vmatprep.subr.mxu1 %v2440_v63  ;;  %2866 = vmatprep.mubr.f32.mxu1 %v2292_v62  ;;  %v1897_v49 = vpop.f32.mrf.mxu0  ;;  %v1974_v52 = vpop.f32.mrf.mxu1  ;;  %v2414_v58 = vld [vmem:[%s10794_s7 + $0x308] sm:$0xff] }
 0x9f5   :  { %7080 = vmatpush3.msra.mxu0 %v2392_v0  ;;  %7118 = vmatpush3.msra.mxu1 %v2424_v1  ;;  %v1898_v62 = vadd.f32 %v8771_v46, %v1897_v49  ;;  %v1975_v63 = vadd.f32 %v8776_v47, %v1974_v52  ;;  %v2381_v1 = vld [vmem:[%s10794_s7 + $0x200] sm:$0xff]  ;;  %v2476_v46 = vld [vmem:[%s10794_s7 + $0x4f8] sm:$0xff]  ;;  %v2503_v49 = vld [vmem:[%s10794_s7 + $0x5d0] sm:$0xff] }
 0x9f6   :  { %7081 = vmatprep.subr.mxu0 %v2407_v2  ;;  %7119 = vmatprep.subr.mxu1 %v2439_v3  ;;  %v2413_v2 = vld [vmem:[%s10794_s7 + $0x300] sm:$0xff]  ;;  %v2289_v3 = vmax.f32 %v1890_v56, 0.0  ;;  %v2508_v47 = vld [vmem:[%s10794_s7 + $0x5f8] sm:$0xff]  ;;  %v2470_v52 = vld [vmem:[%s10794_s7 + $0x4c8] sm:$0xff] }
 0x9f7   :  { %7082 = vmatpush3.msra.mxu0 %v2391_v5  ;;  %7120 = vmatpush3.msra.mxu1 %v2423_v6  ;;  %v2291_v5 = vmax.f32 %v1967_v57, 0.0  ;;  %v8967_v6 = vld [vmem:[%s10793_s6 + $0x248] ss:$0 sm:$0xff]  ;;  %v2501_v56 = vld [vmem:[%s10794_s7 + $0x5c0] sm:$0xff] }
 0x9f8   :  { %7083 = vmatprep.subr.mxu0 %v2406_v7  ;;  %7121 = vmatprep.subr.mxu1 %v2438_v11  ;;  %v8940_v60 = vpop.f32.mrf.mxu0  ;;  %v8950_v0 = vpop.f32.mrf.mxu1  ;;  %v1896_v11 = vadd.f32 %v6462_v39, %v8882_v33  ;;  %v2504_v39 = vld [vmem:[%s10794_s7 + $0x5d8] sm:$0xff]  ;;  %v2453_v57 = vld [vmem:[%s10794_s7 + $0x440] sm:$0xff] }
 0x9f9   :  { %7084 = vmatpush3.msra.mxu0 %v2390_v10  ;;  %7122 = vmatpush3.msra.mxu1 %v2422_v12  ;;  %v1973_v10 = vadd.f32 %v6464_v48, %v1972_v19  ;;  %v2306_v12 = vmax.f32 %v1898_v62, 0.0  ;;  %v2473_v19 = vld [vmem:[%s10794_s7 + $0x4e0] sm:$0xff]  ;;  %v2471_v48 = vld [vmem:[%s10794_s7 + $0x4d0] sm:$0xff]  ;;  %v2484_v62 = vld [vmem:[%s10794_s7 + $0x538] sm:$0xff] }
 0x9fa   :  { %7085 = vmatprep.subr.mxu0 %v2405_v13  ;;  %7123 = vmatprep.subr.mxu1 %v2437_v15  ;;  %v2045_v7 = vpop.f32.mrf.mxu0  ;;  %v2308_v13 = vmax.f32 %v1975_v63, 0.0  ;;  %v8973_v15 = vld [vmem:[%s10793_s6 + $0x258] ss:$0 sm:$0xff]  ;;  %v2467_v63 = vld [vmem:[%s10794_s7 + $0x4b0] sm:$0xff] }
 0x9fb   :  { %7086 = vmatpush3.msra.mxu0 %v2389_v16  ;;  %7124 = vmatpush3.msra.mxu1 %v2421_v17  ;;  %v2122_v16 = vpop.f32.mrf.mxu1  ;;  %v2460_v17 = vld [vmem:[%s10794_s7 + $0x478] sm:$0xff] }
 0x9fc   :  { %7087 = vmatprep.subr.mxu0 %v2404_v20  ;;  %7125 = vmatprep.subr.mxu1 %v2436_v21  ;;  %v2492_v20 = vld [vmem:[%s10794_s7 + $0x578] sm:$0xff]  ;;  %v2475_v21 = vld [vmem:[%s10794_s7 + $0x4f0] sm:$0xff] }
 0x9fd   :  { %7088 = vmatpush3.msra.mxu0 %v2388_v22  ;;  %7126 = vmatpush3.msra.mxu1 %v2420_v24  ;;  %v2507_v22 = vld [vmem:[%s10794_s7 + $0x5f0] sm:$0xff]  ;;  %v2046_v24 = vadd.f32 %v8967_v6, %v2045_v7  ;;  %v2482_v7 = vld [vmem:[%s10794_s7 + $0x528] sm:$0xff] }
 0x9fe   :  { %7089 = vmatprep.subr.mxu0 %v2403_v25  ;;  %7127 = vmatprep.subr.mxu1 %v2435_v26  ;;  %v2459_v25 = vld [vmem:[%s10794_s7 + $0x470] sm:$0xff] }
 0x9ff   :  { %7090 = vmatpush3.msra.mxu0 %v2387_v27  ;;  %7128 = vmatpush3.msra.mxu1 %v2419_v28  ;;  %v2491_v26 = vld [vmem:[%s10794_s7 + $0x570] sm:$0xff]  ;;  %v2123_v27 = vadd.f32 %v8973_v15, %v2122_v16  ;;  %v2305_v28 = vmax.f32 %v1896_v11, 0.0  ;;  %v2294_v33 = vmax.f32 %v2046_v24, 0.0  ;;  %v9103_v11 = vpop.f32.mrf.mxu0  ;;  %v2449_v16 = vld [vmem:[%s10794_s7 + $0x420] sm:$0xff]  ;;  %v2448_v24 = vld [vmem:[%s10794_s7 + $0x418] sm:$0xff] }
 0xa00   :  { %7091 = vmatprep.subr.mxu0 %v2402_v29  ;;  %7129 = vmatprep.subr.mxu1 %v2434_v30  ;;  %v2307_v29 = vmax.f32 %v1973_v10, 0.0  ;;  %v2474_v30 = vld [vmem:[%s10794_s7 + $0x4e8] sm:$0xff]  ;;  %v2465_v10 = vld [vmem:[%s10794_s7 + $0x4a0] sm:$0xff] }
 0xa01   :  { %7092 = vmatpush3.msra.mxu0 %v2386_v31  ;;  %7130 = vmatpush3.msra.mxu1 %v2418_v32  ;;  %v2506_v31 = vld [vmem:[%s10794_s7 + $0x5e8] sm:$0xff] }
 0xa02   :  { %7093 = vmatprep.subr.mxu0 %v2401_v34  ;;  %7131 = vmatprep.subr.mxu1 %v2433_v35  ;;  %v2458_v32 = vld [vmem:[%s10794_s7 + $0x468] sm:$0xff]  ;;  %v2296_v35 = vmax.f32 %v2123_v27, 0.0  ;;  %v2051_v27 = vpop.f32.mrf.mxu0 }
 0xa03   :  { %7094 = vmatpush3.msra.mxu0 %v2385_v18  ;;  %7132 = vmatpush3.msra.mxu1 %v2417_v36  ;;  %v2490_v34 = vld [vmem:[%s10794_s7 + $0x568] sm:$0xff]  ;;  %v2505_v18 = vld [vmem:[%s10794_s7 + $0x5e0] sm:$0xff] }
 0xa04   :  { %7095 = vmatprep.subr.mxu0 %v2400_v37  ;;  %7133 = vmatprep.subr.mxu1 %v2432_v38  ;;  %v2457_v36 = vld [vmem:[%s10794_s7 + $0x460] sm:$0xff]  ;;  %v2472_v38 = vld [vmem:[%s10794_s7 + $0x4d8] sm:$0xff] }
 0xa05   :  { %7096 = vmatpush3.msra.mxu0 %v2384_v41  ;;  %7134 = vmatpush3.msra.mxu1 %v2416_v42  ;;  %v2489_v37 = vld [vmem:[%s10794_s7 + $0x560] sm:$0xff]  ;;  %v2456_v41 = vld [vmem:[%s10794_s7 + $0x458] sm:$0xff] }
 0xa06   :  { %7097 = vmatprep.subr.mxu0 %v2399_v50  ;;  %7135 = vmatprep.subr.mxu1 %v2431_v51  ;;  %v2488_v42 = vld [vmem:[%s10794_s7 + $0x558] sm:$0xff]  ;;  %v2455_v50 = vld [vmem:[%s10794_s7 + $0x450] sm:$0xff] }
 0xa07   :  { %7098 = vmatpush3.msra.mxu0 %v2383_v53  ;;  %7136 = vmatpush3.msra.mxu1 %v2415_v54  ;;  %v2487_v51 = vld [vmem:[%s10794_s7 + $0x550] sm:$0xff]  ;;  %v2502_v53 = vld [vmem:[%s10794_s7 + $0x5c8] sm:$0xff] }
 0xa08   :  { %7099 = vmatprep.subr.mxu0 %v2398_v44  ;;  %7137 = vmatprep.subr.mxu1 %v2430_v55  ;;  %v2454_v54 = vld [vmem:[%s10794_s7 + $0x448] sm:$0xff]  ;;  %v2469_v55 = vld [vmem:[%s10794_s7 + $0x4c0] sm:$0xff] }
 0xa09   :  { %7100 = vmatpush3.msra.mxu0 %v2382_v40  ;;  %7138 = vmatpush3.msra.mxu1 %v2414_v58  ;;  %v2486_v44 = vld [vmem:[%s10794_s7 + $0x548] sm:$0xff]  ;;  %v2485_v40 = vld [vmem:[%s10794_s7 + $0x540] sm:$0xff]  ;;  %v2468_v58 = vld [vmem:[%s10794_s7 + $0x4b8] sm:$0xff] }
 0xa0a   :  { %7101 = vmatprep.subr.mxu0 %v2397_v43  ;;  %7139 = vmatprep.subr.mxu1 %v2429_v45  ;;  %v2500_v43 = vld [vmem:[%s10794_s7 + $0x5b8] sm:$0xff] }
 0xa0b   :  { %7102 = vmatpush3.msra.mxu0 %v2381_v1  ;;  %7140 = vmatpush3.msra.mxu1 %v2413_v2  ;;  %v2452_v45 = vld [vmem:[%s10794_s7 + $0x438] sm:$0xff]  ;;  %v2499_v1 = vld [vmem:[%s10794_s7 + $0x5b0] sm:$0xff] }
 0xa0c   :  { %2792 = vmatmul.mubr.f32.vlgmr.msra.gmra.mxu0 %v2289_v3  ;;  %2867 = vmatmul.mubr.f32.vlgmr.msra.gmra.mxu1 %v2291_v5  ;;  %v2451_v2 = vld [vmem:[%s10794_s7 + $0x430] sm:$0xff]  ;;  %v2466_v5 = vld [vmem:[%s10794_s7 + $0x4a8] sm:$0xff] }
 0xa0d   :  { %7147 = vmatprep.subr.mxu0 %v2476_v46  ;;  %7185 = vmatprep.subr.mxu1 %v2508_v47  ;;  %v2483_v3 = vld [vmem:[%s10794_s7 + $0x530] sm:$0xff]  ;;  %v2498_v46 = vld [vmem:[%s10794_s7 + $0x5a8] sm:$0xff] }
 0xa0e   :  { %2796 = vmatprep.mubr.f32.mxu0 %v2306_v12  ;;  %2871 = vmatprep.mubr.f32.mxu1 %v2308_v13  ;;  %v2450_v47 = vld [vmem:[%s10794_s7 + $0x428] sm:$0xff]  ;;  %v2497_v12 = vld [vmem:[%s10794_s7 + $0x5a0] sm:$0xff]  ;;  %v2126_v13 = vpop.f32.mrf.mxu1 }
 0xa0f   :  { %7148 = vmatpush3.msra.mxu0 %v2460_v17  ;;  %7186 = vmatpush3.msra.mxu1 %v2492_v20  ;;  %v2481_v17 = vld [vmem:[%s10794_s7 + $0x520] sm:$0xff]  ;;  %v2464_v20 = vld [vmem:[%s10794_s7 + $0x498] sm:$0xff] }
 0xa10   :  { %7149 = vmatprep.subr.mxu0 %v2475_v21  ;;  %7187 = vmatprep.subr.mxu1 %v2507_v22  ;;  %v2496_v21 = vld [vmem:[%s10794_s7 + $0x598] sm:$0xff]  ;;  %v6466_v22 = vld [vmem:[%s10793_s6 + $0x240] ss:$0 sm:$0xff] }
 0xa11   :  { %7150 = vmatpush3.msra.mxu0 %v2459_v25  ;;  %7188 = vmatpush3.msra.mxu1 %v2491_v26  ;;  %v2480_v25 = vld [vmem:[%s10794_s7 + $0x518] sm:$0xff]  ;;  %v6468_v26 = vld [vmem:[%s10793_s6 + $0x250] ss:$0 sm:$0xff] }
 0xa12   :  { %2797 = vmatmul.mubr.f32.gmra.mxu0 %v2305_v28  ;;  %2872 = vmatmul.mubr.f32.gmra.mxu1 %v2307_v29  ;;  %v2463_v28 = vld [vmem:[%s10794_s7 + $0x490] sm:$0xff] }
 0xa13   :  { %7151 = vmatprep.subr.mxu0 %v2474_v30  ;;  %7189 = vmatprep.subr.mxu1 %v2506_v31  ;;  %v2495_v29 = vld [vmem:[%s10794_s7 + $0x590] sm:$0xff]  ;;  %v2128_v30 = vpop.f32.mrf.mxu1 }
 0xa14   :  { %7152 = vmatpush3.msra.mxu0 %v2458_v32  ;;  %2941 = vmatprep.mubr.f32.mxu0 %v2294_v33  ;;  %v2447_v31 = vld [vmem:[%s10794_s7 + $0x410] sm:$0xff]  ;;  %v2462_v33 = vld [vmem:[%s10794_s7 + $0x488] sm:$0xff] }
 0xa15   :  { %7190 = vmatpush3.msra.mxu1 %v2490_v34  ;;  %3016 = vmatprep.mubr.f32.mxu1 %v2296_v35  ;;  %v2479_v32 = vld [vmem:[%s10794_s7 + $0x510] sm:$0xff]  ;;  %v2494_v34 = vld [vmem:[%s10794_s7 + $0x588] sm:$0xff]  ;;  %v2044_v35 = vadd.f32 %v6466_v22, %v8940_v60  ;;  %v2461_v60 = vld [vmem:[%s10794_s7 + $0x480] sm:$0xff] }
 0xa16   :  { %7153 = vmatprep.subr.mxu0 %v2473_v19  ;;  %7191 = vmatprep.subr.mxu1 %v2505_v18  ;;  %v2121_v19 = vadd.f32 %v6468_v26, %v8950_v0  ;;  %v2446_v18 = vld [vmem:[%s10794_s7 + $0x408] sm:$0xff]  ;;  %v2493_v0 = vld [vmem:[%s10794_s7 + $0x580] sm:$0xff] }
 0xa17   :  { %7154 = vmatpush3.msra.mxu0 %v2457_v36  ;;  %7192 = vmatpush3.msra.mxu1 %v2489_v37  ;;  %v2478_v36 = vld [vmem:[%s10794_s7 + $0x508] sm:$0xff]  ;;  %v9161_v37 = vpop.f32.mrf.mxu0 }
 0xa18   :  { %7155 = vmatprep.subr.mxu0 %v2472_v38  ;;  %7193 = vmatprep.subr.mxu1 %v2504_v39  ;;  %v2052_v38 = vadd.f32 %v8967_v6, %v2051_v27  ;;  %v2129_v39 = vadd.f32 %v8973_v15, %v2128_v30  ;;  %v2540_v6 = vld [vmem:[%s10794_s7 + $0x6f8] sm:$0xff]  ;;  %v2567_v27 = vld [vmem:[%s10794_s7 + $0x7d0] sm:$0xff]  ;;  %v2534_v30 = vld [vmem:[%s10794_s7 + $0x6c8] sm:$0xff] }
 0xa19   :  { %7156 = vmatpush3.msra.mxu0 %v2456_v41  ;;  %7194 = vmatpush3.msra.mxu1 %v2488_v42  ;;  %v9171_v41 = vpop.f32.mrf.mxu1  ;;  %v2445_v42 = vld [vmem:[%s10794_s7 + $0x400] sm:$0xff]  ;;  %v2572_v15 = vld [vmem:[%s10794_s7 + $0x7f8] sm:$0xff] }
 0xa1a   :  { %7157 = vmatprep.subr.mxu0 %v2471_v48  ;;  %7195 = vmatprep.subr.mxu1 %v2503_v49  ;;  %v2477_v48 = vld [vmem:[%s10794_s7 + $0x500] sm:$0xff]  ;;  %v2293_v49 = vmax.f32 %v2044_v35, 0.0 }
 0xa1b   :  { %7158 = vmatpush3.msra.mxu0 %v2455_v50  ;;  %7196 = vmatpush3.msra.mxu1 %v2487_v51  ;;  %v2295_v50 = vmax.f32 %v2121_v19, 0.0  ;;  %v9188_v51 = vld [vmem:[%s10793_s6 + $0x268] ss:$0 sm:$0xff]  ;;  %v2565_v35 = vld [vmem:[%s10794_s7 + $0x7c0] sm:$0xff] }
 0xa1c   :  { %7159 = vmatprep.subr.mxu0 %v2470_v52  ;;  %7197 = vmatprep.subr.mxu1 %v2502_v53  ;;  %v2199_v52 = vpop.f32.mrf.mxu0  ;;  %v2050_v53 = vadd.f32 %v6466_v22, %v9103_v11  ;;  %v2568_v22 = vld [vmem:[%s10794_s7 + $0x7d8] sm:$0xff]  ;;  %v2517_v19 = vld [vmem:[%s10794_s7 + $0x640] sm:$0xff] }
 0xa1d   :  { %7160 = vmatpush3.msra.mxu0 %v2454_v54  ;;  %7198 = vmatpush3.msra.mxu1 %v2486_v44  ;;  %v2127_v54 = vadd.f32 %v6468_v26, %v2126_v13  ;;  %v2310_v44 = vmax.f32 %v2052_v38, 0.0  ;;  %v2537_v13 = vld [vmem:[%s10794_s7 + $0x6e0] sm:$0xff]  ;;  %v2535_v26 = vld [vmem:[%s10794_s7 + $0x6d0] sm:$0xff]  ;;  %v2548_v38 = vld [vmem:[%s10794_s7 + $0x738] sm:$0xff] }
 0xa1e   :  { %7161 = vmatprep.subr.mxu0 %v2469_v55  ;;  %7199 = vmatprep.subr.mxu1 %v2501_v56  ;;  %v2312_v55 = vmax.f32 %v2129_v39, 0.0  ;;  %v9194_v56 = vld [vmem:[%s10793_s6 + $0x278] ss:$0 sm:$0xff]  ;;  %v2531_v39 = vld [vmem:[%s10794_s7 + $0x6b0] sm:$0xff] }
 0xa1f   :  { %7162 = vmatpush3.msra.mxu0 %v2453_v57  ;;  %7200 = vmatpush3.msra.mxu1 %v2485_v40  ;;  %v2276_v57 = vpop.f32.mrf.mxu1  ;;  %v2524_v40 = vld [vmem:[%s10794_s7 + $0x678] sm:$0xff] }
 0xa20   :  { %7163 = vmatprep.subr.mxu0 %v2468_v58  ;;  %7201 = vmatprep.subr.mxu1 %v2500_v43  ;;  %v2556_v58 = vld [vmem:[%s10794_s7 + $0x778] sm:$0xff]  ;;  %v2539_v43 = vld [vmem:[%s10794_s7 + $0x6f0] sm:$0xff] }
 0xa21   :  { %7164 = vmatpush3.msra.mxu0 %v2452_v45  ;;  %7202 = vmatpush3.msra.mxu1 %v2484_v62  ;;  %v2571_v45 = vld [vmem:[%s10794_s7 + $0x7f0] sm:$0xff]  ;;  %v2200_v62 = vadd.f32 %v9188_v51, %v2199_v52  ;;  %v2546_v52 = vld [vmem:[%s10794_s7 + $0x728] sm:$0xff] }
 0xa22   :  { %7165 = vmatprep.subr.mxu0 %v2467_v63  ;;  %7203 = vmatprep.subr.mxu1 %v2499_v1  ;;  %v2523_v63 = vld [vmem:[%s10794_s7 + $0x670] sm:$0xff] }
 0xa23   :  { %7166 = vmatpush3.msra.mxu0 %v2451_v2  ;;  %7204 = vmatpush3.msra.mxu1 %v2483_v3  ;;  %v2555_v1 = vld [vmem:[%s10794_s7 + $0x770] sm:$0xff]  ;;  %v2277_v2 = vadd.f32 %v9194_v56, %v2276_v57  ;;  %v2309_v3 = vmax.f32 %v2050_v53, 0.0  ;;  %v2298_v11 = vmax.f32 %v2200_v62, 0.0  ;;  %v2529_v53 = vld [vmem:[%s10794_s7 + $0x6a0] sm:$0xff]  ;;  %v2512_v62 = vld [vmem:[%s10794_s7 + $0x618] sm:$0xff] }
 0xa24   :  { %7167 = vmatprep.subr.mxu0 %v2466_v5  ;;  %7205 = vmatprep.subr.mxu1 %v2498_v46  ;;  %v2311_v5 = vmax.f32 %v2127_v54, 0.0  ;;  %v2538_v46 = vld [vmem:[%s10794_s7 + $0x6e8] sm:$0xff]  ;;  %v2561_v54 = vld [vmem:[%s10794_s7 + $0x7a0] sm:$0xff] }
 0xa25   :  { %7168 = vmatpush3.msra.mxu0 %v2450_v47  ;;  %7206 = vmatpush3.msra.mxu1 %v2482_v7  ;;  %v2570_v47 = vld [vmem:[%s10794_s7 + $0x7e8] sm:$0xff]  ;;  %v2513_v57 = vld [vmem:[%s10794_s7 + $0x620] sm:$0xff] }
 0xa26   :  { %7169 = vmatprep.subr.mxu0 %v2465_v10  ;;  %7207 = vmatprep.subr.mxu1 %v2497_v12  ;;  %v2522_v7 = vld [vmem:[%s10794_s7 + $0x668] sm:$0xff]  ;;  %v2300_v12 = vmax.f32 %v2277_v2, 0.0  ;;  %v2527_v2 = vld [vmem:[%s10794_s7 + $0x690] sm:$0xff] }
 0xa27   :  { %7170 = vmatpush3.msra.mxu0 %v2449_v16  ;;  %7208 = vmatpush3.msra.mxu1 %v2481_v17  ;;  %v2554_v10 = vld [vmem:[%s10794_s7 + $0x768] sm:$0xff]  ;;  %v2569_v16 = vld [vmem:[%s10794_s7 + $0x7e0] sm:$0xff] }
 0xa28   :  { %7171 = vmatprep.subr.mxu0 %v2464_v20  ;;  %7209 = vmatprep.subr.mxu1 %v2496_v21  ;;  %v2521_v17 = vld [vmem:[%s10794_s7 + $0x660] sm:$0xff]  ;;  %v2536_v21 = vld [vmem:[%s10794_s7 + $0x6d8] sm:$0xff] }
 0xa29   :  { %7172 = vmatpush3.msra.mxu0 %v2448_v24  ;;  %7210 = vmatpush3.msra.mxu1 %v2480_v25  ;;  %v2553_v20 = vld [vmem:[%s10794_s7 + $0x760] sm:$0xff]  ;;  %v2520_v24 = vld [vmem:[%s10794_s7 + $0x658] sm:$0xff] }
 0xa2a   :  { %7173 = vmatprep.subr.mxu0 %v2463_v28  ;;  %7211 = vmatprep.subr.mxu1 %v2495_v29  ;;  %v2552_v25 = vld [vmem:[%s10794_s7 + $0x758] sm:$0xff]  ;;  %v2519_v28 = vld [vmem:[%s10794_s7 + $0x650] sm:$0xff] }
 0xa2b   :  { %7174 = vmatpush3.msra.mxu0 %v2447_v31  ;;  %7212 = vmatpush3.msra.mxu1 %v2479_v32  ;;  %v2551_v29 = vld [vmem:[%s10794_s7 + $0x750] sm:$0xff]  ;;  %v2566_v31 = vld [vmem:[%s10794_s7 + $0x7c8] sm:$0xff] }
 0xa2c   :  { %7175 = vmatprep.subr.mxu0 %v2462_v33  ;;  %7213 = vmatprep.subr.mxu1 %v2494_v34  ;;  %v2518_v32 = vld [vmem:[%s10794_s7 + $0x648] sm:$0xff]  ;;  %v2533_v34 = vld [vmem:[%s10794_s7 + $0x6c0] sm:$0xff] }
 0xa2d   :  { %7176 = vmatpush3.msra.mxu0 %v2446_v18  ;;  %7214 = vmatpush3.msra.mxu1 %v2478_v36  ;;  %v2550_v33 = vld [vmem:[%s10794_s7 + $0x748] sm:$0xff]  ;;  %v2549_v18 = vld [vmem:[%s10794_s7 + $0x740] sm:$0xff]  ;;  %v2532_v36 = vld [vmem:[%s10794_s7 + $0x6b8] sm:$0xff] }
 0xa2e   :  { %7177 = vmatprep.subr.mxu0 %v2461_v60  ;;  %7215 = vmatprep.subr.mxu1 %v2493_v0  ;;  %v2564_v60 = vld [vmem:[%s10794_s7 + $0x7b8] sm:$0xff] }
 0xa2f   :  { %7178 = vmatpush3.msra.mxu0 %v2445_v42  ;;  %7216 = vmatpush3.msra.mxu1 %v2477_v48  ;;  %v2516_v0 = vld [vmem:[%s10794_s7 + $0x638] sm:$0xff]  ;;  %v2563_v42 = vld [vmem:[%s10794_s7 + $0x7b0] sm:$0xff] }
 0xa30   :  { %2942 = vmatmul.mubr.f32.vlgmr.msra.gmra.mxu0 %v2293_v49  ;;  %3017 = vmatmul.mubr.f32.vlgmr.msra.gmra.mxu1 %v2295_v50  ;;  %v2515_v48 = vld [vmem:[%s10794_s7 + $0x630] sm:$0xff]  ;;  %v2530_v50 = vld [vmem:[%s10794_s7 + $0x6a8] sm:$0xff] }
 0xa31   :  { %7223 = vmatprep.subr.mxu0 %v2540_v6  ;;  %7261 = vmatprep.subr.mxu1 %v2572_v15  ;;  %v2547_v49 = vld [vmem:[%s10794_s7 + $0x730] sm:$0xff]  ;;  %v2562_v6 = vld [vmem:[%s10794_s7 + $0x7a8] sm:$0xff] }
 0xa32   :  { %2946 = vmatprep.mubr.f32.mxu0 %v2310_v44  ;;  %3021 = vmatprep.mubr.f32.mxu1 %v2312_v55  ;;  %v2514_v15 = vld [vmem:[%s10794_s7 + $0x628] sm:$0xff]  ;;  %v2203_v44 = vpop.f32.mrf.mxu0  ;;  %v2280_v55 = vpop.f32.mrf.mxu1 }
 0xa33   :  { %7224 = vmatpush3.msra.mxu0 %v2524_v40  ;;  %7262 = vmatpush3.msra.mxu1 %v2556_v58  ;;  %v2545_v40 = vld [vmem:[%s10794_s7 + $0x720] sm:$0xff]  ;;  %v2528_v58 = vld [vmem:[%s10794_s7 + $0x698] sm:$0xff] }
 0xa34   :  { %7225 = vmatprep.subr.mxu0 %v2539_v43  ;;  %7263 = vmatprep.subr.mxu1 %v2571_v45  ;;  %v2560_v43 = vld [vmem:[%s10794_s7 + $0x798] sm:$0xff]  ;;  %v6470_v45 = vld [vmem:[%s10793_s6 + $0x260] ss:$0 sm:$0xff] }
 0xa35   :  { %7226 = vmatpush3.msra.mxu0 %v2523_v63  ;;  %7264 = vmatpush3.msra.mxu1 %v2555_v1  ;;  %v2544_v63 = vld [vmem:[%s10794_s7 + $0x718] sm:$0xff]  ;;  %v6472_v1 = vld [vmem:[%s10793_s6 + $0x270] ss:$0 sm:$0xff] }
 0xa36   :  { %2947 = vmatmul.mubr.f32.gmra.mxu0 %v2309_v3  ;;  %3022 = vmatmul.mubr.f32.gmra.mxu1 %v2311_v5  ;;  %v2559_v3 = vld [vmem:[%s10794_s7 + $0x790] sm:$0xff]  ;;  %v2205_v5 = vpop.f32.mrf.mxu0 }
 0xa37   :  { %7227 = vmatprep.subr.mxu0 %v2538_v46  ;;  %7265 = vmatprep.subr.mxu1 %v2570_v47  ;;  %v2282_v46 = vpop.f32.mrf.mxu1  ;;  %v2511_v47 = vld [vmem:[%s10794_s7 + $0x610] sm:$0xff] }
 0xa38   :  { %7228 = vmatpush3.msra.mxu0 %v2522_v7  ;;  %3091 = vmatprep.mubr.f32.mxu0 %v2298_v11  ;;  %v2543_v7 = vld [vmem:[%s10794_s7 + $0x710] sm:$0xff]  ;;  %v2526_v11 = vld [vmem:[%s10794_s7 + $0x688] sm:$0xff] }
 0xa39   :  { %7266 = vmatpush3.msra.mxu1 %v2554_v10  ;;  %3166 = vmatprep.mubr.f32.mxu1 %v2300_v12  ;;  %v2558_v10 = vld [vmem:[%s10794_s7 + $0x788] sm:$0xff]  ;;  %v2198_v12 = vadd.f32 %v6470_v45, %v9161_v37  ;;  %v2525_v37 = vld [vmem:[%s10794_s7 + $0x680] sm:$0xff] }
 0xa3a   :  { %7229 = vmatprep.subr.mxu0 %v2537_v13  ;;  %7267 = vmatprep.subr.mxu1 %v2569_v16  ;;  %v2275_v13 = vadd.f32 %v6472_v1, %v9171_v41  ;;  %v2510_v16 = vld [vmem:[%s10794_s7 + $0x608] sm:$0xff]  ;;  %v2557_v41 = vld [vmem:[%s10794_s7 + $0x780] sm:$0xff] }
 0xa3b   :  { %7230 = vmatpush3.msra.mxu0 %v2521_v17  ;;  %7268 = vmatpush3.msra.mxu1 %v2553_v20  ;;  %v2542_v17 = vld [vmem:[%s10794_s7 + $0x708] sm:$0xff]  ;;  %v2206_v20 = vadd.f32 %v9188_v51, %v2205_v5  ;;  %v2541_v51 = vld [vmem:[%s10794_s7 + $0x700] sm:$0xff] }
 0xa3c   :  { %7231 = vmatprep.subr.mxu0 %v2536_v21  ;;  %7269 = vmatprep.subr.mxu1 %v2568_v22  ;;  %v2283_v21 = vadd.f32 %v9194_v56, %v2282_v46  ;;  %v2509_v22 = vld [vmem:[%s10794_s7 + $0x600] sm:$0xff]  ;;  %v2297_v56 = vmax.f32 %v2198_v12, 0.0 }
 0xa3d   :  { %7232 = vmatpush3.msra.mxu0 %v2520_v24  ;;  %7270 = vmatpush3.msra.mxu1 %v2552_v25  ;;  %v2299_v24 = vmax.f32 %v2275_v13, 0.0  ;;  %v2204_v25 = vadd.f32 %v6470_v45, %v2203_v44 }
 0xa3e   :  { %7233 = vmatprep.subr.mxu0 %v2535_v26  ;;  %7271 = vmatprep.subr.mxu1 %v2567_v27  ;;  %v2281_v26 = vadd.f32 %v6472_v1, %v2280_v55  ;;  %v2314_v27 = vmax.f32 %v2206_v20, 0.0 }
 0xa3f   :  { %7234 = vmatpush3.msra.mxu0 %v2519_v28  ;;  %7272 = vmatpush3.msra.mxu1 %v2551_v29  ;;  %v2316_v28 = vmax.f32 %v2283_v21, 0.0  ;;  %v2313_v29 = vmax.f32 %v2204_v25, 0.0 }
 0xa40   :  { %7235 = vmatprep.subr.mxu0 %v2534_v30  ;;  %7273 = vmatprep.subr.mxu1 %v2566_v31  ;;  %v2315_v30 = vmax.f32 %v2281_v26, 0.0 }
 0xa41   :  { %7236 = vmatpush3.msra.mxu0 %v2518_v32  ;;  %7274 = vmatpush3.msra.mxu1 %v2550_v33 }
 0xa42   :  { %7237 = vmatprep.subr.mxu0 %v2533_v34  ;;  %7275 = vmatprep.subr.mxu1 %v2565_v35 }
 0xa43   :  { %7238 = vmatpush3.msra.mxu0 %v2517_v19  ;;  %7276 = vmatpush3.msra.mxu1 %v2549_v18 }
 0xa44   :  { %7239 = vmatprep.subr.mxu0 %v2532_v36  ;;  %7277 = vmatprep.subr.mxu1 %v2564_v60 }
 0xa45   :  { %7240 = vmatpush3.msra.mxu0 %v2516_v0  ;;  %7278 = vmatpush3.msra.mxu1 %v2548_v38 }
 0xa46   :  { %7241 = vmatprep.subr.mxu0 %v2531_v39  ;;  %7279 = vmatprep.subr.mxu1 %v2563_v42 }
 0xa47   :  { %7242 = vmatpush3.msra.mxu0 %v2515_v48  ;;  %7280 = vmatpush3.msra.mxu1 %v2547_v49  ;;  %v2575_v48 = vsub.s32 1, %v8263_v8 }
 0xa48   :  { %7243 = vmatprep.subr.mxu0 %v2530_v50  ;;  %7281 = vmatprep.subr.mxu1 %v2562_v6  ;;  %v9398_v6 = vld [vmem:[%s10792_s8] sm:$0x3f] }
 0xa49   :  { %7244 = vmatpush3.msra.mxu0 %v2514_v15  ;;  %7282 = vmatpush3.msra.mxu1 %v2546_v52  ;;  %v2576_v15 = vrot.slane %v9398_v6, %v2575_v48 }
 0xa4a   :  { %7245 = vmatprep.subr.mxu0 %v2529_v53  ;;  %7283 = vmatprep.subr.mxu1 %v2561_v54 }
 0xa4b   :  { %7246 = vmatpush3.msra.mxu0 %v2513_v57  ;;  %7284 = vmatpush3.msra.mxu1 %v2545_v40 }
 0xa4c   :  { %7247 = vmatprep.subr.mxu0 %v2528_v58  ;;  %7285 = vmatprep.subr.mxu1 %v2560_v43 }
 0xa4d   :  { %7248 = vmatpush3.msra.mxu0 %v2512_v62  ;;  %7286 = vmatpush3.msra.mxu1 %v2544_v63 }
 0xa4e   :  { %7249 = vmatprep.subr.mxu0 %v2527_v2  ;;  %7287 = vmatprep.subr.mxu1 %v2559_v3 }
 0xa4f   :  { %7250 = vmatpush3.msra.mxu0 %v2511_v47  ;;  %7288 = vmatpush3.msra.mxu1 %v2543_v7 }
 0xa50   :  { %7251 = vmatprep.subr.mxu0 %v2526_v11  ;;  %7289 = vmatprep.subr.mxu1 %v2558_v10 }
 0xa51   :  { %7252 = vmatpush3.msra.mxu0 %v2510_v16  ;;  %7290 = vmatpush3.msra.mxu1 %v2542_v17 }
 0xa52   :  { %7253 = vmatprep.subr.mxu0 %v2525_v37  ;;  %7291 = vmatprep.subr.mxu1 %v2557_v41 }
 0xa53   :  { %7254 = vmatpush3.msra.mxu0 %v2509_v22  ;;  %7292 = vmatpush3.msra.mxu1 %v2541_v51 }
 0xa54   :  { %3092 = vmatmul.mubr.f32.vlgmr.msra.gmra.mxu0 %v2297_v56  ;;  %3167 = vmatmul.mubr.f32.vlgmr.msra.gmra.mxu1 %v2299_v24 }
 0xa55   :  { %3096 = vmatprep.mubr.f32.mxu0 %v2314_v27  ;;  %3171 = vmatprep.mubr.f32.mxu1 %v2316_v28 }
 0xa58   :  { %3097 = vmatmul.mubr.f32.gmra.mxu0 %v2313_v29  ;;  %3172 = vmatmul.mubr.f32.gmra.mxu1 %v2315_v30 }
 0xaa9   :  { %v7027_v31 = vpop.f32.mrf.mxu0  ;;  %v7065_v32 = vpop.f32.mrf.mxu1 }
 0xaab   :  { %v7028_v33 = vpop.f32.mrf.mxu0  ;;  %v7066_v34 = vpop.f32.mrf.mxu1 }
 0xaac   :  { %v7029_v52 = vadd.f32 %v7028_v33, %v7027_v31  ;;  %v7067_v58 = vadd.f32 %v7066_v34, %v7065_v32 }
 0xaae   :  { %v2644_v55 = vadd.f32 %v7029_v52, %v2576_v15 }
 0xaaf   :  { %v7030_v35 = vpop.f32.mrf.mxu0  ;;  %v7068_v19 = vpop.f32.mrf.mxu1 }
 0xab0   :  { %v2719_v62 = vadd.f32 %v7067_v58, %v2644_v55  ;;  %v6499_v58 = vld [vmem:[%s10788_s4 + $0x130] sm:$0xff] }
 0xab1   :  { %v7031_v18 = vpop.f32.mrf.mxu0  ;;  %v7069_v36 = vpop.f32.mrf.mxu1  ;;  %7809 = vmatprep.subr.mxu1 %v6499_v58 }
 0xab2   :  { %v7032_v57 = vadd.f32 %v7031_v18, %v7030_v35  ;;  %v7070_v2 = vadd.f32 %v7069_v36, %v7068_v19  ;;  %7810 = vmatpush3.msra.mxu1 %v6499_v58 }
 0xab4   :  { %v2649_v63 = vadd.f32 %v7032_v57, %v2576_v15 }
 0xab6   :  { %v2724_v47 = vadd.f32 %v7070_v2, %v2649_v63  ;;  %v6497_v63 = vld [vmem:[%s10788_s4 + $0x120] sm:$0xff]  ;;  %v6496_v2 = vld [vmem:[%s10788_s4 + $0x118] sm:$0xff] }
 0xacc   :  { %v7103_v60 = vpop.f32.mrf.mxu0  ;;  %v7141_v0 = vpop.f32.mrf.mxu1 }
 0xace   :  { %v7104_v38 = vpop.f32.mrf.mxu0  ;;  %v7142_v39 = vpop.f32.mrf.mxu1 }
 0xacf   :  { %v7105_v43 = vadd.f32 %v7104_v38, %v7103_v60  ;;  %v7143_v7 = vadd.f32 %v7142_v39, %v7141_v0 }
 0xad1   :  { %v2794_v3 = vadd.f32 %v7105_v43, %v2719_v62  ;;  %v6493_v43 = vld [vmem:[%s10788_s4 + $0x100] sm:$0xff]  ;;  %v6492_v62 = vld [vmem:[%s10788_s4 + $0xf8] sm:$0xff] }
 0xad2   :  { %v7106_v42 = vpop.f32.mrf.mxu0  ;;  %v7144_v49 = vpop.f32.mrf.mxu1 }
 0xad3   :  { %v2869_v12 = vadd.f32 %v7143_v7, %v2794_v3  ;;  %v6504_v3 = vld [vmem:[%s10788_s4 + $0x158] sm:$0xff] }
 0xad4   :  { %v7107_v50 = vpop.f32.mrf.mxu0  ;;  %v7145_v53 = vpop.f32.mrf.mxu1 }
 0xad5   :  { %v7108_v5 = vadd.f32 %v7107_v50, %v7106_v42  ;;  %v7146_v17 = vadd.f32 %v7145_v53, %v7144_v49 }
 0xad7   :  { %v2799_v13 = vadd.f32 %v7108_v5, %v2724_v47 }
 0xad9   :  { %v2874_v22 = vadd.f32 %v7146_v17, %v2799_v13  ;;  %v3213_v13 = vsub.s32 5, %v8263_v8 }
 0xaf0   :  { %v7179_v54 = vpop.f32.mrf.mxu0  ;;  %v7217_v44 = vpop.f32.mrf.mxu1 }
 0xaf2   :  { %v7180_v40 = vpop.f32.mrf.mxu0  ;;  %v7218_v45 = vpop.f32.mrf.mxu1 }
 0xaf3   :  { %v7181_v11 = vadd.f32 %v7180_v40, %v7179_v54  ;;  %v7219_v51 = vadd.f32 %v7218_v45, %v7217_v44  ;;  %v6498_v45 = vld [vmem:[%s10788_s4 + $0x128] sm:$0xff] }
 0xaf4   :  { %7811 = vmatprep.subr.mxu1 %v6498_v45 }
 0xaf5   :  { %v2944_v20 = vadd.f32 %v7181_v11, %v2869_v12  ;;  %7812 = vmatpush3.msra.mxu1 %v6498_v45  ;;  %v3207_v12 = vsub.s32 4, %v8263_v8 }
 0xaf6   :  { %v7182_v1 = vpop.f32.mrf.mxu0  ;;  %v7220_v46 = vpop.f32.mrf.mxu1  ;;  %7813 = vmatprep.subr.mxu1 %v6497_v63 }
 0xaf7   :  { %v3019_v25 = vadd.f32 %v7219_v51, %v2944_v20  ;;  %7814 = vmatpush3.msra.mxu1 %v6497_v63  ;;  %v3214_v20 = vrot.slane %v9398_v6, %v3213_v13 }
 0xaf8   :  { %v7183_v10 = vpop.f32.mrf.mxu0  ;;  %v7221_v16 = vpop.f32.mrf.mxu1  ;;  %7815 = vmatprep.subr.mxu1 %v6496_v2 }
 0xaf9   :  { %v7184_v21 = vadd.f32 %v7183_v10, %v7182_v1  ;;  %v7222_v30 = vadd.f32 %v7221_v16, %v7220_v46  ;;  %v6491_v1 = vld [vmem:[%s10788_s4 + $0xf0] sm:$0xff]  ;;  %7816 = vmatpush3.msra.mxu1 %v6496_v2  ;;  %v3208_v16 = vrot.slane %v9398_v6, %v3207_v12  ;;  %v6502_v6 = vld [vmem:[%s10788_s4 + $0x148] sm:$0xff] }
 0xafa   :  { %7831 = vmatprep.subr.mxu1 %v7983_v23 }
 0xafb   :  { %v2949_v26 = vadd.f32 %v7184_v21, %v2874_v22 }
 0xafd   :  { %v3024_v35 = vadd.f32 %v7222_v30, %v2949_v26  ;;  %v6501_v26 = vld [vmem:[%s10788_s4 + $0x140] sm:$0xff] }
 0xb14   :  { %v7255_v37 = vpop.f32.mrf.mxu0  ;;  %v7293_v41 = vpop.f32.mrf.mxu1 }
 0xb16   :  { %v7256_v56 = vpop.f32.mrf.mxu0  ;;  %v7294_v24 = vpop.f32.mrf.mxu1 }
 0xb17   :  { %v7257_v27 = vadd.f32 %v7256_v56, %v7255_v37  ;;  %v7295_v32 = vadd.f32 %v7294_v24, %v7293_v41 }
 0xb18   :  { %v7258_v28 = vpop.f32.mrf.mxu0  ;;  %v7296_v29 = vpop.f32.mrf.mxu1 }
 0xb19   :  { %v3094_v31 = vadd.f32 %v7257_v27, %v3019_v25  ;;  %v6503_v25 = vld [vmem:[%s10788_s4 + $0x150] sm:$0xff] }
 0xb1a   :  { %v7259_v33 = vpop.f32.mrf.mxu0  ;;  %v7297_v34 = vpop.f32.mrf.mxu1 }
 0xb1b   :  { %v3169_v19 = vadd.f32 %v7295_v32, %v3094_v31  ;;  %v7260_v18 = vadd.f32 %v7259_v33, %v7258_v28  ;;  %v7298_v60 = vadd.f32 %v7297_v34, %v7296_v29  ;;  %v6509_v29 = vld [vmem:[%s10788_s4 + $0x138] ss:$0 sm:$0xff]  ;;  %v6506_v33 = vld [vmem:[%s10788_s4 + $0x110] ss:$0 sm:$0xff] }
 0xb1d   :  { %v3099_v36 = vadd.f32 %v7260_v18, %v3024_v35  ;;  %v3177_v0 = vadd.f32 %v3169_v19, %v8342_v4  ;;  %v6512_v18 = vld [vmem:[%s10788_s4 + $0x160] ss:$0 sm:$0xff] }
 0xb1f   :  { %v3174_v38 = vadd.f32 %v7298_v60, %v3099_v36  ;;  %v3179_v39 = vsel %vm148_vm1, %v3177_v0, 0.0 }
 0xb20   :  { %3180 = vadd.xlane.f32.xlu0 %v3179_v39 }
 0xb21   :  { %v3178_v42 = vadd.f32 %v3174_v38, %v8366_v14  ;;  %v6494_v14 = vld [vmem:[%s10788_s4 + $0x108] sm:$0xff] }
 0xb22   :  { %7798 = vmatprep.subr.mxu0 %v6494_v14 }
 0xb23   :  { %v3182_v49 = vsel %vm148_vm1, %v3178_v42, 0.0  ;;  %7799 = vmatpush3.msra.mxu0 %v6494_v14 }
 0xb24   :  { %3183 = vadd.xlane.f32.xlu1 %v3182_v49  ;;  %7800 = vmatprep.subr.mxu0 %v6493_v43 }
 0xb25   :  { %7801 = vmatpush3.msra.mxu0 %v6493_v43 }
 0xb26   :  { %7802 = vmatprep.subr.mxu0 %v6492_v62 }
 0xb27   :  { %7803 = vmatpush3.msra.mxu0 %v6492_v62 }
 0xb28   :  { %7804 = vmatprep.subr.mxu0 %v6491_v1 }
 0xb29   :  { %7805 = vmatpush3.msra.mxu0 %v6491_v1 }
 0xb2a   :  { %7820 = vmatprep.subr.mxu0 %v6504_v3 }
 0xba9   :  { %v3181_v50 = vpop.xlane.xlu0 %3180 }
 0xbaa   :  { %v3185_v15 = vmul.f32 0.03125, %v3181_v50  ;;  %v9497_v50 = vld [vmem:[%s10790_s2] ss:$0 sm:$0xff] }
 0xbac   :  { %v3187_v52 = vsub.f32 %v3177_v0, %v3185_v15 }
 0xbad   :  { %v3184_v53 = vpop.xlane.xlu1 %3183 }
 0xbae   :  { %v3186_v54 = vmul.f32 0.03125, %v3184_v53  ;;  %v3189_v44 = vmul.f32 %v3187_v52, %v3187_v52 }
 0xbb0   :  { %v3188_v55 = vsub.f32 %v3178_v42, %v3186_v54  ;;  %v3191_v57 = vsel %vm148_vm1, %v3189_v44, 0.0 }
 0xbb1   :  { %3192 = vadd.xlane.f32.xlu0 %v3191_v57 }
 0xbb2   :  { %v3190_v4 = vmul.f32 %v3188_v55, %v3188_v55 }
 0xbb4   :  { %v3194_v40 = vsel %vm148_vm1, %v3190_v4, 0.0 }
 0xbb5   :  { %3195 = vadd.xlane.f32.xlu1 %v3194_v40 }
 0xc3a   :  { %v3193_v5 = vpop.xlane.xlu0 %3192 }
 0xc3b   :  { %v3197_v46 = vmul.f32 0.03125, %v3193_v5  ;;  %v6526_v5 = vld [vmem:[%s10788_s4 + $0x180] sm:$0xff] }
 0xc3d   :  { %v3199_v47 = vadd.f32 1e-05, %v3197_v46  ;;  %v6531_v46 = vld [vmem:[%s10788_s4 + $0x1a8] sm:$0xff] }
 0xc3e   :  { %v3196_v7 = vpop.xlane.xlu1 %3195 }
 0xc3f   :  { %7951 = vrsqrt.f32 %v3199_v47  ;;  %v3198_v11 = vmul.f32 0.03125, %v3196_v7 }
 0xc41   :  { %v3200_v10 = vadd.f32 1e-05, %v3198_v11 }
 0xc43   :  { %7953 = vrsqrt.f32 %v3200_v10 }
 0xc4c   :  { %v7952_v17 = vpop.eup %7951 }
 0xc4d   :  { %v3203_v21 = vmul.f32 %v7952_v17, %v3187_v52 }
 0xc4f   :  { %v3209_v37 = vmul.f32 %v3208_v16, %v3203_v21 }
 0xc50   :  { %v7954_v41 = vpop.eup %7953 }
 0xc51   :  { %v9445_v22 = vadd.f32 %v3214_v20, %v3209_v37  ;;  %v3204_v51 = vmul.f32 %v7954_v41, %v3188_v55  ;;  %v9504_v55 = vld [vmem:[%s10790_s2 + $0x1] ss:$0 sm:$0xff]  ;;  %v6523_v37 = vld [vmem:[%s10788_s4 + $0x168] sm:$0xff] }
 0xc52   :  { %v6530_v41 = vld [vmem:[%s10788_s4 + $0x1a0] sm:$0xff] }
 0xc53   :  { %v3210_v56 = vmul.f32 %v3208_v16, %v3204_v51  ;;  %7806 = vmatprep.mubr.msk.f32.mxu0 %vm148_vm1, %v9445_v22  ;;  %7817 = vmatprep.mubr.msk.f32.mxu1 %vm148_vm1, %v9445_v22  ;;  %v6525_v16 = vld [vmem:[%s10788_s4 + $0x178] sm:$0xff] }
 0xc54   :  { %v6529_v51 = vld [vmem:[%s10788_s4 + $0x198] sm:$0xff] }
 0xc55   :  { %v9451_v24 = vadd.f32 %v3214_v20, %v3210_v56  ;;  %v6524_v20 = vld [vmem:[%s10788_s4 + $0x170] sm:$0xff] }
 0xc56   :  { %v6536_v56 = vld [vmem:[%s10788_s4 + $0x1d0] sm:$0xff] }
 0xc57   :  { %7807 = vmatmul.mubr.msk.f32.vlgmr.msra.gmra.mxu0 %vm148_vm1, %v9451_v24  ;;  %7818 = vmatmul.mubr.msk.f32.vlgmr.msra.gmra.mxu1 %vm148_vm1, %v9451_v24 }
 0xc58   :  { %7821 = vmatpush3.msra.mxu0 %v6504_v3  ;;  %7828 = vmatprep.mubr.msk.f32.mxu0 %vm148_vm1, %v9445_v22 }
 0xc59   :  { %7822 = vmatprep.subr.mxu0 %v6503_v25  ;;  %7833 = vmatprep.mubr.msk.f32.mxu1 %vm7984_vm2, %v7983_v23 }
 0xc5a   :  { %7823 = vmatpush3.msra.mxu0 %v6503_v25  ;;  %v6528_v25 = vld [vmem:[%s10788_s4 + $0x190] sm:$0xff] }
 0xc5b   :  { %7824 = vmatprep.subr.mxu0 %v6502_v6 }
 0xc5c   :  { %7825 = vmatpush3.msra.mxu0 %v6502_v6  ;;  %v6535_v6 = vld [vmem:[%s10788_s4 + $0x1c8] sm:$0xff] }
 0xc5d   :  { %7826 = vmatprep.subr.mxu0 %v6501_v26 }
 0xc5e   :  { %7827 = vmatpush3.msra.mxu0 %v6501_v26  ;;  %v6534_v26 = vld [vmem:[%s10788_s4 + $0x1c0] sm:$0xff] }
 0xc5f   :  { %7829 = vmatmul.mubr.msk.f32.vlgmr.msra.gmra.mxu0 %vm148_vm1, %v9451_v24  ;;  %7841 = vmatprep.subr.mxu0 %v7983_v23 }
 0xc60   :  { %7843 = vmatprep.mubr.msk.f32.mxu0 %vm7984_vm2, %v7983_v23 }
 0xd17   :  { %v7808_v27 = vpop.f32.mrf.mxu0  ;;  %v7819_v28 = vpop.f32.mrf.mxu1 }
 0xd18   :  { %v3398_v35 = vadd.f32 %v7819_v28, %v6509_v29  ;;  %v3319_v36 = vadd.f32 %v7808_v27, %v6506_v33  ;;  %v6533_v27 = vld [vmem:[%s10788_s4 + $0x1b8] sm:$0xff] }
 0xd19   :  { %v3392_v30 = vpop.f32.mrf.mxu1  ;;  %v3313_v31 = vpop.f32.mrf.mxu0 }
 0xd1a   :  { %v3393_v32 = vadd.f32 %v6509_v29, %v3392_v30  ;;  %v3314_v34 = vadd.f32 %v6506_v33, %v3313_v31 }
 0xd1c   :  { %7832 = vmatpush3.xpose.msk.msra.mxu1 %vm388_vm3, %v3393_v32 }
 0xd1d   :  { %7836 = vmatprep.subr.mxu1 %v7983_v23 }
 0xd1f   :  { %v7830_v19 = vpop.f32.mrf.mxu0  ;;  %7834 = vmatmul.mubr.msk.f32.vlgmr.msra.gmra.mxu1 %vm388_vm3, %v3314_v34  ;;  %v6541_v34 = vld [vmem:[%s10788_s4 + $0x1b0] ss:$0 sm:$0xff] }
 0xd20   :  { %7837 = vmatpush3.xpose.msk.msra.mxu1 %vm388_vm3, %v3398_v35  ;;  %7838 = vmatprep.mubr.msk.f32.mxu1 %vm7984_vm2, %v7983_v23  ;;  %v3477_v0 = vadd.f32 %v7830_v19, %v6512_v18 }
 0xd21   :  { %v3471_v60 = vpop.f32.mrf.mxu0  ;;  %7846 = vmatprep.subr.mxu1 %v7983_v23 }
 0xd22   :  { %v3472_v38 = vadd.f32 %v6512_v18, %v3471_v60 }
 0xd23   :  { %7839 = vmatmul.mubr.msk.f32.vlgmr.msra.gmra.mxu1 %vm388_vm3, %v3319_v36  ;;  %v6538_v36 = vld [vmem:[%s10788_s4 + $0x188] ss:$0 sm:$0xff] }
 0xd24   :  { %7842 = vmatpush3.msra.mxu0 %v3472_v38  ;;  %7847 = vmatpush3.msra.mxu1 %v3477_v0 }
 0xd25   :  { %7848 = vmatprep.mubr.msk.f32.mxu1 %vm7984_vm2, %v7983_v23  ;;  %7851 = vmatprep.subr.mxu0 %v6526_v5 }
 0xd26   :  { %7862 = vmatprep.subr.mxu1 %v6531_v46 }
 0xddf   :  { %v3552_v39 = vpop.f32.mrf.mxu1 }
 0xde0   :  { %v3632_v42 = vmul.f32 0.25, %v3552_v39  ;;  %v6544_v39 = vld [vmem:[%s10788_s4 + $0x1d8] ss:$0 sm:$0xff] }
 0xde1   :  { %v7835_v49 = vpop.f32.mrf.mxu1 }
 0xde2   :  { %v3634_v15 = vadd.f32 %v9497_v50, %v3632_v42 }
 0xde3   :  { %v3628_v52 = vpop.f32.mrf.mxu1 }
 0xde4   :  { %v3633_v53 = vmul.f32 0.25, %v3628_v52  ;;  %v3636_v54 = vsel %vm557_vm4, %v3634_v15, -inf }
 0xde5   :  { %3637 = vmax.xlane.f32.xlu1 %v3636_v54  ;;  %v7840_v44 = vpop.f32.mrf.mxu1 }
 0xde6   :  { %v3635_v57 = vadd.f32 %v9504_v55, %v3633_v53 }
 0xde8   :  { %v3639_v4 = vsel %vm557_vm4, %v3635_v57, -inf }
 0xde9   :  { %3640 = vmax.xlane.f32.xlu0 %v3639_v4 }
 0xe6e   :  { %v3638_v40 = vpop.xlane.xlu1 %3637 }
 0xe6f   :  { %v3642_v14 = vsub.f32 %v3634_v15, %v3638_v40 }
 0xe71   :  { %v3644_v58 = vmul.f32 1.442695, %v3642_v14 }
 0xe72   :  { %v3641_v43 = vpop.xlane.xlu0 %3640 }
 0xe73   :  { %7955 = vpow2.f32 %v3644_v58  ;;  %v3643_v45 = vsub.f32 %v3635_v57, %v3641_v43 }
 0xe75   :  { %v3646_v62 = vmul.f32 1.442695, %v3643_v45 }
 0xe77   :  { %7957 = vpow2.f32 %v3646_v62 }
 0xe80   :  { %v7956_v63 = vpop.eup %7955 }
 0xe81   :  { %v3648_v1 = vsel %vm557_vm4, %v7956_v63, 0.0 }
 0xe82   :  { %3649 = vadd.xlane.f32.xlu1 %v3648_v1 }
 0xe84   :  { %v7958_v2 = vpop.eup %7957 }
 0xe85   :  { %v3651_v3 = vsel %vm557_vm4, %v7958_v2, 0.0 }
 0xe86   :  { %3652 = vadd.xlane.f32.xlu0 %v3651_v3 }
 0xf0b   :  { %v3650_v47 = vpop.xlane.xlu1 %3649 }
 0xf0c   :  { %7959 = vrcp.f32 %v3650_v47 }
 0xf0f   :  { %v3653_v7 = vpop.xlane.xlu0 %3652 }
 0xf10   :  { %7961 = vrcp.f32 %v3653_v7 }
 0xf19   :  { %v7960_v11 = vpop.eup %7959 }
 0xf1a   :  { %v3655_v10 = vmul.f32 %v7960_v11, %v7956_v63 }
 0xf1c   :  { %7844 = vmatmul.mubr.msk.f32.vlgmr.msra.gmra.mxu0 %vm557_vm4, %v3655_v10 }
 0xf1d   :  { %v7962_v17 = vpop.eup %7961  ;;  %7852 = vmatpush3.msra.mxu0 %v6526_v5  ;;  %7859 = vmatprep.mubr.msk.f32.mxu0 %vm148_vm1, %v9445_v22 }
 0xf1e   :  { %7853 = vmatprep.subr.mxu0 %v6525_v16  ;;  %v3657_v21 = vmul.f32 %v7962_v17, %v7958_v2 }
 0xf1f   :  { %7854 = vmatpush3.msra.mxu0 %v6525_v16 }
 0xf20   :  { %7855 = vmatprep.subr.mxu0 %v6524_v20  ;;  %7849 = vmatmul.mubr.msk.f32.vlgmr.msra.gmra.mxu1 %vm557_vm4, %v3657_v21 }
 0xf21   :  { %7856 = vmatpush3.msra.mxu0 %v6524_v20  ;;  %7863 = vmatpush3.msra.mxu1 %v6531_v46 }
 0xf22   :  { %7857 = vmatprep.subr.mxu0 %v6523_v37  ;;  %7864 = vmatprep.subr.mxu1 %v6530_v41 }
 0xf23   :  { %7870 = vmatprep.mubr.msk.f32.mxu1 %vm148_vm1, %v9445_v22  ;;  %7858 = vmatpush3.msra.mxu0 %v6523_v37  ;;  %v6521_v37 = vld [vmem:[%s10791_s5 + $0x20] sm:$0xff] }
 0xf24   :  { %7865 = vmatpush3.msra.mxu1 %v6530_v41  ;;  %7860 = vmatmul.mubr.msk.f32.vlgmr.msra.gmra.mxu0 %vm148_vm1, %v9451_v24  ;;  %v6554_v41 = vld [vmem:[%s10791_s5 + $0x38] sm:$0xff] }
 0xf25   :  { %7866 = vmatprep.subr.mxu1 %v6529_v51  ;;  %7873 = vmatprep.subr.mxu0 %v6536_v56 }
 0xf26   :  { %7867 = vmatpush3.msra.mxu1 %v6529_v51  ;;  %7874 = vmatpush3.msra.mxu0 %v6536_v56  ;;  %v6553_v51 = vld [vmem:[%s10791_s5 + $0x30] sm:$0xff] }
 0xf27   :  { %7881 = vmatprep.mubr.msk.f32.mxu0 %vm148_vm1, %v9445_v22  ;;  %7868 = vmatprep.subr.mxu1 %v6528_v25 }
 0xf28   :  { %7875 = vmatprep.subr.mxu0 %v6535_v6  ;;  %7869 = vmatpush3.msra.mxu1 %v6528_v25 }
 0xf29   :  { %7876 = vmatpush3.msra.mxu0 %v6535_v6  ;;  %7871 = vmatmul.mubr.msk.f32.vlgmr.msra.gmra.mxu1 %vm148_vm1, %v9451_v24 }
 0xf2a   :  { %7877 = vmatprep.subr.mxu0 %v6534_v26  ;;  %7884 = vmatprep.subr.mxu1 %v7983_v23 }
 0xf2b   :  { %7878 = vmatpush3.msra.mxu0 %v6534_v26  ;;  %7886 = vmatprep.mubr.msk.f32.mxu1 %vm7984_vm2, %v7983_v23 }
 0xf2c   :  { %7879 = vmatprep.subr.mxu0 %v6533_v27 }
 0xf2d   :  { %7880 = vmatpush3.msra.mxu0 %v6533_v27  ;;  %v9620_v27 = vld [vmem:[%s10792_s8 + $0x8] sm:$0x3f] }
 0xf2e   :  { %7882 = vmatmul.mubr.msk.f32.vlgmr.msra.gmra.mxu0 %vm148_vm1, %v9451_v24  ;;  %7894 = vmatprep.subr.mxu0 %v7983_v23 }
 0xf2f   :  { %7896 = vmatprep.mubr.msk.f32.mxu0 %vm7984_vm2, %v7983_v23 }
 0xfdc   :  { %v9566_v28 = vpop.f32.mrf.mxu0 }
 0xfde   :  { %v7845_v29 = vpop.f32.mrf.mxu0 }
 0xfdf   :  { %v4554_v29 = vrot.slane %v9620_v27, %v1474_v9 }
 0xfe0   :  { %v9568_v30 = vpop.f32.mrf.mxu1 }
 0xfe2   :  { %v7850_v31 = vpop.f32.mrf.mxu1 }
 0xfe4   :  { %v7861_v32 = vpop.f32.mrf.mxu0 }
 0xfe5   :  { %v3901_v15 = vadd.f32 %v7861_v32, %v6538_v36 }
 0xfe6   :  { %v3895_v19 = vpop.f32.mrf.mxu0 }
 0xfe7   :  { %v3896_v0 = vadd.f32 %v6538_v36, %v3895_v19 }
 0xfe9   :  { %v7872_v33 = vpop.f32.mrf.mxu1 }
 0xfea   :  { %v3980_v38 = vadd.f32 %v7872_v33, %v6541_v34 }
 0xfeb   :  { %v3974_v35 = vpop.f32.mrf.mxu1 }
 0xfec   :  { %v3975_v18 = vadd.f32 %v6541_v34, %v3974_v35 }
 0xfee   :  { %v7883_v60 = vpop.f32.mrf.mxu0  ;;  %7885 = vmatpush3.xpose.msk.msra.mxu1 %vm388_vm3, %v3975_v18 }
 0xfef   :  { %7889 = vmatprep.subr.mxu1 %v7983_v23  ;;  %v4059_v52 = vadd.f32 %v7883_v60, %v6544_v39 }
 0xff0   :  { %v4053_v42 = vpop.f32.mrf.mxu0 }
 0xff1   :  { %v4054_v49 = vadd.f32 %v6544_v39, %v4053_v42  ;;  %7887 = vmatmul.mubr.msk.f32.vlgmr.msra.gmra.mxu1 %vm388_vm3, %v3896_v0 }
 0xff2   :  { %7890 = vmatpush3.xpose.msk.msra.mxu1 %vm388_vm3, %v3980_v38  ;;  %7891 = vmatprep.mubr.msk.f32.mxu1 %vm7984_vm2, %v7983_v23 }
 0xff3   :  { %7895 = vmatpush3.msra.mxu0 %v4054_v49  ;;  %7899 = vmatprep.subr.mxu1 %v7983_v23 }
 0xff4   :  { %7904 = vmatprep.subr.mxu0 %v6554_v41 }
 0xff5   :  { %7892 = vmatmul.mubr.msk.f32.vlgmr.msra.gmra.mxu1 %vm388_vm3, %v3901_v15 }
 0xff6   :  { %7900 = vmatpush3.msra.mxu1 %v4059_v52  ;;  %7901 = vmatprep.mubr.msk.f32.mxu1 %vm7984_vm2, %v7983_v23 }
0x10b1   :  { %v4134_v53 = vpop.f32.mrf.mxu1 }
0x10b2   :  { %v4214_v54 = vmul.f32 0.25, %v4134_v53 }
0x10b3   :  { %v7888_v44 = vpop.f32.mrf.mxu1 }
0x10b4   :  { %v4216_v57 = vadd.f32 %v9497_v50, %v4214_v54  ;;  %v6610_v44 = vld [vmem:[%s10793_s6 + $0x418] sm:$0xff] }
0x10b5   :  { %v4210_v4 = vpop.f32.mrf.mxu1 }
0x10b6   :  { %v4215_v40 = vmul.f32 0.25, %v4210_v4  ;;  %v4218_v14 = vsel %vm557_vm4, %v4216_v57, -inf  ;;  %v6609_v4 = vld [vmem:[%s10793_s6 + $0x410] sm:$0xff] }
0x10b7   :  { %4219 = vmax.xlane.f32.xlu0 %v4218_v14  ;;  %v7893_v58 = vpop.f32.mrf.mxu1  ;;  %v6594_v14 = vld [vmem:[%s10793_s6 + $0x398] sm:$0xff] }
0x10b8   :  { %v4217_v43 = vadd.f32 %v9504_v55, %v4215_v40  ;;  %v6522_v55 = vld [vmem:[%s10791_s5 + $0x28] sm:$0xff]  ;;  %v6591_v58 = vld [vmem:[%s10793_s6 + $0x380] sm:$0xff] }
0x10b9   :  { %7911 = vmatprep.subr.mxu1 %v6522_v55  ;;  %v6592_v40 = vld [vmem:[%s10793_s6 + $0x388] sm:$0xff] }
0x10ba   :  { %v4221_v45 = vsel %vm557_vm4, %v4217_v43, -inf }
0x10bb   :  { %4222 = vmax.xlane.f32.xlu1 %v4221_v45  ;;  %v6576_v45 = vld [vmem:[%s10793_s6 + $0x308] sm:$0xff] }
0x1140   :  { %v4220_v62 = vpop.xlane.xlu0 %4219 }
0x1141   :  { %v4224_v63 = vsub.f32 %v4216_v57, %v4220_v62  ;;  %v6607_v57 = vld [vmem:[%s10793_s6 + $0x400] sm:$0xff]  ;;  %v6578_v62 = vld [vmem:[%s10793_s6 + $0x318] sm:$0xff] }
0x1143   :  { %v4226_v1 = vmul.f32 1.442695, %v4224_v63  ;;  %v6575_v63 = vld [vmem:[%s10793_s6 + $0x300] sm:$0xff] }
0x1144   :  { %v4223_v2 = vpop.xlane.xlu1 %4222 }
0x1145   :  { %7963 = vpow2.f32 %v4226_v1  ;;  %v4225_v3 = vsub.f32 %v4217_v43, %v4223_v2  ;;  %v6593_v43 = vld [vmem:[%s10793_s6 + $0x390] sm:$0xff]  ;;  %v6560_v2 = vld [vmem:[%s10793_s6 + $0x288] sm:$0xff] }
0x1146   :  { %v6577_v1 = vld [vmem:[%s10793_s6 + $0x310] sm:$0xff] }
0x1147   :  { %v4228_v5 = vmul.f32 1.442695, %v4225_v3  ;;  %v6562_v3 = vld [vmem:[%s10793_s6 + $0x298] sm:$0xff] }
0x1149   :  { %7965 = vpow2.f32 %v4228_v5  ;;  %v6559_v5 = vld [vmem:[%s10793_s6 + $0x280] sm:$0xff] }
0x1152   :  { %v7964_v50 = vpop.eup %7963 }
0x1153   :  { %v4230_v46 = vsel %vm557_vm4, %v7964_v50, 0.0 }
0x1154   :  { %4231 = vadd.xlane.f32.xlu0 %v4230_v46  ;;  %v6612_v46 = vld [vmem:[%s10793_s6 + $0x428] sm:$0xff] }
0x1156   :  { %v7966_v47 = vpop.eup %7965 }
0x1157   :  { %v4233_v7 = vsel %vm557_vm4, %v7966_v47, 0.0 }
0x1158   :  { %4234 = vadd.xlane.f32.xlu1 %v4233_v7 }
0x11dd   :  { %v4232_v11 = vpop.xlane.xlu0 %4231 }
0x11de   :  { %7967 = vrcp.f32 %v4232_v11 }
0x11e1   :  { %v4235_v10 = vpop.xlane.xlu1 %4234 }
0x11e2   :  { %7969 = vrcp.f32 %v4235_v10 }
0x11eb   :  { %v7968_v16 = vpop.eup %7967 }
0x11ec   :  { %v4237_v17 = vmul.f32 %v7968_v16, %v7964_v50  ;;  %v6561_v50 = vld [vmem:[%s10793_s6 + $0x290] sm:$0xff] }
0x11ee   :  { %7897 = vmatmul.mubr.msk.f32.vlgmr.msra.gmra.mxu0 %vm557_vm4, %v4237_v17 }
0x11ef   :  { %v7970_v20 = vpop.eup %7969  ;;  %7905 = vmatpush3.msra.mxu0 %v6554_v41 }
0x11f0   :  { %v4239_v21 = vmul.f32 %v7970_v20, %v7966_v47  ;;  %7906 = vmatprep.subr.mxu0 %v6553_v51  ;;  %v6614_v47 = vld [vmem:[%s10793_s6 + $0x438] sm:$0xff] }
0x11f1   :  { %7907 = vmatpush3.msra.mxu0 %v6553_v51 }
0x11f2   :  { %7902 = vmatmul.mubr.msk.f32.vlgmr.msra.gmra.mxu1 %vm557_vm4, %v4239_v21 }
0x11f3   :  { %7912 = vmatpush3.msra.mxu1 %v6522_v55  ;;  %7915 = vmatprep.mubr.msk.f32.mxu1 %vm388_vm3, %v9566_v28 }
0x11f4   :  { %7913 = vmatprep.subr.mxu1 %v6521_v37 }
0x11f5   :  { %7914 = vmatpush3.msra.mxu1 %v6521_v37  ;;  %v4588_v37 = vrot.slane %v9620_v27, %v1509_v59  ;;  %v6596_v59 = vld [vmem:[%s10793_s6 + $0x3a8] sm:$0xff] }
0x11f6   :  { %7916 = vmatmul.mubr.msk.f32.vlgmr.msra.gmra.mxu1 %vm388_vm3, %v9568_v30  ;;  %4849 = vmatprep.subr.mxu1 %v6610_v44  ;;  %v6568_v44 = vld [vmem:[%s10793_s6 + $0x2c8] sm:$0xff] }
0x11f7   :  { %4889 = vmatprep.mubr.f32.mxu1 %v7983_v23  ;;  %4850 = vmatpush1.msra.mxu1 %v6609_v4  ;;  %v6567_v4 = vld [vmem:[%s10793_s6 + $0x2c0] sm:$0xff] }
0x11f8   :  { %4851 = vmatprep.subr.mxu1 %v6594_v14  ;;  %v6620_v14 = vld [vmem:[%s10793_s6 + $0x468] sm:$0xff] }
0x11f9   :  { %4852 = vmatpush1.msra.mxu1 %v6593_v43  ;;  %v6619_v43 = vld [vmem:[%s10793_s6 + $0x460] sm:$0xff] }
0x11fa   :  { %4853 = vmatprep.subr.mxu1 %v6578_v62  ;;  %v6604_v62 = vld [vmem:[%s10793_s6 + $0x3e8] sm:$0xff] }
0x11fb   :  { %4854 = vmatpush1.msra.mxu1 %v6577_v1  ;;  %v6603_v1 = vld [vmem:[%s10793_s6 + $0x3e0] sm:$0xff] }
0x11fc   :  { %4855 = vmatprep.subr.mxu1 %v6562_v3  ;;  %v6588_v3 = vld [vmem:[%s10793_s6 + $0x368] sm:$0xff] }
0x11fd   :  { %4856 = vmatpush1.msra.mxu1 %v6561_v50  ;;  %v6587_v50 = vld [vmem:[%s10793_s6 + $0x360] sm:$0xff] }
0x11fe   :  { %5003 = vmatprep.subr.mxu1 %v6614_v47  ;;  %v6572_v47 = vld [vmem:[%s10793_s6 + $0x2e8] sm:$0xff] }
0x12ae   :  { %v4309_v56 = vpop.f32.mrf.mxu0 }
0x12af   :  { %7908 = vmatprep.mubr.msk.f32.mxu0 %vm388_vm3, %v4309_v56  ;;  %v4594_v56 = vrot.slane %v9620_v27, %v1515_v61  ;;  %v6598_v61 = vld [vmem:[%s10793_s6 + $0x3b8] sm:$0xff]  ;;  %v6595_v27 = vld [vmem:[%s10793_s6 + $0x3a0] sm:$0xff] }
0x12b0   :  { %v7898_v25 = vpop.f32.mrf.mxu0 }
0x12b2   :  { %v4382_v6 = vpop.f32.mrf.mxu1 }
0x12b3   :  { %7909 = vmatmul.mubr.msk.f32.vlgmr.msra.gmra.mxu0 %vm388_vm3, %v4382_v6 }
0x12b4   :  { %v7903_v26 = vpop.f32.mrf.mxu1  ;;  %4812 = vmatprep.mubr.f32.mxu0 %v7983_v23 }
0x12b5   :  { %v6611_v26 = vld [vmem:[%s10793_s6 + $0x420] sm:$0xff] }
0x12b6   :  { %v7917_v28 = vpop.f32.mrf.mxu1 }
0x12b8   :  { %v4542_v32 = vpop.f32.mrf.mxu1 }
0x1373   :  { %v7910_v30 = vpop.f32.mrf.mxu0 }
0x1374   :  { %v4548_v31 = vadd.f32 %v7917_v28, %v7910_v30  ;;  %v6613_v28 = vld [vmem:[%s10793_s6 + $0x430] sm:$0xff] }
0x1375   :  { %v4461_v33 = vpop.f32.mrf.mxu0  ;;  %v6597_v30 = vld [vmem:[%s10793_s6 + $0x3b0] sm:$0xff] }
0x1376   :  { %v4556_v34 = vadd.f32 %v4554_v29, %v4548_v31  ;;  %v4543_v35 = vadd.f32 %v4542_v32, %v4461_v33  ;;  %v6580_v32 = vld [vmem:[%s10793_s6 + $0x328] sm:$0xff]  ;;  %v6582_v33 = vld [vmem:[%s10793_s6 + $0x338] sm:$0xff] }
0x1378   :  { %v4555_v19 = vadd.f32 %v4554_v29, %v4543_v35  ;;  %v4558_v18 = vadd.f32 %v4556_v34, %v9451_v24  ;;  %v6579_v34 = vld [vmem:[%s10793_s6 + $0x320] sm:$0xff]  ;;  %v6581_v35 = vld [vmem:[%s10793_s6 + $0x330] sm:$0xff] }
0x137a   :  { %v4562_v36 = vsel %vm148_vm1, %v4558_v18, 0.0  ;;  %v4557_v60 = vadd.f32 %v4555_v19, %v9445_v22  ;;  %v6608_v22 = vld [vmem:[%s10793_s6 + $0x408] sm:$0xff] }
0x137b   :  { %4563 = vadd.xlane.f32.xlu1 %v4562_v36  ;;  %4772 = vmatprep.subr.mxu0 %v6608_v22  ;;  %v6564_v19 = vld [vmem:[%s10793_s6 + $0x2a8] sm:$0xff]  ;;  %v6563_v36 = vld [vmem:[%s10793_s6 + $0x2a0] sm:$0xff]  ;;  %v6585_v22 = vld [vmem:[%s10793_s6 + $0x350] sm:$0xff] }
0x137c   :  { %v4559_v0 = vsel %vm148_vm1, %v4557_v60, 0.0  ;;  %4773 = vmatpush1.msra.mxu0 %v6607_v57  ;;  %v6570_v57 = vld [vmem:[%s10793_s6 + $0x2d8] sm:$0xff] }
0x137d   :  { %4560 = vadd.xlane.f32.xlu0 %v4559_v0  ;;  %4774 = vmatprep.subr.mxu0 %v6592_v40  ;;  %v6616_v0 = vld [vmem:[%s10793_s6 + $0x448] sm:$0xff]  ;;  %v6569_v40 = vld [vmem:[%s10793_s6 + $0x2d0] sm:$0xff] }
0x137e   :  { %4775 = vmatpush1.msra.mxu0 %v6591_v58  ;;  %v6622_v58 = vld [vmem:[%s10793_s6 + $0x478] sm:$0xff] }
0x137f   :  { %4776 = vmatprep.subr.mxu0 %v6576_v45  ;;  %v6621_v45 = vld [vmem:[%s10793_s6 + $0x470] sm:$0xff] }
0x1380   :  { %4777 = vmatpush1.msra.mxu0 %v6575_v63  ;;  %v6606_v63 = vld [vmem:[%s10793_s6 + $0x3f8] sm:$0xff] }
0x1381   :  { %4778 = vmatprep.subr.mxu0 %v6560_v2  ;;  %v6605_v2 = vld [vmem:[%s10793_s6 + $0x3f0] sm:$0xff] }
0x1382   :  { %4779 = vmatpush1.msra.mxu0 %v6559_v5  ;;  %v6590_v5 = vld [vmem:[%s10793_s6 + $0x378] sm:$0xff] }
0x1383   :  { %4926 = vmatprep.subr.mxu0 %v6612_v46  ;;  %v6589_v46 = vld [vmem:[%s10793_s6 + $0x370] sm:$0xff] }
0x1404   :  { %v4564_v38 = vpop.xlane.xlu1 %4563 }
0x1405   :  { %v4566_v39 = vmul.f32 0.03125, %v4564_v38  ;;  %v6618_v38 = vld [vmem:[%s10793_s6 + $0x458] sm:$0xff] }
0x1406   :  { %v4561_v9 = vpop.xlane.xlu0 %4560 }
0x1407   :  { %v4568_v42 = vsub.f32 %v4558_v18, %v4566_v39  ;;  %v4565_v49 = vmul.f32 0.03125, %v4561_v9  ;;  %v6566_v18 = vld [vmem:[%s10793_s6 + $0x2b8] sm:$0xff]  ;;  %v6615_v39 = vld [vmem:[%s10793_s6 + $0x440] sm:$0xff]  ;;  %v6617_v9 = vld [vmem:[%s10793_s6 + $0x450] sm:$0xff] }
0x1409   :  { %v4567_v15 = vsub.f32 %v4557_v60, %v4565_v49  ;;  %v4570_v52 = vmul.f32 %v4568_v42, %v4568_v42  ;;  %v6565_v60 = vld [vmem:[%s10793_s6 + $0x2b0] sm:$0xff]  ;;  %v6602_v49 = vld [vmem:[%s10793_s6 + $0x3d8] sm:$0xff] }
0x140b   :  { %v4574_v53 = vsel %vm148_vm1, %v4570_v52, 0.0  ;;  %v4569_v54 = vmul.f32 %v4567_v15, %v4567_v15  ;;  %v6601_v52 = vld [vmem:[%s10793_s6 + $0x3d0] sm:$0xff] }
0x140c   :  { %4575 = vadd.xlane.f32.xlu1 %v4574_v53  ;;  %v6584_v53 = vld [vmem:[%s10793_s6 + $0x348] sm:$0xff] }
0x140d   :  { %v4571_v24 = vsel %vm148_vm1, %v4569_v54, 0.0  ;;  %v6586_v54 = vld [vmem:[%s10793_s6 + $0x358] sm:$0xff] }
0x140e   :  { %4572 = vadd.xlane.f32.xlu0 %v4571_v24  ;;  %v6583_v24 = vld [vmem:[%s10793_s6 + $0x340] sm:$0xff] }
0x1495   :  { %v4576_v7 = vpop.xlane.xlu1 %4575 }
0x1496   :  { %v4578_v55 = vmul.f32 0.03125, %v4576_v7  ;;  %v6574_v7 = vld [vmem:[%s10793_s6 + $0x2f8] sm:$0xff] }
0x1497   :  { %v4573_v11 = vpop.xlane.xlu0 %4572 }
0x1498   :  { %v4580_v10 = vadd.f32 1e-05, %v4578_v55  ;;  %v4577_v16 = vmul.f32 0.03125, %v4573_v11  ;;  %v6571_v55 = vld [vmem:[%s10793_s6 + $0x2e0] sm:$0xff]  ;;  %v6573_v11 = vld [vmem:[%s10793_s6 + $0x2f0] sm:$0xff] }
0x149a   :  { %v4579_v17 = vadd.f32 1e-05, %v4577_v16  ;;  %7971 = vrsqrt.f32 %v4580_v10  ;;  %v6702_v10 = vld [vmem:[%s10794_s7 + $0x8f8] sm:$0xff] }
0x149b   :  { %v6734_v16 = vld [vmem:[%s10794_s7 + $0x9f8] sm:$0xff] }
0x149c   :  { %7973 = vrsqrt.f32 %v4579_v17  ;;  %v6686_v17 = vld [vmem:[%s10794_s7 + $0x878] sm:$0xff] }
0x14a7   :  { %v7972_v20 = vpop.eup %7971 }
0x14a8   :  { %v4584_v51 = vmul.f32 %v7972_v20, %v4568_v42  ;;  %v6600_v42 = vld [vmem:[%s10793_s6 + $0x3c8] sm:$0xff]  ;;  %v6718_v20 = vld [vmem:[%s10794_s7 + $0x978] sm:$0xff] }
0x14a9   :  { %v7974_v21 = vpop.eup %7973 }
0x14aa   :  { %v4583_v41 = vmul.f32 %v7974_v21, %v4567_v15  ;;  %v4590_v29 = vmul.f32 %v4588_v37, %v4584_v51  ;;  %v6599_v15 = vld [vmem:[%s10793_s6 + $0x3c0] sm:$0xff]  ;;  %v6701_v21 = vld [vmem:[%s10794_s7 + $0x8f0] sm:$0xff]  ;;  %v6700_v51 = vld [vmem:[%s10794_s7 + $0x8e8] sm:$0xff] }
0x14ac   :  { %v4589_v25 = vmul.f32 %v4588_v37, %v4583_v41  ;;  %v9715_v31 = vadd.f32 %v4594_v56, %v4590_v29  ;;  %v6733_v37 = vld [vmem:[%s10794_s7 + $0x9f0] sm:$0xff]  ;;  %v6731_v29 = vld [vmem:[%s10794_s7 + $0x9e0] sm:$0xff] }
0x14ad   :  { %v6685_v41 = vld [vmem:[%s10794_s7 + $0x870] sm:$0xff] }
0x14ae   :  { %v9691_v6 = vadd.f32 %v4594_v56, %v4589_v25  ;;  %v6732_v56 = vld [vmem:[%s10794_s7 + $0x9e8] sm:$0xff] }
0x14af   :  { %v6684_v25 = vld [vmem:[%s10794_s7 + $0x868] sm:$0xff] }
0x14b0   :  { %6655 = vmatmul.mubr.msk.f32.vlgmr.msra.gmra.mxu0 %vm148_vm1, %v9691_v6  ;;  %6657 = vmatmul.mubr.msk.f32.vlgmr.msra.gmra.mxu1 %vm148_vm1, %v9691_v6 }
0x14b1   :  { %4927 = vmatpush1.msra.mxu0 %v6611_v26  ;;  %5004 = vmatpush1.msra.mxu1 %v6613_v28  ;;  %v6716_v26 = vld [vmem:[%s10794_s7 + $0x968] sm:$0xff]  ;;  %v6699_v28 = vld [vmem:[%s10794_s7 + $0x8e0] sm:$0xff] }
0x14b2   :  { %4928 = vmatprep.subr.mxu0 %v6596_v59  ;;  %5005 = vmatprep.subr.mxu1 %v6598_v61  ;;  %v6683_v59 = vld [vmem:[%s10794_s7 + $0x860] sm:$0xff] }
0x14b3   :  { %4818 = vmatprep.mubr.f32.mxu0 %v7983_v23  ;;  %4895 = vmatprep.mubr.f32.mxu1 %v7983_v23  ;;  %v6715_v61 = vld [vmem:[%s10794_s7 + $0x960] sm:$0xff] }
0x14b4   :  { %4929 = vmatpush1.msra.mxu0 %v6595_v27  ;;  %5006 = vmatpush1.msra.mxu1 %v6597_v30  ;;  %v6698_v27 = vld [vmem:[%s10794_s7 + $0x8d8] sm:$0xff] }
0x14b5   :  { %6656 = vmatmul.mubr.msk.f32.gmra.mxu0 %vm148_vm1, %v9715_v31  ;;  %6658 = vmatmul.mubr.msk.f32.gmra.mxu1 %vm148_vm1, %v9715_v31  ;;  %v6730_v30 = vld [vmem:[%s10794_s7 + $0x9d8] sm:$0xff] }
0x14b6   :  { %4930 = vmatprep.subr.mxu0 %v6580_v32  ;;  %5007 = vmatprep.subr.mxu1 %v6582_v33  ;;  %v6682_v32 = vld [vmem:[%s10794_s7 + $0x858] sm:$0xff] }
0x14b7   :  { %4931 = vmatpush1.msra.mxu0 %v6579_v34  ;;  %5008 = vmatpush1.msra.mxu1 %v6581_v35  ;;  %v6714_v33 = vld [vmem:[%s10794_s7 + $0x958] sm:$0xff]  ;;  %v6697_v34 = vld [vmem:[%s10794_s7 + $0x8d0] sm:$0xff] }
0x14b8   :  { %4932 = vmatprep.subr.mxu0 %v6564_v19  ;;  %5009 = vmatprep.subr.mxu1 %v6566_v18  ;;  %v6729_v35 = vld [vmem:[%s10794_s7 + $0x9d0] sm:$0xff] }
0x14b9   :  { %4933 = vmatpush1.msra.mxu0 %v6563_v36  ;;  %4966 = vmatprep.mubr.f32.mxu0 %v7983_v23  ;;  %v6681_v19 = vld [vmem:[%s10794_s7 + $0x850] sm:$0xff]  ;;  %v6696_v36 = vld [vmem:[%s10794_s7 + $0x8c8] sm:$0xff] }
0x14ba   :  { %5010 = vmatpush1.msra.mxu1 %v6565_v60  ;;  %5043 = vmatprep.mubr.f32.mxu1 %v7983_v23  ;;  %v6713_v18 = vld [vmem:[%s10794_s7 + $0x950] sm:$0xff]  ;;  %v6728_v60 = vld [vmem:[%s10794_s7 + $0x9c8] sm:$0xff] }
0x14bb   :  { %6659 = vmatmul.mubr.msk.f32.vlgmr.msra.gmra.mxu0 %vm148_vm1, %v9691_v6  ;;  %6661 = vmatmul.mubr.msk.f32.vlgmr.msra.gmra.mxu1 %vm148_vm1, %v9691_v6 }
0x14bc   :  { %5080 = vmatprep.subr.mxu0 %v6616_v0  ;;  %5157 = vmatprep.subr.mxu1 %v6618_v38  ;;  %v6680_v0 = vld [vmem:[%s10794_s7 + $0x848] sm:$0xff] }
0x14bd   :  { %5081 = vmatpush1.msra.mxu0 %v6615_v39  ;;  %5158 = vmatpush1.msra.mxu1 %v6617_v9  ;;  %v6712_v38 = vld [vmem:[%s10794_s7 + $0x948] sm:$0xff]  ;;  %v6695_v39 = vld [vmem:[%s10794_s7 + $0x8c0] sm:$0xff] }
0x14be   :  { %5082 = vmatprep.subr.mxu0 %v6600_v42  ;;  %5159 = vmatprep.subr.mxu1 %v6602_v49  ;;  %v6727_v9 = vld [vmem:[%s10794_s7 + $0x9c0] sm:$0xff] }
0x14bf   :  { %4972 = vmatprep.mubr.f32.mxu0 %v7983_v23  ;;  %5049 = vmatprep.mubr.f32.mxu1 %v7983_v23  ;;  %v6679_v42 = vld [vmem:[%s10794_s7 + $0x840] sm:$0xff] }
0x14c0   :  { %5083 = vmatpush1.msra.mxu0 %v6599_v15  ;;  %5160 = vmatpush1.msra.mxu1 %v6601_v52  ;;  %v6711_v49 = vld [vmem:[%s10794_s7 + $0x940] sm:$0xff]  ;;  %v6694_v15 = vld [vmem:[%s10794_s7 + $0x8b8] sm:$0xff] }
0x14c1   :  { %6660 = vmatmul.mubr.msk.f32.gmra.mxu0 %vm148_vm1, %v9715_v31  ;;  %6662 = vmatmul.mubr.msk.f32.gmra.mxu1 %vm148_vm1, %v9715_v31  ;;  %v6726_v52 = vld [vmem:[%s10794_s7 + $0x9b8] sm:$0xff] }
0x14c2   :  { %5084 = vmatprep.subr.mxu0 %v6584_v53  ;;  %5161 = vmatprep.subr.mxu1 %v6586_v54  ;;  %v6678_v53 = vld [vmem:[%s10794_s7 + $0x838] sm:$0xff] }
0x14c3   :  { %5085 = vmatpush1.msra.mxu0 %v6583_v24  ;;  %5162 = vmatpush1.msra.mxu1 %v6585_v22  ;;  %v6710_v54 = vld [vmem:[%s10794_s7 + $0x938] sm:$0xff]  ;;  %v6693_v24 = vld [vmem:[%s10794_s7 + $0x8b0] sm:$0xff] }
0x14c4   :  { %5086 = vmatprep.subr.mxu0 %v6568_v44  ;;  %5163 = vmatprep.subr.mxu1 %v6570_v57  ;;  %v6725_v22 = vld [vmem:[%s10794_s7 + $0x9b0] sm:$0xff] }
0x14c5   :  { %5087 = vmatpush1.msra.mxu0 %v6567_v4  ;;  %5120 = vmatprep.mubr.f32.mxu0 %v7983_v23  ;;  %v6677_v44 = vld [vmem:[%s10794_s7 + $0x830] sm:$0xff]  ;;  %v6692_v4 = vld [vmem:[%s10794_s7 + $0x8a8] sm:$0xff] }
0x14c6   :  { %5164 = vmatpush1.msra.mxu1 %v6569_v40  ;;  %5197 = vmatprep.mubr.f32.mxu1 %v7983_v23  ;;  %v6709_v57 = vld [vmem:[%s10794_s7 + $0x930] sm:$0xff]  ;;  %v6724_v40 = vld [vmem:[%s10794_s7 + $0x9a8] sm:$0xff] }
0x14c7   :  { %6663 = vmatmul.mubr.msk.f32.vlgmr.msra.gmra.mxu0 %vm148_vm1, %v9691_v6  ;;  %6665 = vmatmul.mubr.msk.f32.vlgmr.msra.gmra.mxu1 %vm148_vm1, %v9691_v6 }
0x14c8   :  { %5234 = vmatprep.subr.mxu0 %v6620_v14  ;;  %5311 = vmatprep.subr.mxu1 %v6622_v58  ;;  %v6676_v14 = vld [vmem:[%s10794_s7 + $0x828] sm:$0xff] }
0x14c9   :  { %5235 = vmatpush1.msra.mxu0 %v6619_v43  ;;  %5312 = vmatpush1.msra.mxu1 %v6621_v45  ;;  %v6708_v58 = vld [vmem:[%s10794_s7 + $0x928] sm:$0xff]  ;;  %v6691_v43 = vld [vmem:[%s10794_s7 + $0x8a0] sm:$0xff] }
0x14ca   :  { %5236 = vmatprep.subr.mxu0 %v6604_v62  ;;  %5313 = vmatprep.subr.mxu1 %v6606_v63  ;;  %v6723_v45 = vld [vmem:[%s10794_s7 + $0x9a0] sm:$0xff] }
0x14cb   :  { %5126 = vmatprep.mubr.f32.mxu0 %v7983_v23  ;;  %5203 = vmatprep.mubr.f32.mxu1 %v7983_v23  ;;  %v6675_v62 = vld [vmem:[%s10794_s7 + $0x820] sm:$0xff] }
0x14cc   :  { %5237 = vmatpush1.msra.mxu0 %v6603_v1  ;;  %5314 = vmatpush1.msra.mxu1 %v6605_v2  ;;  %v6707_v63 = vld [vmem:[%s10794_s7 + $0x920] sm:$0xff]  ;;  %v6690_v1 = vld [vmem:[%s10794_s7 + $0x898] sm:$0xff] }
0x14cd   :  { %6664 = vmatmul.mubr.msk.f32.gmra.mxu0 %vm148_vm1, %v9715_v31  ;;  %6666 = vmatmul.mubr.msk.f32.gmra.mxu1 %vm148_vm1, %v9715_v31  ;;  %v6722_v2 = vld [vmem:[%s10794_s7 + $0x998] sm:$0xff] }
0x14ce   :  { %5238 = vmatprep.subr.mxu0 %v6588_v3  ;;  %5315 = vmatprep.subr.mxu1 %v6590_v5  ;;  %v6674_v3 = vld [vmem:[%s10794_s7 + $0x818] sm:$0xff] }
0x14cf   :  { %5239 = vmatpush1.msra.mxu0 %v6587_v50  ;;  %5316 = vmatpush1.msra.mxu1 %v6589_v46  ;;  %v6706_v5 = vld [vmem:[%s10794_s7 + $0x918] sm:$0xff]  ;;  %v6689_v50 = vld [vmem:[%s10794_s7 + $0x890] sm:$0xff] }
0x14d0   :  { %5240 = vmatprep.subr.mxu0 %v6572_v47  ;;  %5317 = vmatprep.subr.mxu1 %v6574_v7  ;;  %v6721_v46 = vld [vmem:[%s10794_s7 + $0x990] sm:$0xff] }
0x14d1   :  { %5241 = vmatpush1.msra.mxu0 %v6571_v55  ;;  %5274 = vmatprep.mubr.f32.mxu0 %v7983_v23  ;;  %v6673_v47 = vld [vmem:[%s10794_s7 + $0x810] sm:$0xff]  ;;  %v6688_v55 = vld [vmem:[%s10794_s7 + $0x888] sm:$0xff] }
0x14d2   :  { %5318 = vmatpush1.msra.mxu1 %v6573_v11  ;;  %5351 = vmatprep.mubr.f32.mxu1 %v7983_v23  ;;  %v6705_v7 = vld [vmem:[%s10794_s7 + $0x910] sm:$0xff]  ;;  %v6720_v11 = vld [vmem:[%s10794_s7 + $0x988] sm:$0xff] }
0x14d3   :  { %6667 = vmatmul.mubr.msk.f32.vlgmr.msra.gmra.mxu0 %vm148_vm1, %v9691_v6  ;;  %6669 = vmatmul.mubr.msk.f32.vlgmr.msra.gmra.mxu1 %vm148_vm1, %v9691_v6 }
0x14d4   :  { %5280 = vmatprep.mubr.f32.mxu0 %v7983_v23  ;;  %5357 = vmatprep.mubr.f32.mxu1 %v7983_v23  ;;  %v6717_v23 = vld [vmem:[%s10794_s7 + $0x970] sm:$0xff] }
0x14d5   :  { %7359 = vmatprep.subr.mxu0 %v6702_v10  ;;  %7397 = vmatprep.subr.mxu1 %v6734_v16  ;;  %v6672_v10 = vld [vmem:[%s10794_s7 + $0x808] sm:$0xff] }
0x14d6   :  { %7360 = vmatpush3.msra.mxu0 %v6686_v17  ;;  %7398 = vmatpush3.msra.mxu1 %v6718_v20  ;;  %v6704_v16 = vld [vmem:[%s10794_s7 + $0x908] sm:$0xff]  ;;  %v6687_v17 = vld [vmem:[%s10794_s7 + $0x880] sm:$0xff] }
0x14d7   :  { %6668 = vmatmul.mubr.msk.f32.gmra.mxu0 %vm148_vm1, %v9715_v31  ;;  %6670 = vmatmul.mubr.msk.f32.gmra.mxu1 %vm148_vm1, %v9715_v31  ;;  %v6719_v20 = vld [vmem:[%s10794_s7 + $0x980] sm:$0xff] }
0x14d8   :  { %7361 = vmatprep.subr.mxu0 %v6701_v21  ;;  %7399 = vmatprep.subr.mxu1 %v6733_v37  ;;  %v6671_v21 = vld [vmem:[%s10794_s7 + $0x800] sm:$0xff] }
0x14d9   :  { %7362 = vmatpush3.msra.mxu0 %v6685_v41  ;;  %7400 = vmatpush3.msra.mxu1 %v6717_v23  ;;  %v6703_v37 = vld [vmem:[%s10794_s7 + $0x900] sm:$0xff]  ;;  %v6766_v41 = vld [vmem:[%s10794_s7 + $0xaf8] sm:$0xff] }
0x14da   :  { %7363 = vmatprep.subr.mxu0 %v6700_v51  ;;  %7401 = vmatprep.subr.mxu1 %v6732_v56  ;;  %v6798_v23 = vld [vmem:[%s10794_s7 + $0xbf8] sm:$0xff]  ;;  %v6639_v51 = vld [vmem:[%s10793_s6 + $0x480] ss:$0 sm:$0xff]  ;;  %v6641_v56 = vld [vmem:[%s10793_s6 + $0x490] ss:$0 sm:$0xff] }
0x14db   :  { %7364 = vmatpush3.msra.mxu0 %v6684_v25  ;;  %7402 = vmatpush3.msra.mxu1 %v6716_v26 }
0x14dc   :  { %7365 = vmatprep.subr.mxu0 %v6699_v28  ;;  %7403 = vmatprep.subr.mxu1 %v6731_v29  ;;  %v6640_v28 = vld [vmem:[%s10793_s6 + $0x488] ss:$0 sm:$0xff]  ;;  %v6642_v29 = vld [vmem:[%s10793_s6 + $0x498] ss:$0 sm:$0xff] }
0x14dd   :  { %7366 = vmatpush3.msra.mxu0 %v6683_v59  ;;  %7404 = vmatpush3.msra.mxu1 %v6715_v61 }
0x14de   :  { %7367 = vmatprep.subr.mxu0 %v6698_v27  ;;  %7405 = vmatprep.subr.mxu1 %v6730_v30 }
0x14df   :  { %7368 = vmatpush3.msra.mxu0 %v6682_v32  ;;  %7406 = vmatpush3.msra.mxu1 %v6714_v33 }
0x14e0   :  { %7369 = vmatprep.subr.mxu0 %v6697_v34  ;;  %7407 = vmatprep.subr.mxu1 %v6729_v35 }
0x14e1   :  { %7370 = vmatpush3.msra.mxu0 %v6681_v19  ;;  %7408 = vmatpush3.msra.mxu1 %v6713_v18 }
0x14e2   :  { %7371 = vmatprep.subr.mxu0 %v6696_v36  ;;  %7409 = vmatprep.subr.mxu1 %v6728_v60 }
0x14e3   :  { %7372 = vmatpush3.msra.mxu0 %v6680_v0  ;;  %7410 = vmatpush3.msra.mxu1 %v6712_v38  ;;  %v6750_v0 = vld [vmem:[%s10794_s7 + $0xa78] sm:$0xff] }
0x14e4   :  { %7373 = vmatprep.subr.mxu0 %v6695_v39  ;;  %7411 = vmatprep.subr.mxu1 %v6727_v9  ;;  %v6782_v38 = vld [vmem:[%s10794_s7 + $0xb78] sm:$0xff] }
0x14e5   :  { %7374 = vmatpush3.msra.mxu0 %v6679_v42  ;;  %7412 = vmatpush3.msra.mxu1 %v6711_v49  ;;  %v6765_v49 = vld [vmem:[%s10794_s7 + $0xaf0] sm:$0xff] }
0x14e6   :  { %7375 = vmatprep.subr.mxu0 %v6694_v15  ;;  %7413 = vmatprep.subr.mxu1 %v6726_v52  ;;  %v6797_v15 = vld [vmem:[%s10794_s7 + $0xbf0] sm:$0xff] }
0x14e7   :  { %7376 = vmatpush3.msra.mxu0 %v6678_v53  ;;  %7414 = vmatpush3.msra.mxu1 %v6710_v54 }
0x14e8   :  { %7377 = vmatprep.subr.mxu0 %v6693_v24  ;;  %7415 = vmatprep.subr.mxu1 %v6725_v22  ;;  %v6749_v24 = vld [vmem:[%s10794_s7 + $0xa70] sm:$0xff] }
0x14e9   :  { %7378 = vmatpush3.msra.mxu0 %v6677_v44  ;;  %7416 = vmatpush3.msra.mxu1 %v6709_v57  ;;  %v6781_v22 = vld [vmem:[%s10794_s7 + $0xb70] sm:$0xff] }
0x14ea   :  { %7379 = vmatprep.subr.mxu0 %v6692_v4  ;;  %7417 = vmatprep.subr.mxu1 %v6724_v40  ;;  %v6764_v4 = vld [vmem:[%s10794_s7 + $0xae8] sm:$0xff] }
0x14eb   :  { %7380 = vmatpush3.msra.mxu0 %v6676_v14  ;;  %7418 = vmatpush3.msra.mxu1 %v6708_v58  ;;  %v6796_v40 = vld [vmem:[%s10794_s7 + $0xbe8] sm:$0xff] }
0x14ec   :  { %7381 = vmatprep.subr.mxu0 %v6691_v43  ;;  %7419 = vmatprep.subr.mxu1 %v6723_v45  ;;  %v10120_v43 = vld [vmem:[%s10793_s6 + $0x4a8] ss:$0 sm:$0xff]  ;;  %v10125_v45 = vld [vmem:[%s10793_s6 + $0x4b8] ss:$0 sm:$0xff] }
0x14ed   :  { %7382 = vmatpush3.msra.mxu0 %v6675_v62  ;;  %7420 = vmatpush3.msra.mxu1 %v6707_v63 }
0x14ee   :  { %7383 = vmatprep.subr.mxu0 %v6690_v1  ;;  %7421 = vmatprep.subr.mxu1 %v6722_v2  ;;  %v6748_v1 = vld [vmem:[%s10794_s7 + $0xa68] sm:$0xff] }
0x14ef   :  { %7384 = vmatpush3.msra.mxu0 %v6674_v3  ;;  %7422 = vmatpush3.msra.mxu1 %v6706_v5  ;;  %v6780_v2 = vld [vmem:[%s10794_s7 + $0xb68] sm:$0xff] }
0x14f0   :  { %7385 = vmatprep.subr.mxu0 %v6689_v50  ;;  %7423 = vmatprep.subr.mxu1 %v6721_v46  ;;  %v6763_v50 = vld [vmem:[%s10794_s7 + $0xae0] sm:$0xff] }
0x14f1   :  { %7386 = vmatpush3.msra.mxu0 %v6673_v47  ;;  %7424 = vmatpush3.msra.mxu1 %v6705_v7  ;;  %v6795_v46 = vld [vmem:[%s10794_s7 + $0xbe0] sm:$0xff] }
0x14f2   :  { %7387 = vmatprep.subr.mxu0 %v6688_v55  ;;  %7425 = vmatprep.subr.mxu1 %v6720_v11  ;;  %v6747_v55 = vld [vmem:[%s10794_s7 + $0xa60] sm:$0xff] }
0x14f3   :  { %7388 = vmatpush3.msra.mxu0 %v6672_v10  ;;  %7426 = vmatpush3.msra.mxu1 %v6704_v16  ;;  %v6779_v11 = vld [vmem:[%s10794_s7 + $0xb60] sm:$0xff]  ;;  %v6762_v10 = vld [vmem:[%s10794_s7 + $0xad8] sm:$0xff] }
0x14f4   :  { %7389 = vmatprep.subr.mxu0 %v6687_v17  ;;  %7427 = vmatprep.subr.mxu1 %v6719_v20  ;;  %v6794_v20 = vld [vmem:[%s10794_s7 + $0xbd8] sm:$0xff] }
0x14f5   :  { %7390 = vmatpush3.msra.mxu0 %v6671_v21  ;;  %7428 = vmatpush3.msra.mxu1 %v6703_v37  ;;  %v6746_v21 = vld [vmem:[%s10794_s7 + $0xa58] sm:$0xff] }
0x14f6   :  { %7435 = vmatprep.subr.mxu0 %v6766_v41  ;;  %7473 = vmatprep.subr.mxu1 %v6798_v23  ;;  %v6778_v37 = vld [vmem:[%s10794_s7 + $0xb58] sm:$0xff]  ;;  %v6761_v41 = vld [vmem:[%s10794_s7 + $0xad0] sm:$0xff] }
0x14f7   :  { %v6793_v23 = vld [vmem:[%s10794_s7 + $0xbd0] sm:$0xff] }
0x1570   :  { %v4814_v25 = vpop.f32.mrf.mxu0  ;;  %v4891_v26 = vpop.f32.mrf.mxu1 }
0x1571   :  { %v4815_v59 = vadd.f32 %v6639_v51, %v4814_v25  ;;  %v4892_v61 = vadd.f32 %v6641_v56, %v4891_v26  ;;  %v6760_v25 = vld [vmem:[%s10794_s7 + $0xac8] sm:$0xff] }
0x1572   :  { %v4816_v27 = vpop.f32.mrf.mxu0  ;;  %v4893_v30 = vpop.f32.mrf.mxu1  ;;  %v6792_v26 = vld [vmem:[%s10794_s7 + $0xbc8] sm:$0xff] }
0x1573   :  { %v4817_v32 = vadd.f32 %v6640_v28, %v4816_v27  ;;  %v4894_v33 = vadd.f32 %v6642_v29, %v4893_v30  ;;  %v5364_v36 = vmax.f32 %v4815_v59, 0.0  ;;  %v5366_v60 = vmax.f32 %v4892_v61, 0.0  ;;  %v6759_v59 = vld [vmem:[%s10794_s7 + $0xac0] sm:$0xff] }
0x1574   :  { %v6791_v61 = vld [vmem:[%s10794_s7 + $0xbc0] sm:$0xff] }
0x1575   :  { %v5365_v34 = vmax.f32 %v4817_v32, 0.0  ;;  %v5367_v35 = vmax.f32 %v4894_v33, 0.0  ;;  %v4820_v19 = vpop.f32.mrf.mxu0  ;;  %v4897_v18 = vpop.f32.mrf.mxu1  ;;  %v6743_v27 = vld [vmem:[%s10794_s7 + $0xa40] sm:$0xff]  ;;  %v6758_v32 = vld [vmem:[%s10794_s7 + $0xab8] sm:$0xff] }
0x1576   :  { %v4821_v39 = vadd.f32 %v6639_v51, %v4820_v19  ;;  %v4898_v52 = vadd.f32 %v6641_v56, %v4897_v18  ;;  %v6745_v51 = vld [vmem:[%s10794_s7 + $0xa50] sm:$0xff]  ;;  %v6775_v30 = vld [vmem:[%s10794_s7 + $0xb40] sm:$0xff]  ;;  %v6790_v33 = vld [vmem:[%s10794_s7 + $0xbb8] sm:$0xff] }
0x1577   :  { %v4822_v9 = vpop.f32.mrf.mxu0  ;;  %v4899_v42 = vpop.f32.mrf.mxu1  ;;  %5721 = vmatprep.mubr.f32.mxu0 %v5365_v34  ;;  %5796 = vmatprep.mubr.f32.mxu1 %v5367_v35  ;;  %v6777_v56 = vld [vmem:[%s10794_s7 + $0xb50] sm:$0xff]  ;;  %v6742_v34 = vld [vmem:[%s10794_s7 + $0xa38] sm:$0xff] }
0x1578   :  { %v4823_v53 = vadd.f32 %v6640_v28, %v4822_v9  ;;  %v4900_v54 = vadd.f32 %v6642_v29, %v4899_v42  ;;  %5722 = vmatmul.mubr.f32.vlgmr.msra.gmra.mxu0 %v5364_v36  ;;  %5797 = vmatmul.mubr.f32.vlgmr.msra.gmra.mxu1 %v5366_v60  ;;  %v5380_v62 = vmax.f32 %v4821_v39, 0.0  ;;  %v5382_v63 = vmax.f32 %v4898_v52, 0.0  ;;  %v6744_v28 = vld [vmem:[%s10794_s7 + $0xa48] sm:$0xff]  ;;  %v6774_v35 = vld [vmem:[%s10794_s7 + $0xb38] sm:$0xff]  ;;  %v6757_v19 = vld [vmem:[%s10794_s7 + $0xab0] sm:$0xff] }
0x1579   :  { %7436 = vmatpush3.msra.mxu0 %v6750_v0  ;;  %7474 = vmatpush3.msra.mxu1 %v6782_v38  ;;  %v6776_v29 = vld [vmem:[%s10794_s7 + $0xb48] sm:$0xff]  ;;  %v6789_v18 = vld [vmem:[%s10794_s7 + $0xbb0] sm:$0xff] }
0x157a   :  { %v5381_v44 = vmax.f32 %v4823_v53, 0.0  ;;  %v5383_v57 = vmax.f32 %v4900_v54, 0.0  ;;  %7437 = vmatprep.subr.mxu0 %v6765_v49  ;;  %7475 = vmatprep.subr.mxu1 %v6797_v15  ;;  %v6741_v36 = vld [vmem:[%s10794_s7 + $0xa30] sm:$0xff]  ;;  %v6756_v0 = vld [vmem:[%s10794_s7 + $0xaa8] sm:$0xff]  ;;  %v6755_v49 = vld [vmem:[%s10794_s7 + $0xaa0] sm:$0xff] }
0x157b   :  { %v10113_v14 = vpop.f32.mrf.mxu0  ;;  %v10115_v58 = vpop.f32.mrf.mxu1  ;;  %7438 = vmatpush3.msra.mxu0 %v6749_v24  ;;  %7476 = vmatpush3.msra.mxu1 %v6781_v22  ;;  %v6773_v60 = vld [vmem:[%s10794_s7 + $0xb30] sm:$0xff]  ;;  %v6788_v38 = vld [vmem:[%s10794_s7 + $0xba8] sm:$0xff]  ;;  %v6787_v15 = vld [vmem:[%s10794_s7 + $0xba0] sm:$0xff] }
0x157c   :  { %5726 = vmatprep.mubr.f32.mxu0 %v5381_v44  ;;  %5801 = vmatprep.mubr.f32.mxu1 %v5383_v57  ;;  %v6740_v39 = vld [vmem:[%s10794_s7 + $0xa28] sm:$0xff]  ;;  %v6739_v53 = vld [vmem:[%s10794_s7 + $0xa20] sm:$0xff]  ;;  %v6754_v24 = vld [vmem:[%s10794_s7 + $0xa98] sm:$0xff] }
0x157d   :  { %v4970_v3 = vpop.f32.mrf.mxu0  ;;  %v5047_v5 = vpop.f32.mrf.mxu1  ;;  %7439 = vmatprep.subr.mxu0 %v6764_v4  ;;  %7477 = vmatprep.subr.mxu1 %v6796_v40  ;;  %v6772_v9 = vld [vmem:[%s10794_s7 + $0xb28] sm:$0xff]  ;;  %v6771_v54 = vld [vmem:[%s10794_s7 + $0xb20] sm:$0xff]  ;;  %v6786_v22 = vld [vmem:[%s10794_s7 + $0xb98] sm:$0xff] }
0x157e   :  { %v4971_v47 = vadd.f32 %v10120_v43, %v4970_v3  ;;  %v5048_v7 = vadd.f32 %v10125_v45, %v5047_v5  ;;  %5727 = vmatmul.mubr.f32.gmra.mxu0 %v5380_v62  ;;  %5802 = vmatmul.mubr.f32.gmra.mxu1 %v5382_v63  ;;  %v6643_v44 = vld [vmem:[%s10793_s6 + $0x4a0] ss:$0 sm:$0xff]  ;;  %v6738_v57 = vld [vmem:[%s10794_s7 + $0xa18] sm:$0xff]  ;;  %v6645_v40 = vld [vmem:[%s10793_s6 + $0x4b0] ss:$0 sm:$0xff] }
0x157f   :  { %7440 = vmatpush3.msra.mxu0 %v6748_v1  ;;  %7478 = vmatpush3.msra.mxu1 %v6780_v2  ;;  %v6770_v4 = vld [vmem:[%s10794_s7 + $0xb18] sm:$0xff]  ;;  %v6753_v63 = vld [vmem:[%s10794_s7 + $0xa90] sm:$0xff] }
0x1580   :  { %v5369_v16 = vmax.f32 %v4971_v47, 0.0  ;;  %v5371_v17 = vmax.f32 %v5048_v7, 0.0  ;;  %7441 = vmatprep.subr.mxu0 %v6763_v50  ;;  %7479 = vmatprep.subr.mxu1 %v6795_v46  ;;  %v6785_v1 = vld [vmem:[%s10794_s7 + $0xb90] sm:$0xff]  ;;  %v6752_v50 = vld [vmem:[%s10794_s7 + $0xa88] sm:$0xff]  ;;  %v4969_v47 = vadd.f32 %v6643_v44, %v10113_v14  ;;  %v5046_v7 = vadd.f32 %v6645_v40, %v10115_v58  ;;  %v6751_v14 = vld [vmem:[%s10794_s7 + $0xa80] sm:$0xff] }
0x1581   :  { %7442 = vmatpush3.msra.mxu0 %v6747_v55  ;;  %7480 = vmatpush3.msra.mxu1 %v6779_v11  ;;  %v10231_v42 = vpop.f32.mrf.mxu0  ;;  %v5051_v52 = vpop.f32.mrf.mxu1  ;;  %v6737_v3 = vld [vmem:[%s10794_s7 + $0xa10] sm:$0xff]  ;;  %v6784_v46 = vld [vmem:[%s10794_s7 + $0xb88] sm:$0xff]  ;;  %v6783_v58 = vld [vmem:[%s10794_s7 + $0xb80] sm:$0xff] }
0x1582   :  { %7443 = vmatprep.subr.mxu0 %v6762_v10  ;;  %5871 = vmatprep.mubr.f32.mxu0 %v5369_v16  ;;  %v6769_v5 = vld [vmem:[%s10794_s7 + $0xb10] sm:$0xff]  ;;  %v6736_v55 = vld [vmem:[%s10794_s7 + $0xa08] sm:$0xff] }
0x1583   :  { %7481 = vmatprep.subr.mxu1 %v6794_v20  ;;  %5946 = vmatprep.mubr.f32.mxu1 %v5371_v17  ;;  %v4976_v62 = vpop.f32.mrf.mxu0  ;;  %v5053_v2 = vpop.f32.mrf.mxu1  ;;  %v6768_v11 = vld [vmem:[%s10794_s7 + $0xb08] sm:$0xff] }
0x1584   :  { %7444 = vmatpush3.msra.mxu0 %v6746_v21  ;;  %7482 = vmatpush3.msra.mxu1 %v6778_v37  ;;  %v4977_v16 = vadd.f32 %v10120_v43, %v4976_v62  ;;  %v5054_v17 = vadd.f32 %v10125_v45, %v5053_v2  ;;  %v6735_v21 = vld [vmem:[%s10794_s7 + $0xa00] sm:$0xff]  ;;  %v6830_v43 = vld [vmem:[%s10794_s7 + $0xcf8] sm:$0xff]  ;;  %v6809_v62 = vld [vmem:[%s10794_s7 + $0xc50] sm:$0xff] }
0x1585   :  { %7445 = vmatprep.subr.mxu0 %v6761_v41  ;;  %7483 = vmatprep.subr.mxu1 %v6793_v23  ;;  %v6767_v37 = vld [vmem:[%s10794_s7 + $0xb00] sm:$0xff]  ;;  %v5368_v41 = vmax.f32 %v4969_v47, 0.0  ;;  %v5370_v23 = vmax.f32 %v5046_v7, 0.0  ;;  %v6862_v45 = vld [vmem:[%s10794_s7 + $0xdf8] sm:$0xff]  ;;  %v6856_v2 = vld [vmem:[%s10794_s7 + $0xdc8] sm:$0xff] }
0x1586   :  { %7446 = vmatpush3.msra.mxu0 %v6745_v51  ;;  %7484 = vmatpush3.msra.mxu1 %v6777_v56  ;;  %v10316_v51 = vld [vmem:[%s10793_s6 + $0x4c8] ss:$0 sm:$0xff]  ;;  %v6807_v47 = vld [vmem:[%s10794_s7 + $0xc40] sm:$0xff] }
0x1587   :  { %7447 = vmatprep.subr.mxu0 %v6760_v25  ;;  %7485 = vmatprep.subr.mxu1 %v6792_v26  ;;  %v10289_v10 = vpop.f32.mrf.mxu0  ;;  %v10299_v20 = vpop.f32.mrf.mxu1  ;;  %v4975_v25 = vadd.f32 %v6643_v44, %v10231_v42  ;;  %v5052_v26 = vadd.f32 %v6645_v40, %v5051_v52  ;;  %v6844_v42 = vld [vmem:[%s10794_s7 + $0xd68] sm:$0xff]  ;;  %v6859_v52 = vld [vmem:[%s10794_s7 + $0xde0] sm:$0xff]  ;;  %v6810_v44 = vld [vmem:[%s10794_s7 + $0xc58] sm:$0xff] }
0x1588   :  { %7448 = vmatpush3.msra.mxu0 %v6744_v28  ;;  %7486 = vmatpush3.msra.mxu1 %v6776_v29  ;;  %v5385_v28 = vmax.f32 %v4977_v16, 0.0  ;;  %v5387_v29 = vmax.f32 %v5054_v17, 0.0  ;;  %v6857_v40 = vld [vmem:[%s10794_s7 + $0xdd0] sm:$0xff]  ;;  %v6839_v7 = vld [vmem:[%s10794_s7 + $0xd40] sm:$0xff] }
0x1589   :  { %7449 = vmatprep.subr.mxu0 %v6759_v59  ;;  %7487 = vmatprep.subr.mxu1 %v6791_v61  ;;  %v5124_v56 = vpop.f32.mrf.mxu0  ;;  %v10322_v59 = vld [vmem:[%s10793_s6 + $0x4d8] ss:$0 sm:$0xff]  ;;  %v5201_v61 = vpop.f32.mrf.mxu1  ;;  %v6821_v16 = vld [vmem:[%s10794_s7 + $0xcb0] sm:$0xff] }
0x158a   :  { %7450 = vmatpush3.msra.mxu0 %v6743_v27  ;;  %7488 = vmatpush3.msra.mxu1 %v6775_v30  ;;  %v6814_v27 = vld [vmem:[%s10794_s7 + $0xc78] sm:$0xff]  ;;  %v6853_v17 = vld [vmem:[%s10794_s7 + $0xdb0] sm:$0xff] }
0x158b   :  { %7451 = vmatprep.subr.mxu0 %v6758_v32  ;;  %7489 = vmatprep.subr.mxu1 %v6790_v33  ;;  %v6846_v30 = vld [vmem:[%s10794_s7 + $0xd78] sm:$0xff]  ;;  %v6829_v32 = vld [vmem:[%s10794_s7 + $0xcf0] sm:$0xff] }
0x158c   :  { %7452 = vmatpush3.msra.mxu0 %v6742_v34  ;;  %7490 = vmatpush3.msra.mxu1 %v6774_v35  ;;  %v6861_v33 = vld [vmem:[%s10794_s7 + $0xdf0] sm:$0xff]  ;;  %v5125_v34 = vadd.f32 %v10316_v51, %v5124_v56 }
0x158d   :  { %7453 = vmatprep.subr.mxu0 %v6757_v19  ;;  %7491 = vmatprep.subr.mxu1 %v6789_v18  ;;  %v6813_v35 = vld [vmem:[%s10794_s7 + $0xc70] sm:$0xff]  ;;  %v5202_v18 = vadd.f32 %v10322_v59, %v5201_v61  ;;  %v10452_v56 = vpop.f32.mrf.mxu0  ;;  %v6835_v61 = vld [vmem:[%s10794_s7 + $0xd20] sm:$0xff] }
0x158e   :  { %7454 = vmatpush3.msra.mxu0 %v6741_v36  ;;  %7492 = vmatpush3.msra.mxu1 %v6773_v60  ;;  %v6845_v19 = vld [vmem:[%s10794_s7 + $0xd70] sm:$0xff]  ;;  %v5384_v36 = vmax.f32 %v4975_v25, 0.0  ;;  %v5386_v60 = vmax.f32 %v5052_v26, 0.0  ;;  %v6819_v25 = vld [vmem:[%s10794_s7 + $0xca0] sm:$0xff] }
0x158f   :  { %7455 = vmatprep.subr.mxu0 %v6756_v0  ;;  %7493 = vmatprep.subr.mxu1 %v6788_v38  ;;  %v6828_v0 = vld [vmem:[%s10794_s7 + $0xce8] sm:$0xff]  ;;  %v6851_v26 = vld [vmem:[%s10794_s7 + $0xda0] sm:$0xff] }
0x1590   :  { %7456 = vmatpush3.msra.mxu0 %v6740_v39  ;;  %7494 = vmatpush3.msra.mxu1 %v6772_v9  ;;  %v6860_v38 = vld [vmem:[%s10794_s7 + $0xde8] sm:$0xff]  ;;  %v5373_v9 = vmax.f32 %v5125_v34, 0.0  ;;  %v6834_v34 = vld [vmem:[%s10794_s7 + $0xd18] sm:$0xff] }
0x1591   :  { %7457 = vmatprep.subr.mxu0 %v6755_v49  ;;  %7495 = vmatprep.subr.mxu1 %v6787_v15  ;;  %v6812_v39 = vld [vmem:[%s10794_s7 + $0xc68] sm:$0xff]  ;;  %v5375_v49 = vmax.f32 %v5202_v18, 0.0  ;;  %v6827_v15 = vld [vmem:[%s10794_s7 + $0xce0] sm:$0xff]  ;;  %v6817_v18 = vld [vmem:[%s10794_s7 + $0xc90] sm:$0xff] }
0x1592   :  { %7458 = vmatpush3.msra.mxu0 %v6739_v53  ;;  %7496 = vmatpush3.msra.mxu1 %v6771_v54  ;;  %v6811_v53 = vld [vmem:[%s10794_s7 + $0xc60] sm:$0xff] }
0x1593   :  { %7459 = vmatprep.subr.mxu0 %v6754_v24  ;;  %7497 = vmatprep.subr.mxu1 %v6786_v22  ;;  %v6843_v54 = vld [vmem:[%s10794_s7 + $0xd60] sm:$0xff]  ;;  %v6826_v24 = vld [vmem:[%s10794_s7 + $0xcd8] sm:$0xff] }
0x1594   :  { %7460 = vmatpush3.msra.mxu0 %v6738_v57  ;;  %7498 = vmatpush3.msra.mxu1 %v6770_v4  ;;  %v6858_v22 = vld [vmem:[%s10794_s7 + $0xdd8] sm:$0xff]  ;;  %v6825_v4 = vld [vmem:[%s10794_s7 + $0xcd0] sm:$0xff] }
0x1595   :  { %7461 = vmatprep.subr.mxu0 %v6753_v63  ;;  %7499 = vmatprep.subr.mxu1 %v6785_v1  ;;  %v6842_v57 = vld [vmem:[%s10794_s7 + $0xd58] sm:$0xff]  ;;  %v6841_v63 = vld [vmem:[%s10794_s7 + $0xd50] sm:$0xff]  ;;  %v6824_v1 = vld [vmem:[%s10794_s7 + $0xcc8] sm:$0xff] }
0x1596   :  { %7462 = vmatpush3.msra.mxu0 %v6737_v3  ;;  %7500 = vmatpush3.msra.mxu1 %v6769_v5  ;;  %v6808_v3 = vld [vmem:[%s10794_s7 + $0xc48] sm:$0xff] }
0x1597   :  { %7463 = vmatprep.subr.mxu0 %v6752_v50  ;;  %7501 = vmatprep.subr.mxu1 %v6784_v46  ;;  %v6840_v5 = vld [vmem:[%s10794_s7 + $0xd48] sm:$0xff]  ;;  %v6823_v50 = vld [vmem:[%s10794_s7 + $0xcc0] sm:$0xff] }
0x1598   :  { %7464 = vmatpush3.msra.mxu0 %v6736_v55  ;;  %7502 = vmatpush3.msra.mxu1 %v6768_v11  ;;  %v6855_v46 = vld [vmem:[%s10794_s7 + $0xdc0] sm:$0xff]  ;;  %v6822_v55 = vld [vmem:[%s10794_s7 + $0xcb8] sm:$0xff] }
0x1599   :  { %7465 = vmatprep.subr.mxu0 %v6751_v14  ;;  %7503 = vmatprep.subr.mxu1 %v6783_v58  ;;  %v6854_v11 = vld [vmem:[%s10794_s7 + $0xdb8] sm:$0xff] }
0x159a   :  { %7466 = vmatpush3.msra.mxu0 %v6735_v21  ;;  %7504 = vmatpush3.msra.mxu1 %v6767_v37  ;;  %v6806_v14 = vld [vmem:[%s10794_s7 + $0xc38] sm:$0xff]  ;;  %v6805_v21 = vld [vmem:[%s10794_s7 + $0xc30] sm:$0xff] }
0x159b   :  { %5872 = vmatmul.mubr.f32.vlgmr.msra.gmra.mxu0 %v5368_v41  ;;  %5947 = vmatmul.mubr.f32.vlgmr.msra.gmra.mxu1 %v5370_v23  ;;  %v6838_v58 = vld [vmem:[%s10794_s7 + $0xd38] sm:$0xff]  ;;  %v6837_v37 = vld [vmem:[%s10794_s7 + $0xd30] sm:$0xff]  ;;  %v6820_v41 = vld [vmem:[%s10794_s7 + $0xca8] sm:$0xff] }
0x159c   :  { %7511 = vmatprep.subr.mxu0 %v6830_v43  ;;  %7549 = vmatprep.subr.mxu1 %v6862_v45  ;;  %v6852_v23 = vld [vmem:[%s10794_s7 + $0xda8] sm:$0xff] }
0x159d   :  { %5876 = vmatprep.mubr.f32.mxu0 %v5385_v28  ;;  %5951 = vmatprep.mubr.f32.mxu1 %v5387_v29  ;;  %v6804_v43 = vld [vmem:[%s10794_s7 + $0xc28] sm:$0xff]  ;;  %v5205_v28 = vpop.f32.mrf.mxu1  ;;  %v6803_v29 = vld [vmem:[%s10794_s7 + $0xc20] sm:$0xff] }
0x159e   :  { %7512 = vmatpush3.msra.mxu0 %v6814_v27  ;;  %7550 = vmatpush3.msra.mxu1 %v6846_v30  ;;  %v6836_v45 = vld [vmem:[%s10794_s7 + $0xd28] sm:$0xff]  ;;  %v6818_v27 = vld [vmem:[%s10794_s7 + $0xc98] sm:$0xff] }
0x159f   :  { %7513 = vmatprep.subr.mxu0 %v6829_v32  ;;  %7551 = vmatprep.subr.mxu1 %v6861_v33  ;;  %v6850_v30 = vld [vmem:[%s10794_s7 + $0xd98] sm:$0xff]  ;;  %v6647_v32 = vld [vmem:[%s10793_s6 + $0x4c0] ss:$0 sm:$0xff] }
0x15a0   :  { %7514 = vmatpush3.msra.mxu0 %v6813_v35  ;;  %7552 = vmatpush3.msra.mxu1 %v6845_v19  ;;  %v6802_v33 = vld [vmem:[%s10794_s7 + $0xc18] sm:$0xff]  ;;  %v6649_v35 = vld [vmem:[%s10793_s6 + $0x4d0] ss:$0 sm:$0xff]  ;;  %v5130_v19 = vpop.f32.mrf.mxu0 }
0x15a1   :  { %5877 = vmatmul.mubr.f32.gmra.mxu0 %v5384_v36  ;;  %5952 = vmatmul.mubr.f32.gmra.mxu1 %v5386_v60  ;;  %v6849_v36 = vld [vmem:[%s10794_s7 + $0xd90] sm:$0xff]  ;;  %v5207_v60 = vpop.f32.mrf.mxu1 }
0x15a2   :  { %7515 = vmatprep.subr.mxu0 %v6828_v0  ;;  %7553 = vmatprep.subr.mxu1 %v6860_v38  ;;  %v6801_v0 = vld [vmem:[%s10794_s7 + $0xc10] sm:$0xff] }
0x15a3   :  { %7516 = vmatpush3.msra.mxu0 %v6812_v39  ;;  %6021 = vmatprep.mubr.f32.mxu0 %v5373_v9  ;;  %v6833_v38 = vld [vmem:[%s10794_s7 + $0xd10] sm:$0xff]  ;;  %v6816_v39 = vld [vmem:[%s10794_s7 + $0xc88] sm:$0xff] }
0x15a4   :  { %7554 = vmatpush3.msra.mxu1 %v6844_v42  ;;  %6096 = vmatprep.mubr.f32.mxu1 %v5375_v49  ;;  %v6848_v9 = vld [vmem:[%s10794_s7 + $0xd88] sm:$0xff]  ;;  %v5123_v42 = vadd.f32 %v6647_v32, %v10289_v10  ;;  %v5200_v49 = vadd.f32 %v6649_v35, %v10299_v20  ;;  %v6815_v10 = vld [vmem:[%s10794_s7 + $0xc80] sm:$0xff] }
0x15a5   :  { %7517 = vmatprep.subr.mxu0 %v6827_v15  ;;  %7555 = vmatprep.subr.mxu1 %v6859_v52  ;;  %v6800_v15 = vld [vmem:[%s10794_s7 + $0xc08] sm:$0xff]  ;;  %v6847_v20 = vld [vmem:[%s10794_s7 + $0xd80] sm:$0xff] }
0x15a6   :  { %7518 = vmatpush3.msra.mxu0 %v6811_v53  ;;  %7556 = vmatpush3.msra.mxu1 %v6843_v54  ;;  %v6832_v52 = vld [vmem:[%s10794_s7 + $0xd08] sm:$0xff]  ;;  %v10510_v53 = vpop.f32.mrf.mxu0  ;;  %v5131_v54 = vadd.f32 %v10316_v51, %v5130_v19  ;;  %v6894_v51 = vld [vmem:[%s10794_s7 + $0xef8] sm:$0xff]  ;;  %v6873_v19 = vld [vmem:[%s10794_s7 + $0xe50] sm:$0xff] }
0x15a7   :  { %7519 = vmatprep.subr.mxu0 %v6826_v24  ;;  %7557 = vmatprep.subr.mxu1 %v6858_v22  ;;  %v5208_v24 = vadd.f32 %v10322_v59, %v5207_v60  ;;  %v10520_v22 = vpop.f32.mrf.mxu1  ;;  %v6926_v59 = vld [vmem:[%s10794_s7 + $0xff8] sm:$0xff]  ;;  %v6920_v60 = vld [vmem:[%s10794_s7 + $0xfc8] sm:$0xff] }
0x15a8   :  { %7520 = vmatpush3.msra.mxu0 %v6810_v44  ;;  %7558 = vmatpush3.msra.mxu1 %v6842_v57  ;;  %v6799_v44 = vld [vmem:[%s10794_s7 + $0xc00] sm:$0xff] }
0x15a9   :  { %7521 = vmatprep.subr.mxu0 %v6825_v4  ;;  %7559 = vmatprep.subr.mxu1 %v6857_v40  ;;  %v6831_v57 = vld [vmem:[%s10794_s7 + $0xd00] sm:$0xff]  ;;  %v5372_v4 = vmax.f32 %v5123_v42, 0.0  ;;  %v5374_v40 = vmax.f32 %v5200_v49, 0.0 }
0x15aa   :  { %7522 = vmatpush3.msra.mxu0 %v6809_v62  ;;  %7560 = vmatpush3.msra.mxu1 %v6841_v63  ;;  %v10537_v62 = vld [vmem:[%s10793_s6 + $0x4e8] ss:$0 sm:$0xff]  ;;  %v5278_v63 = vpop.f32.mrf.mxu0  ;;  %v6871_v42 = vld [vmem:[%s10794_s7 + $0xe40] sm:$0xff] }
0x15ab   :  { %7523 = vmatprep.subr.mxu0 %v6824_v1  ;;  %7561 = vmatprep.subr.mxu1 %v6856_v2  ;;  %v5129_v1 = vadd.f32 %v6647_v32, %v10452_v56  ;;  %v5206_v2 = vadd.f32 %v6649_v35, %v5205_v28  ;;  %v6908_v56 = vld [vmem:[%s10794_s7 + $0xf68] sm:$0xff]  ;;  %v6923_v28 = vld [vmem:[%s10794_s7 + $0xfe0] sm:$0xff]  ;;  %v6874_v32 = vld [vmem:[%s10794_s7 + $0xe58] sm:$0xff] }
0x15ac   :  { %7524 = vmatpush3.msra.mxu0 %v6808_v3  ;;  %7562 = vmatpush3.msra.mxu1 %v6840_v5  ;;  %v5389_v3 = vmax.f32 %v5131_v54, 0.0  ;;  %v5391_v5 = vmax.f32 %v5208_v24, 0.0  ;;  %v6921_v35 = vld [vmem:[%s10794_s7 + $0xfd0] sm:$0xff]  ;;  %v6903_v49 = vld [vmem:[%s10794_s7 + $0xf40] sm:$0xff] }
0x15ad   :  { %7525 = vmatprep.subr.mxu0 %v6823_v50  ;;  %7563 = vmatprep.subr.mxu1 %v6855_v46  ;;  %v10543_v50 = vld [vmem:[%s10793_s6 + $0x4f8] ss:$0 sm:$0xff]  ;;  %v5355_v46 = vpop.f32.mrf.mxu1  ;;  %v6885_v54 = vld [vmem:[%s10794_s7 + $0xeb0] sm:$0xff] }
0x15ae   :  { %7526 = vmatpush3.msra.mxu0 %v6807_v47  ;;  %7564 = vmatpush3.msra.mxu1 %v6839_v7  ;;  %v6878_v47 = vld [vmem:[%s10794_s7 + $0xe78] sm:$0xff]  ;;  %v6917_v24 = vld [vmem:[%s10794_s7 + $0xfb0] sm:$0xff] }
0x15af   :  { %7527 = vmatprep.subr.mxu0 %v6822_v55  ;;  %7565 = vmatprep.subr.mxu1 %v6854_v11  ;;  %v6910_v7 = vld [vmem:[%s10794_s7 + $0xf78] sm:$0xff]  ;;  %v6893_v55 = vld [vmem:[%s10794_s7 + $0xef0] sm:$0xff] }
0x15b0   :  { %7528 = vmatpush3.msra.mxu0 %v6806_v14  ;;  %7566 = vmatpush3.msra.mxu1 %v6838_v58  ;;  %v6925_v11 = vld [vmem:[%s10794_s7 + $0xff0] sm:$0xff]  ;;  %v5279_v14 = vadd.f32 %v10537_v62, %v5278_v63  ;;  %v6883_v63 = vld [vmem:[%s10794_s7 + $0xea0] sm:$0xff] }
0x15b1   :  { %7529 = vmatprep.subr.mxu0 %v6821_v16  ;;  %7567 = vmatprep.subr.mxu1 %v6853_v17  ;;  %v6877_v58 = vld [vmem:[%s10794_s7 + $0xe70] sm:$0xff]  ;;  %v5356_v17 = vadd.f32 %v10543_v50, %v5355_v46  ;;  %v6899_v46 = vld [vmem:[%s10794_s7 + $0xf20] sm:$0xff] }
0x15b2   :  { %7530 = vmatpush3.msra.mxu0 %v6805_v21  ;;  %7568 = vmatpush3.msra.mxu1 %v6837_v37  ;;  %v6909_v16 = vld [vmem:[%s10794_s7 + $0xf70] sm:$0xff]  ;;  %v5388_v21 = vmax.f32 %v5129_v1, 0.0  ;;  %v5390_v37 = vmax.f32 %v5206_v2, 0.0  ;;  %v6915_v1 = vld [vmem:[%s10794_s7 + $0xfa0] sm:$0xff]  ;;  %v5282_v2 = vpop.f32.mrf.mxu0 }
0x15b3   :  { %7531 = vmatprep.subr.mxu0 %v6820_v41  ;;  %7569 = vmatprep.subr.mxu1 %v6852_v23  ;;  %v6892_v41 = vld [vmem:[%s10794_s7 + $0xee8] sm:$0xff] }
0x15b4   :  { %7532 = vmatpush3.msra.mxu0 %v6804_v43  ;;  %7570 = vmatpush3.msra.mxu1 %v6836_v45  ;;  %v6924_v23 = vld [vmem:[%s10794_s7 + $0xfe8] sm:$0xff]  ;;  %v5377_v45 = vmax.f32 %v5279_v14, 0.0  ;;  %v6898_v14 = vld [vmem:[%s10794_s7 + $0xf18] sm:$0xff] }
0x15b5   :  { %7533 = vmatprep.subr.mxu0 %v6819_v25  ;;  %7571 = vmatprep.subr.mxu1 %v6851_v26  ;;  %v6876_v43 = vld [vmem:[%s10794_s7 + $0xe68] sm:$0xff]  ;;  %v5379_v25 = vmax.f32 %v5356_v17, 0.0  ;;  %v6891_v26 = vld [vmem:[%s10794_s7 + $0xee0] sm:$0xff]  ;;  %v6913_v17 = vld [vmem:[%s10794_s7 + $0xf90] sm:$0xff] }
0x15b6   :  { %7534 = vmatpush3.msra.mxu0 %v6803_v29  ;;  %7572 = vmatpush3.msra.mxu1 %v6835_v61  ;;  %v6875_v29 = vld [vmem:[%s10794_s7 + $0xe60] sm:$0xff] }
0x15b7   :  { %7535 = vmatprep.subr.mxu0 %v6818_v27  ;;  %7573 = vmatprep.subr.mxu1 %v6850_v30  ;;  %v6907_v61 = vld [vmem:[%s10794_s7 + $0xf60] sm:$0xff]  ;;  %v6890_v27 = vld [vmem:[%s10794_s7 + $0xed8] sm:$0xff] }
0x15b8   :  { %7536 = vmatpush3.msra.mxu0 %v6802_v33  ;;  %7574 = vmatpush3.msra.mxu1 %v6834_v34  ;;  %v6922_v30 = vld [vmem:[%s10794_s7 + $0xfd8] sm:$0xff]  ;;  %v6889_v34 = vld [vmem:[%s10794_s7 + $0xed0] sm:$0xff] }
0x15b9   :  { %7537 = vmatprep.subr.mxu0 %v6817_v18  ;;  %7575 = vmatprep.subr.mxu1 %v6849_v36  ;;  %v6906_v33 = vld [vmem:[%s10794_s7 + $0xf58] sm:$0xff]  ;;  %v6905_v18 = vld [vmem:[%s10794_s7 + $0xf50] sm:$0xff]  ;;  %v6888_v36 = vld [vmem:[%s10794_s7 + $0xec8] sm:$0xff] }
0x15ba   :  { %7538 = vmatpush3.msra.mxu0 %v6801_v0  ;;  %7576 = vmatpush3.msra.mxu1 %v6833_v38  ;;  %v6872_v0 = vld [vmem:[%s10794_s7 + $0xe48] sm:$0xff] }
0x15bb   :  { %7539 = vmatprep.subr.mxu0 %v6816_v39  ;;  %7577 = vmatprep.subr.mxu1 %v6848_v9  ;;  %v6904_v38 = vld [vmem:[%s10794_s7 + $0xf48] sm:$0xff]  ;;  %v6887_v39 = vld [vmem:[%s10794_s7 + $0xec0] sm:$0xff] }
0x15bc   :  { %7540 = vmatpush3.msra.mxu0 %v6800_v15  ;;  %7578 = vmatpush3.msra.mxu1 %v6832_v52  ;;  %v6919_v9 = vld [vmem:[%s10794_s7 + $0xfc0] sm:$0xff]  ;;  %v6886_v15 = vld [vmem:[%s10794_s7 + $0xeb8] sm:$0xff] }
0x15bd   :  { %7541 = vmatprep.subr.mxu0 %v6815_v10  ;;  %7579 = vmatprep.subr.mxu1 %v6847_v20  ;;  %v6918_v52 = vld [vmem:[%s10794_s7 + $0xfb8] sm:$0xff] }
0x15be   :  { %7542 = vmatpush3.msra.mxu0 %v6799_v44  ;;  %7580 = vmatpush3.msra.mxu1 %v6831_v57  ;;  %v6870_v10 = vld [vmem:[%s10794_s7 + $0xe38] sm:$0xff]  ;;  %v6869_v44 = vld [vmem:[%s10794_s7 + $0xe30] sm:$0xff] }
0x15bf   :  { %6022 = vmatmul.mubr.f32.vlgmr.msra.gmra.mxu0 %v5372_v4  ;;  %6097 = vmatmul.mubr.f32.vlgmr.msra.gmra.mxu1 %v5374_v40  ;;  %v6902_v20 = vld [vmem:[%s10794_s7 + $0xf38] sm:$0xff]  ;;  %v6901_v57 = vld [vmem:[%s10794_s7 + $0xf30] sm:$0xff]  ;;  %v6884_v4 = vld [vmem:[%s10794_s7 + $0xea8] sm:$0xff] }
0x15c0   :  { %7587 = vmatprep.subr.mxu0 %v6894_v51  ;;  %7625 = vmatprep.subr.mxu1 %v6926_v59  ;;  %v6916_v40 = vld [vmem:[%s10794_s7 + $0xfa8] sm:$0xff] }
0x15c1   :  { %6026 = vmatprep.mubr.f32.mxu0 %v5389_v3  ;;  %6101 = vmatprep.mubr.f32.mxu1 %v5391_v5  ;;  %v6868_v51 = vld [vmem:[%s10794_s7 + $0xe28] sm:$0xff]  ;;  %v5359_v3 = vpop.f32.mrf.mxu1  ;;  %v6867_v5 = vld [vmem:[%s10794_s7 + $0xe20] sm:$0xff] }
0x15c2   :  { %7588 = vmatpush3.msra.mxu0 %v6878_v47  ;;  %7626 = vmatpush3.msra.mxu1 %v6910_v7  ;;  %v6900_v59 = vld [vmem:[%s10794_s7 + $0xf28] sm:$0xff]  ;;  %v6882_v47 = vld [vmem:[%s10794_s7 + $0xe98] sm:$0xff] }
0x15c3   :  { %7589 = vmatprep.subr.mxu0 %v6893_v55  ;;  %7627 = vmatprep.subr.mxu1 %v6925_v11  ;;  %v6914_v7 = vld [vmem:[%s10794_s7 + $0xf98] sm:$0xff]  ;;  %v6651_v55 = vld [vmem:[%s10793_s6 + $0x4e0] ss:$0 sm:$0xff] }
0x15c4   :  { %7590 = vmatpush3.msra.mxu0 %v6877_v58  ;;  %7628 = vmatpush3.msra.mxu1 %v6909_v16  ;;  %v6866_v11 = vld [vmem:[%s10794_s7 + $0xe18] sm:$0xff]  ;;  %v6653_v58 = vld [vmem:[%s10793_s6 + $0x4f0] ss:$0 sm:$0xff] }
0x15c5   :  { %6027 = vmatmul.mubr.f32.gmra.mxu0 %v5388_v21  ;;  %6102 = vmatmul.mubr.f32.gmra.mxu1 %v5390_v37  ;;  %v6881_v16 = vld [vmem:[%s10794_s7 + $0xe90] sm:$0xff]  ;;  %v5284_v21 = vpop.f32.mrf.mxu0  ;;  %v5361_v37 = vpop.f32.mrf.mxu1 }
0x15c6   :  { %7591 = vmatprep.subr.mxu0 %v6892_v41  ;;  %7629 = vmatprep.subr.mxu1 %v6924_v23  ;;  %v6865_v41 = vld [vmem:[%s10794_s7 + $0xe10] sm:$0xff] }
0x15c7   :  { %7592 = vmatpush3.msra.mxu0 %v6876_v43  ;;  %6171 = vmatprep.mubr.f32.mxu0 %v5377_v45  ;;  %v6897_v23 = vld [vmem:[%s10794_s7 + $0xf10] sm:$0xff]  ;;  %v6880_v43 = vld [vmem:[%s10794_s7 + $0xe88] sm:$0xff] }
0x15c8   :  { %7630 = vmatpush3.msra.mxu1 %v6908_v56  ;;  %6246 = vmatprep.mubr.f32.mxu1 %v5379_v25  ;;  %v6912_v45 = vld [vmem:[%s10794_s7 + $0xf88] sm:$0xff]  ;;  %v5277_v56 = vadd.f32 %v6651_v55, %v10510_v53  ;;  %v5354_v25 = vadd.f32 %v6653_v58, %v10520_v22  ;;  %v6879_v53 = vld [vmem:[%s10794_s7 + $0xe80] sm:$0xff] }
0x15c9   :  { %7593 = vmatprep.subr.mxu0 %v6891_v26  ;;  %7631 = vmatprep.subr.mxu1 %v6923_v28  ;;  %v6864_v26 = vld [vmem:[%s10794_s7 + $0xe08] sm:$0xff]  ;;  %v6911_v22 = vld [vmem:[%s10794_s7 + $0xf80] sm:$0xff] }
0x15ca   :  { %7594 = vmatpush3.msra.mxu0 %v6875_v29  ;;  %7632 = vmatpush3.msra.mxu1 %v6907_v61  ;;  %v6896_v28 = vld [vmem:[%s10794_s7 + $0xf08] sm:$0xff]  ;;  %v5285_v29 = vadd.f32 %v10537_v62, %v5284_v21  ;;  %v5362_v61 = vadd.f32 %v10543_v50, %v5361_v37  ;;  %v6895_v62 = vld [vmem:[%s10794_s7 + $0xf00] sm:$0xff]  ;;  %v5376_v50 = vmax.f32 %v5277_v56, 0.0 }
0x15cb   :  { %7595 = vmatprep.subr.mxu0 %v6890_v27  ;;  %7633 = vmatprep.subr.mxu1 %v6922_v30  ;;  %v6863_v27 = vld [vmem:[%s10794_s7 + $0xe00] sm:$0xff]  ;;  %v5378_v30 = vmax.f32 %v5354_v25, 0.0 }
0x15cc   :  { %7596 = vmatpush3.msra.mxu0 %v6874_v32  ;;  %7634 = vmatpush3.msra.mxu1 %v6906_v33  ;;  %v5283_v32 = vadd.f32 %v6651_v55, %v5282_v2  ;;  %v5360_v33 = vadd.f32 %v6653_v58, %v5359_v3 }
0x15cd   :  { %7597 = vmatprep.subr.mxu0 %v6889_v34  ;;  %7635 = vmatprep.subr.mxu1 %v6921_v35  ;;  %v5393_v34 = vmax.f32 %v5285_v29, 0.0  ;;  %v5395_v35 = vmax.f32 %v5362_v61, 0.0 }
0x15ce   :  { %7598 = vmatpush3.msra.mxu0 %v6873_v19  ;;  %7636 = vmatpush3.msra.mxu1 %v6905_v18  ;;  %v5392_v19 = vmax.f32 %v5283_v32, 0.0  ;;  %v5394_v18 = vmax.f32 %v5360_v33, 0.0 }
0x15cf   :  { %7599 = vmatprep.subr.mxu0 %v6888_v36  ;;  %7637 = vmatprep.subr.mxu1 %v6920_v60 }
0x15d0   :  { %7600 = vmatpush3.msra.mxu0 %v6872_v0  ;;  %7638 = vmatpush3.msra.mxu1 %v6904_v38 }
0x15d1   :  { %7601 = vmatprep.subr.mxu0 %v6887_v39  ;;  %7639 = vmatprep.subr.mxu1 %v6919_v9 }
0x15d2   :  { %7602 = vmatpush3.msra.mxu0 %v6871_v42  ;;  %7640 = vmatpush3.msra.mxu1 %v6903_v49 }
0x15d3   :  { %7603 = vmatprep.subr.mxu0 %v6886_v15  ;;  %7641 = vmatprep.subr.mxu1 %v6918_v52 }
0x15d4   :  { %7604 = vmatpush3.msra.mxu0 %v6870_v10  ;;  %7642 = vmatpush3.msra.mxu1 %v6902_v20 }
0x15d5   :  { %7605 = vmatprep.subr.mxu0 %v6885_v54  ;;  %7643 = vmatprep.subr.mxu1 %v6917_v24 }
0x15d6   :  { %7606 = vmatpush3.msra.mxu0 %v6869_v44  ;;  %7644 = vmatpush3.msra.mxu1 %v6901_v57  ;;  %v10746_v57 = vld [vmem:[%s10792_s8 + $0x8] sm:$0x3f] }
0x15d7   :  { %7607 = vmatprep.subr.mxu0 %v6884_v4  ;;  %7645 = vmatprep.subr.mxu1 %v6916_v40  ;;  %v5656_v4 = vrot.slane %v10746_v57, %v2575_v48 }
0x15d8   :  { %7608 = vmatpush3.msra.mxu0 %v6868_v51  ;;  %7646 = vmatpush3.msra.mxu1 %v6900_v59 }
0x15d9   :  { %7609 = vmatprep.subr.mxu0 %v6883_v63  ;;  %7647 = vmatprep.subr.mxu1 %v6915_v1 }
0x15da   :  { %7610 = vmatpush3.msra.mxu0 %v6867_v5  ;;  %7648 = vmatpush3.msra.mxu1 %v6899_v46 }
0x15db   :  { %7611 = vmatprep.subr.mxu0 %v6882_v47  ;;  %7649 = vmatprep.subr.mxu1 %v6914_v7 }
0x15dc   :  { %7612 = vmatpush3.msra.mxu0 %v6866_v11  ;;  %7650 = vmatpush3.msra.mxu1 %v6898_v14 }
0x15dd   :  { %7613 = vmatprep.subr.mxu0 %v6881_v16  ;;  %7651 = vmatprep.subr.mxu1 %v6913_v17 }
0x15de   :  { %7614 = vmatpush3.msra.mxu0 %v6865_v41  ;;  %7652 = vmatpush3.msra.mxu1 %v6897_v23 }
0x15df   :  { %7615 = vmatprep.subr.mxu0 %v6880_v43  ;;  %7653 = vmatprep.subr.mxu1 %v6912_v45 }
0x15e0   :  { %7616 = vmatpush3.msra.mxu0 %v6864_v26  ;;  %7654 = vmatpush3.msra.mxu1 %v6896_v28 }
0x15e1   :  { %7617 = vmatprep.subr.mxu0 %v6879_v53  ;;  %7655 = vmatprep.subr.mxu1 %v6911_v22 }
0x15e2   :  { %7618 = vmatpush3.msra.mxu0 %v6863_v27  ;;  %7656 = vmatpush3.msra.mxu1 %v6895_v62 }
0x15e3   :  { %6172 = vmatmul.mubr.f32.vlgmr.msra.gmra.mxu0 %v5376_v50  ;;  %6247 = vmatmul.mubr.f32.vlgmr.msra.gmra.mxu1 %v5378_v30 }
0x15e4   :  { %6176 = vmatprep.mubr.f32.mxu0 %v5393_v34  ;;  %6251 = vmatprep.mubr.f32.mxu1 %v5395_v35 }
0x15e7   :  { %6177 = vmatmul.mubr.f32.gmra.mxu0 %v5392_v19  ;;  %6252 = vmatmul.mubr.f32.gmra.mxu1 %v5394_v18 }
0x1638   :  { %v7391_v36 = vpop.f32.mrf.mxu0  ;;  %v7429_v60 = vpop.f32.mrf.mxu1 }
0x163a   :  { %v7392_v0 = vpop.f32.mrf.mxu0  ;;  %v7430_v38 = vpop.f32.mrf.mxu1 }
0x163b   :  { %v7393_v40 = vadd.f32 %v7392_v0, %v7391_v36  ;;  %v7431_v5 = vadd.f32 %v7430_v38, %v7429_v60 }
0x163d   :  { %v5724_v1 = vadd.f32 %v7393_v40, %v5656_v4 }
0x163e   :  { %v7394_v39 = vpop.f32.mrf.mxu0  ;;  %v7432_v9 = vpop.f32.mrf.mxu1 }
0x163f   :  { %v5799_v7 = vadd.f32 %v7431_v5, %v5724_v1  ;;  %v6299_v1 = vld [vmem:[%s10795_s9 + $0x10] sm:$0xff] }
0x1640   :  { %v7395_v42 = vpop.f32.mrf.mxu0  ;;  %v7433_v49 = vpop.f32.mrf.mxu1 }
0x1641   :  { %v7396_v2 = vadd.f32 %v7395_v42, %v7394_v39  ;;  %v7434_v14 = vadd.f32 %v7433_v49, %v7432_v9 }
0x1643   :  { %v5729_v55 = vadd.f32 %v7396_v2, %v5656_v4  ;;  %v6298_v2 = vld [vmem:[%s10795_s9 + $0x8] sm:$0xff] }
0x1645   :  { %v5804_v21 = vadd.f32 %v7434_v14, %v5729_v55  ;;  %v6288_v14 = vrot.slane %v10746_v57, %v3207_v12  ;;  %v6927_v12 = vld [vmem:[%s10795_s9 + $0x20] ss:$0 sm:$0xff] }
0x165b   :  { %v7467_v15 = vpop.f32.mrf.mxu0  ;;  %v7505_v52 = vpop.f32.mrf.mxu1 }
0x165d   :  { %v7468_v10 = vpop.f32.mrf.mxu0  ;;  %v7506_v20 = vpop.f32.mrf.mxu1 }
0x165e   :  { %v7469_v46 = vadd.f32 %v7468_v10, %v7467_v15  ;;  %v7507_v37 = vadd.f32 %v7506_v20, %v7505_v52 }
0x1660   :  { %v5874_v58 = vadd.f32 %v7469_v46, %v5799_v7 }
0x1661   :  { %v7470_v54 = vpop.f32.mrf.mxu0  ;;  %v7508_v24 = vpop.f32.mrf.mxu1 }
0x1662   :  { %v5949_v23 = vadd.f32 %v7507_v37, %v5874_v58 }
0x1663   :  { %v7471_v44 = vpop.f32.mrf.mxu0  ;;  %v7509_v51 = vpop.f32.mrf.mxu1 }
0x1664   :  { %v7472_v16 = vadd.f32 %v7471_v44, %v7470_v54  ;;  %v7510_v56 = vadd.f32 %v7509_v51, %v7508_v24 }
0x1666   :  { %v5879_v43 = vadd.f32 %v7472_v16, %v5804_v21 }
0x1668   :  { %v5954_v61 = vadd.f32 %v7510_v56, %v5879_v43 }
0x167f   :  { %v7543_v59 = vpop.f32.mrf.mxu0  ;;  %v7581_v63 = vpop.f32.mrf.mxu1 }
0x1681   :  { %v7544_v3 = vpop.f32.mrf.mxu0  ;;  %v7582_v47 = vpop.f32.mrf.mxu1 }
0x1682   :  { %v7545_v48 = vadd.f32 %v7544_v3, %v7543_v59  ;;  %v7583_v53 = vadd.f32 %v7582_v47, %v7581_v63  ;;  %v6297_v3 = vld [vmem:[%s10795_s9] sm:$0xff] }
0x1684   :  { %v6024_v25 = vadd.f32 %v7545_v48, %v5949_v23 }
0x1685   :  { %v7546_v11 = vpop.f32.mrf.mxu0  ;;  %v7584_v17 = vpop.f32.mrf.mxu1 }
0x1686   :  { %v6099_v62 = vadd.f32 %v7583_v53, %v6024_v25 }
0x1687   :  { %v7547_v41 = vpop.f32.mrf.mxu0  ;;  %v7585_v45 = vpop.f32.mrf.mxu1 }
0x1688   :  { %v7548_v26 = vadd.f32 %v7547_v41, %v7546_v11  ;;  %v7586_v34 = vadd.f32 %v7585_v45, %v7584_v17  ;;  %v6294_v17 = vrot.slane %v10746_v57, %v3213_v13 }
0x168a   :  { %v6029_v50 = vadd.f32 %v7548_v26, %v5954_v61 }
0x168c   :  { %v6104_v60 = vadd.f32 %v7586_v34, %v6029_v50 }
0x16a3   :  { %v7619_v28 = vpop.f32.mrf.mxu0  ;;  %v7657_v29 = vpop.f32.mrf.mxu1 }
0x16a5   :  { %v7620_v22 = vpop.f32.mrf.mxu0  ;;  %v7658_v27 = vpop.f32.mrf.mxu1 }
0x16a6   :  { %v7621_v30 = vadd.f32 %v7620_v22, %v7619_v28  ;;  %v7659_v19 = vadd.f32 %v7658_v27, %v7657_v29 }
0x16a7   :  { %v7622_v32 = vpop.f32.mrf.mxu0  ;;  %v7660_v33 = vpop.f32.mrf.mxu1 }
0x16a8   :  { %v6174_v35 = vadd.f32 %v7621_v30, %v6099_v62 }
0x16a9   :  { %v7623_v18 = vpop.f32.mrf.mxu0  ;;  %v7661_v36 = vpop.f32.mrf.mxu1 }
0x16aa   :  { %v6249_v0 = vadd.f32 %v7659_v19, %v6174_v35  ;;  %v7624_v38 = vadd.f32 %v7623_v18, %v7622_v32  ;;  %v7662_v9 = vadd.f32 %v7661_v36, %v7660_v33 }
0x16ac   :  { %v6179_v39 = vadd.f32 %v7624_v38, %v6104_v60  ;;  %v6257_v42 = vadd.f32 %v6249_v0, %v9691_v6 }
0x16ae   :  { %v6254_v49 = vadd.f32 %v7662_v9, %v6179_v39  ;;  %v6259_v15 = vsel %vm148_vm1, %v6257_v42, 0.0 }
0x16af   :  { %6260 = vadd.xlane.f32.xlu0 %v6259_v15 }
0x16b0   :  { %v6258_v52 = vadd.f32 %v6254_v49, %v9715_v31  ;;  %v6300_v31 = vld [vmem:[%s10795_s9 + $0x18] sm:$0xff] }
0x16b1   :  { %7918 = vmatprep.subr.mxu0 %v6300_v31 }
0x16b2   :  { %v6262_v10 = vsel %vm148_vm1, %v6258_v52, 0.0  ;;  %7919 = vmatpush3.msra.mxu0 %v6300_v31 }
0x16b3   :  { %6263 = vadd.xlane.f32.xlu1 %v6262_v10  ;;  %7920 = vmatprep.subr.mxu0 %v6299_v1 }
0x16b4   :  { %7921 = vmatpush3.msra.mxu0 %v6299_v1 }
0x16b5   :  { %7922 = vmatprep.subr.mxu0 %v6298_v2 }
0x16b6   :  { %7923 = vmatpush3.msra.mxu0 %v6298_v2 }
0x16b7   :  { %7924 = vmatprep.subr.mxu0 %v6297_v3 }
0x16b8   :  { %7925 = vmatpush3.msra.mxu0 %v6297_v3 }
0x1738   :  { %v6261_v20 = vpop.xlane.xlu0 %6260 }
0x1739   :  { %v6265_v54 = vmul.f32 0.03125, %v6261_v20 }
0x173b   :  { %v6267_v24 = vsub.f32 %v6257_v42, %v6265_v54 }
0x173c   :  { %v6264_v44 = vpop.xlane.xlu1 %6263 }
0x173d   :  { %v6266_v4 = vmul.f32 0.03125, %v6264_v44  ;;  %v6269_v40 = vmul.f32 %v6267_v24, %v6267_v24 }
0x173f   :  { %v6268_v51 = vsub.f32 %v6258_v52, %v6266_v4  ;;  %v6271_v59 = vsel %vm148_vm1, %v6269_v40, 0.0 }
0x1740   :  { %6272 = vadd.xlane.f32.xlu0 %v6271_v59 }
0x1741   :  { %v6270_v6 = vmul.f32 %v6268_v51, %v6268_v51 }
0x1743   :  { %v6274_v63 = vsel %vm148_vm1, %v6270_v6, 0.0 }
0x1744   :  { %6275 = vadd.xlane.f32.xlu1 %v6274_v63 }
0x17c9   :  { %v6273_v5 = vpop.xlane.xlu0 %6272 }
0x17ca   :  { %v6277_v46 = vmul.f32 0.03125, %v6273_v5 }
0x17cc   :  { %v6279_v47 = vadd.f32 1e-05, %v6277_v46 }
0x17cd   :  { %v6276_v7 = vpop.xlane.xlu1 %6275 }
0x17ce   :  { %7975 = vrsqrt.f32 %v6279_v47  ;;  %v6278_v55 = vmul.f32 0.03125, %v6276_v7 }
0x17d0   :  { %v6280_v11 = vadd.f32 1e-05, %v6278_v55 }
0x17d2   :  { %7977 = vrsqrt.f32 %v6280_v11 }
0x17db   :  { %v7976_v58 = vpop.eup %7975 }
0x17dc   :  { %v6283_v16 = vmul.f32 %v7976_v58, %v6267_v24 }
0x17de   :  { %v6289_v21 = vmul.f32 %v6288_v14, %v6283_v16 }
0x17df   :  { %v7978_v37 = vpop.eup %7977 }
0x17e0   :  { %v6284_v48 = vmul.f32 %v7978_v37, %v6268_v51  ;;  %v6295_v41 = vadd.f32 %v6294_v17, %v6289_v21 }
0x17e2   :  { %v6290_v23 = vmul.f32 %v6288_v14, %v6284_v48  ;;  %7926 = vmatprep.mubr.msk.f32.mxu0 %vm148_vm1, %v6295_v41 }
0x17e4   :  { %v6296_v43 = vadd.f32 %v6294_v17, %v6290_v23 }
0x17e6   :  { %7927 = vmatmul.mubr.msk.f32.vlgmr.msra.gmra.mxu0 %vm148_vm1, %v6296_v43 }
0x18a6   :  { %v7928_v45 = vpop.f32.mrf.mxu0 }
0x18a7   :  { %v6384_v56 = vadd.f32 %v7928_v45, %v6927_v12 }
0x18a8   :  { %v6378_v25 = vpop.f32.mrf.mxu0 }
0x18a9   :  { %6388 = vst [vmem:[%s10796_s10 + $0x8] sm:$0xff] %v6384_v56  ;;  %v6379_v8 = vadd.f32 %v6927_v12, %v6378_v25 }
0x18ab   :  { %6387 = vst [vmem:[%s10796_s10] sm:$0xff] %v6379_v8 }

</bundles_post_ra>
